<compile_context>
chip_gen: v5e
topology: v5e:2x2
jax: 0.10.0
libtpu: 0.0.40
codegen_flags: <defaults>
</compile_context>

<pallas_src>
import functools

import jax
import jax.numpy as jnp
from jax import lax
from jax.experimental import pallas as pl
from jax.experimental.pallas import tpu as pltpu

NEG_SLOPE = 0.01   # F.leaky_relu default
BN_EPS = 1e-5      # nn.BatchNorm3d default


# ---------------------------------------------------------------------------
# Weight preparation: fold the kw taps (and the W axis) into a banded weight.
# band[kd*3+kh, (w+kw)*Cin + ci, w*Cout + co] = W_pt[co, ci, kd, kh, kw]
# so each (kd, kh) pair becomes one (TD*H, (W+2)*C) @ ((W+2)*C, W*C) matmul.
# ---------------------------------------------------------------------------
def _band_weights(w_pt, W):
    C_out, C_in = int(w_pt.shape[0]), int(w_pt.shape[1])
    wt = jnp.transpose(w_pt, (2, 3, 4, 1, 0))            # (kd, kh, kw, Cin, Cout)
    band = jnp.zeros((3, 3, (W + 2) * C_in, W * C_out), jnp.float32)
    for kw in range(3):
        for w in range(W):
            band = band.at[:, :, (w + kw) * C_in:(w + kw + 1) * C_in,
                           w * C_out:(w + 1) * C_out].set(wt[:, :, kw])
    return band.reshape(9, (W + 2) * C_in, W * C_out).astype(jnp.bfloat16)


# ---------------------------------------------------------------------------
# Kernel 1: 3x3x3 "same" conv (no bias) on one (n, d-tile) block
#           + per-tile BN partial statistics.
# ---------------------------------------------------------------------------
def _conv3x3x3_bn_stats_kernel(xc_ref, xu_ref, xl_ref, w_ref, o_ref, stats_ref,
                               xp_ref, *, TD, H, W, C):
    t = pl.program_id(1)
    n_t = pl.num_programs(1)
    WC = W * C

    # Build the zero-padded halo tile in VMEM (replaces the old HBM jnp.pad).
    # D-halo planes arrive as their own auto-pipelined blocks; the H/W halo is
    # simply the zero border of the scratch (the row sits at lane offset C).
    xp_ref[...] = jnp.zeros_like(xp_ref)
    xp_ref[1:TD + 1, 1:H + 1, C:C + WC] = xc_ref[0]

    @pl.when(t > 0)
    def _():
        xp_ref[0:1, 1:H + 1, C:C + WC] = xu_ref[0]

    @pl.when(t < n_t - 1)
    def _():
        xp_ref[TD + 1:TD + 2, 1:H + 1, C:C + WC] = xl_ref[0]

    # 9 large-K matmuls: K=(W+2)*C, N=W*C, M=TD*H.  Only contiguous slices of
    # the padded tile are read (kw is folded into the banded weight); the
    # accumulator stays in registers (f32) and is written exactly once.
    acc = None
    for kd in range(3):
        for kh in range(3):
            lhs = xp_ref[kd:kd + TD, kh:kh + H, :].reshape(TD * H, (W + 2) * C)
            part = jnp.dot(lhs, w_ref[kd * 3 + kh],
                           preferred_element_type=jnp.float32)
            acc = part if acc is None else acc + part

    # Lane-dense store of the conv output (last block dim = W*C).
    o_ref[...] = acc.reshape(1, TD, H, WC).astype(o_ref.dtype)

    # Per-tile BN partial statistics (per output lane = (w, c); the fold over
    # w and over tiles happens in plain JAX afterwards).
    stats_ref[0, 0, 0:1, :] = jnp.sum(acc, axis=0, keepdims=True)
    stats_ref[0, 0, 1:2, :] = jnp.sum(acc * acc, axis=0, keepdims=True)


def conv3d_bn_stats(x4, w_band, *, C, TD):
    """x4: (N, D, H, W*C) bf16 (NDHWC flattened over (W, C)).
    w_band: (9, (W+2)*C, W*C) bf16.
    Returns y (N, D, H, W*C) f32 and stats (N, D//TD, 2, W*C) f32."""
    N, D, H, WC = x4.shape
    W = WC // C
    WPC = (W + 2) * C
    assert WC == W * C and D % TD == 0, (x4.shape, C, TD)
    assert w_band.shape == (9, WPC, WC), (w_band.shape, WPC, WC)
    Dt = D // TD

    kern = functools.partial(_conv3x3x3_bn_stats_kernel, TD=TD, H=H, W=W, C=C)

    return pl.pallas_call(
        kern,
        out_shape=(
            jax.ShapeDtypeStruct((N, D, H, WC), jnp.float32),
            jax.ShapeDtypeStruct((N, Dt, 2, WC), jnp.float32),
        ),
        grid=(N, Dt),
        in_specs=[
            # centre D-tile
            pl.BlockSpec((1, TD, H, WC), lambda n, t: (n, t, 0, 0)),
            # upper / lower D-halo planes (index clamped at the volume edges;
            # the kernel skips them there via pl.when, the pad stays zero)
            pl.BlockSpec((1, 1, H, WC),
                         lambda n, t: (n, jnp.maximum(t * TD - 1, 0), 0, 0)),
            pl.BlockSpec((1, 1, H, WC),
                         lambda n, t: (n, jnp.minimum((t + 1) * TD, D - 1), 0, 0)),
            # banded weights (resident)
            pl.BlockSpec((9, WPC, WC), lambda n, t: (0, 0, 0)),
        ],
        out_specs=(
            pl.BlockSpec((1, TD, H, WC), lambda n, t: (n, t, 0, 0)),
            pl.BlockSpec((1, 1, 2, WC), lambda n, t: (n, t, 0, 0)),
        ),
        scratch_shapes=[pltpu.VMEM((TD + 2, H + 2, WPC), jnp.bfloat16)],
        compiler_params=pltpu.CompilerParams(
            # both axes are independent -> megacore-friendly on v7x
            dimension_semantics=("parallel", "parallel"),
            vmem_limit_bytes=48 * 1024 * 1024),
    )(x4, x4, x4, w_band)


# ---------------------------------------------------------------------------
# Kernel 2: fused per-channel affine (folded BatchNorm) + LeakyReLU,
#           tiled over lane-dense (rows, L) slabs.
# ---------------------------------------------------------------------------
def _bn_leaky_kernel(y_ref, scale_ref, shift_ref, o_ref):
    y = y_ref[...] * scale_ref[...] + shift_ref[...]
    o_ref[...] = jnp.where(y >= 0.0, y, NEG_SLOPE * y).astype(o_ref.dtype)


def _lane_width(C, total):
    L = C
    while L % 128:                      # smallest multiple of C that is lane-dense
        L += C
    while 2 * L <= 2048 and total % (2 * L) == 0 and (total // (2 * L)) % 16 == 0:
        L *= 2                          # widen while rows stay nicely tiled
    assert total % L == 0 and (total // L) % 16 == 0, (C, total, L)
    return L


def _row_tile(rows):
    for tr in (8192, 4096, 2048, 1024, 512, 256, 128, 64, 32, 16):
        if rows % tr == 0 and rows // tr >= 2:
            return tr
    return rows


def bn_leaky_relu(y, scale, shift, out_dtype):
    """y: f32 array whose fastest-varying axis cycles through the C channels."""
    C = scale.shape[0]
    total = y.size
    L = _lane_width(C, total)
    rows = total // L
    TR = _row_tile(rows)

    y2 = y.reshape(rows, L)
    scale_row = jnp.tile(scale, L // C).reshape(1, L).astype(jnp.float32)
    shift_row = jnp.tile(shift, L // C).reshape(1, L).astype(jnp.float32)

    return pl.pallas_call(
        _bn_leaky_kernel,
        out_shape=jax.ShapeDtypeStruct((rows, L), out_dtype),
        grid=(rows // TR,),
        in_specs=[
            pl.BlockSpec((TR, L), lambda i: (i, 0)),
            pl.BlockSpec((1, L), lambda i: (0, 0)),
            pl.BlockSpec((1, L), lambda i: (0, 0)),
        ],
        out_specs=pl.BlockSpec((TR, L), lambda i: (i, 0)),
        compiler_params=pltpu.CompilerParams(
            dimension_semantics=("parallel",),
            vmem_limit_bytes=32 * 1024 * 1024),
    )(y2, scale_row, shift_row)


# ---------------------------------------------------------------------------
# ResidualInner forward
# ---------------------------------------------------------------------------
def _fold_stats(stats, count, W, C):
    N, Dt = stats.shape[0], stats.shape[1]
    s = stats.reshape(N, Dt, 2, W, C).sum(axis=(0, 1, 3))   # (2, C), f32
    mean = s[0] / count
    var = s[1] / count - mean * mean                        # biased batch variance
    return mean, var


@jax.jit
def residual_inner_forward(x_ncdhw, params):
    N, C, D, H, W = x_ncdhw.shape
    count = float(N * D * H * W)
    TD = 8 if D % 8 == 0 else D

    # NCDHW -> NDHWC -> (N, D, H, W*C), bf16 for the MXU (f32 accumulation).
    x = jnp.transpose(x_ncdhw, (0, 2, 3, 4, 1))
    x = x.reshape(N, D, H, W * C).astype(jnp.bfloat16)

    def block(x4, w_pt, gamma, beta, out_dtype):
        w_band = _band_weights(w_pt, W)
        y, stats = conv3d_bn_stats(x4, w_band, C=C, TD=TD)
        mean, var = _fold_stats(stats, count, W, C)
        scale = gamma * lax.rsqrt(var + BN_EPS)
        shift = beta - mean * scale
        return bn_leaky_relu(y, scale, shift, out_dtype)     # (rows, L)

    h1 = block(x, params["w1"], params["gamma1"], params["beta1"], jnp.bfloat16)
    h2 = block(h1.reshape(N, D, H, W * C), params["w2"],
               params["gamma2"], params["beta2"], jnp.float32)

    out = h2.reshape(N, D, H, W, C)
    return jnp.transpose(out, (0, 4, 1, 2, 3))               # -> NCDHW


# Pure-JAX reference with the same precision policy (bf16 conv inputs,
# f32 accumulation and f32 BN) for the correctness check.
def reference_forward(x_ncdhw, params):
    def conv(x, w_pt):
        return lax.conv_general_dilated(
            x.astype(jnp.bfloat16), w_pt.astype(jnp.bfloat16),
            window_strides=(1, 1, 1), padding="SAME",
            dimension_numbers=("NCDHW", "OIDHW", "NCDHW"),
            preferred_element_type=jnp.float32)

    def bn_act(y, gamma, beta):
        mean = jnp.mean(y, axis=(0, 2, 3, 4), keepdims=True)
        var = jnp.var(y, axis=(0, 2, 3, 4), keepdims=True)
        g = gamma.reshape(1, -1, 1, 1, 1)
        b = beta.reshape(1, -1, 1, 1, 1)
        yh = (y - mean) / jnp.sqrt(var + BN_EPS) * g + b
        return jnp.where(yh >= 0, yh, NEG_SLOPE * yh)

    h = bn_act(conv(x_ncdhw, params["w1"]), params["gamma1"], params["beta1"])
    h = bn_act(conv(h, params["w2"]), params["gamma2"], params["beta2"])
    return h


if __name__ == "__main__":
    N, C, D, H, W = 2, 8, 16, 16, 16          # W*C = 128 -> lane-dense tiles
    key = jax.random.PRNGKey(0)
    ks = jax.random.split(key, 7)

    x = jax.random.normal(ks[0], (N, C, D, H, W), jnp.float32)
    fan_in = C * 27
    params = dict(
        w1=jax.random.normal(ks[1], (C, C, 3, 3, 3), jnp.float32) / jnp.sqrt(fan_in),
        w2=jax.random.normal(ks[2], (C, C, 3, 3, 3), jnp.float32) / jnp.sqrt(fan_in),
        gamma1=1.0 + 0.1 * jax.random.normal(ks[3], (C,), jnp.float32),
        beta1=0.1 * jax.random.normal(ks[4], (C,), jnp.float32),
        gamma2=1.0 + 0.1 * jax.random.normal(ks[5], (C,), jnp.float32),
        beta2=0.1 * jax.random.normal(ks[6], (C,), jnp.float32),
    )

    out = jax.block_until_ready(residual_inner_forward(x, params))
    ref = jax.block_until_ready(reference_forward(x, params))

    assert out.shape == (N, C, D, H, W), out.shape
    max_err = float(jnp.max(jnp.abs(out - ref)))
    # Tolerance covers bf16 rounding divergence of the layer-1 activations
    # (kernel and reference round slightly different f32 values to bf16).
    assert max_err < 1e-2, f"mismatch vs reference: max_err={max_err}"
    print("KERNEL_OK")
</pallas_src>

<mosaic_0001>
module attributes {stable_mosaic.version = 11 : i64} {
  func.func @_conv3x3x3_bn_stats_kernel(%arg0: i32, %arg1: i32, %arg2: memref<1x8x16x128xbf16, #tpu.memory_space<vmem>>, %arg3: memref<1x1x16x128xbf16, #tpu.memory_space<vmem>>, %arg4: memref<1x1x16x128xbf16, #tpu.memory_space<vmem>>, %arg5: memref<9x144x128xbf16, #tpu.memory_space<vmem>>, %arg6: memref<1x8x16x128xf32, #tpu.memory_space<vmem>>, %arg7: memref<1x1x2x128xf32, #tpu.memory_space<vmem>>, %arg8: memref<10x18x144xbf16, #tpu.memory_space<vmem>>) attributes {dimension_semantics = [#tpu.dimension_semantics<parallel>, #tpu.dimension_semantics<parallel>], iteration_bounds = array<i64: 2, 2>, scalar_prefetch = 0 : i64, scratch_operands = 1 : i64, tpu.core_type = #tpu.core_type<tc>, window_params = [{transform_indices = @transform_0, window_bounds = array<i64: 1, 8, 16, 128>}, {transform_indices = @transform_1, window_bounds = array<i64: 1, 1, 16, 128>}, {transform_indices = @transform_2, window_bounds = array<i64: 1, 1, 16, 128>}, {pipeline_mode = #tpu.pipeline_mode<synchronous>, transform_indices = @transform_3, window_bounds = array<i64: 9, 144, 128>}, {transform_indices = @transform_4, window_bounds = array<i64: 1, 8, 16, 128>}, {transform_indices = @transform_5, window_bounds = array<i64: 1, 1, 2, 128>}]} {
    %cst = arith.constant 0.000000e+00 : bf16
    %0 = vector.broadcast %cst : bf16 to vector<10x18x144xbf16>
    %c0 = arith.constant 0 : index
    %c0_0 = arith.constant 0 : index
    %c0_1 = arith.constant 0 : index
    %1 = vector.load %arg8[%c0, %c0_0, %c0_1] : memref<10x18x144xbf16, #tpu.memory_space<vmem>>, vector<10x18x144xbf16>
    tpu.vector_store %arg8[%c0, %c0_0, %c0_1], %0 {strides = array<i32>} : memref<10x18x144xbf16, #tpu.memory_space<vmem>>, vector<10x18x144xbf16>,
    %c0_2 = arith.constant 0 : index
    %c0_3 = arith.constant 0 : index
    %c0_4 = arith.constant 0 : index
    %c0_5 = arith.constant 0 : index
    %2 = vector.load %arg2[%c0_2, %c0_3, %c0_4, %c0_5] : memref<1x8x16x128xbf16, #tpu.memory_space<vmem>>, vector<1x8x16x128xbf16>
    %3 = vector.shape_cast %2 : vector<1x8x16x128xbf16> to vector<8x16x128xbf16>
    %c1 = arith.constant 1 : index
    %c1_6 = arith.constant 1 : index
    %c8 = arith.constant 8 : index
    %4 = vector.load %arg8[%c1, %c1_6, %c8] : memref<10x18x144xbf16, #tpu.memory_space<vmem>>, vector<8x16x128xbf16>
    tpu.vector_store %arg8[%c1, %c1_6, %c8], %3 {strides = array<i32>} : memref<10x18x144xbf16, #tpu.memory_space<vmem>>, vector<8x16x128xbf16>,
    %c0_i32 = arith.constant 0 : i32
    %5 = arith.cmpi sgt, %arg1, %c0_i32 : i32
    %6 = arith.extui %5 : i1 to i32
    %c0_i32_7 = arith.constant 0 : i32
    %7 = arith.cmpi ne, %6, %c0_i32_7 : i32
    scf.if %7 {
      %c0_80 = arith.constant 0 : index
      %c0_81 = arith.constant 0 : index
      %c0_82 = arith.constant 0 : index
      %c0_83 = arith.constant 0 : index
      %77 = vector.load %arg3[%c0_80, %c0_81, %c0_82, %c0_83] : memref<1x1x16x128xbf16, #tpu.memory_space<vmem>>, vector<1x1x16x128xbf16>
      %78 = vector.shape_cast %77 : vector<1x1x16x128xbf16> to vector<1x16x128xbf16>
      %c0_84 = arith.constant 0 : index
      %c1_85 = arith.constant 1 : index
      %c8_86 = arith.constant 8 : index
      %79 = vector.load %arg8[%c0_84, %c1_85, %c8_86] : memref<10x18x144xbf16, #tpu.memory_space<vmem>>, vector<1x16x128xbf16>
      tpu.vector_store %arg8[%c0_84, %c1_85, %c8_86], %78 {strides = array<i32>} : memref<10x18x144xbf16, #tpu.memory_space<vmem>>, vector<1x16x128xbf16>,
    } else {
    }
    %c1_i32 = arith.constant 1 : i32
    %8 = arith.cmpi slt, %arg1, %c1_i32 : i32
    %9 = arith.extui %8 : i1 to i32
    %c0_i32_8 = arith.constant 0 : i32
    %10 = arith.cmpi ne, %9, %c0_i32_8 : i32
    scf.if %10 {
      %c0_80 = arith.constant 0 : index
      %c0_81 = arith.constant 0 : index
      %c0_82 = arith.constant 0 : index
      %c0_83 = arith.constant 0 : index
      %77 = vector.load %arg4[%c0_80, %c0_81, %c0_82, %c0_83] : memref<1x1x16x128xbf16, #tpu.memory_space<vmem>>, vector<1x1x16x128xbf16>
      %78 = vector.shape_cast %77 : vector<1x1x16x128xbf16> to vector<1x16x128xbf16>
      %c9 = arith.constant 9 : index
      %c1_84 = arith.constant 1 : index
      %c8_85 = arith.constant 8 : index
      %79 = vector.load %arg8[%c9, %c1_84, %c8_85] : memref<10x18x144xbf16, #tpu.memory_space<vmem>>, vector<1x16x128xbf16>
      tpu.vector_store %arg8[%c9, %c1_84, %c8_85], %78 {strides = array<i32>} : memref<10x18x144xbf16, #tpu.memory_space<vmem>>, vector<1x16x128xbf16>,
    } else {
    }
    %c0_9 = arith.constant 0 : index
    %c0_10 = arith.constant 0 : index
    %c0_11 = arith.constant 0 : index
    %11 = vector.load %arg8[%c0_9, %c0_10, %c0_11] : memref<10x18x144xbf16, #tpu.memory_space<vmem>>, vector<8x16x144xbf16>
    %12 = vector.shape_cast %11 : vector<8x16x144xbf16> to vector<128x144xbf16>
    %c0_12 = arith.constant 0 : index
    %c0_13 = arith.constant 0 : index
    %c0_14 = arith.constant 0 : index
    %13 = vector.load %arg5[%c0_12, %c0_13, %c0_14] : memref<9x144x128xbf16, #tpu.memory_space<vmem>>, vector<1x144x128xbf16>
    %14 = vector.shape_cast %13 : vector<1x144x128xbf16> to vector<144x128xbf16>
    %cst_15 = arith.constant dense<0.000000e+00> : vector<128x128xf32>
    %15 = tpu.matmul %12, %14, %cst_15 {dimension_numbers = #tpu.dot_dimension_numbers<[1], [0], [0], [1], [0, 0, 1, 1], [], []>} : vector<128x144xbf16>, vector<144x128xbf16>, vector<128x128xf32> -> vector<128x128xf32>
    %c0_16 = arith.constant 0 : index
    %c1_17 = arith.constant 1 : index
    %c0_18 = arith.constant 0 : index
    %16 = vector.load %arg8[%c0_16, %c1_17, %c0_18] : memref<10x18x144xbf16, #tpu.memory_space<vmem>>, vector<8x16x144xbf16>
    %17 = vector.shape_cast %16 : vector<8x16x144xbf16> to vector<128x144xbf16>
    %c1_19 = arith.constant 1 : index
    %c0_20 = arith.constant 0 : index
    %c0_21 = arith.constant 0 : index
    %18 = vector.load %arg5[%c1_19, %c0_20, %c0_21] : memref<9x144x128xbf16, #tpu.memory_space<vmem>>, vector<1x144x128xbf16>
    %19 = vector.shape_cast %18 : vector<1x144x128xbf16> to vector<144x128xbf16>
    %cst_22 = arith.constant dense<0.000000e+00> : vector<128x128xf32>
    %20 = tpu.matmul %17, %19, %cst_22 {dimension_numbers = #tpu.dot_dimension_numbers<[1], [0], [0], [1], [0, 0, 1, 1], [], []>} : vector<128x144xbf16>, vector<144x128xbf16>, vector<128x128xf32> -> vector<128x128xf32>
    %21 = arith.addf %15, %20 : vector<128x128xf32>
    %c0_23 = arith.constant 0 : index
    %c2 = arith.constant 2 : index
    %c0_24 = arith.constant 0 : index
    %22 = vector.load %arg8[%c0_23, %c2, %c0_24] : memref<10x18x144xbf16, #tpu.memory_space<vmem>>, vector<8x16x144xbf16>
    %23 = vector.shape_cast %22 : vector<8x16x144xbf16> to vector<128x144xbf16>
    %c2_25 = arith.constant 2 : index
    %c0_26 = arith.constant 0 : index
    %c0_27 = arith.constant 0 : index
    %24 = vector.load %arg5[%c2_25, %c0_26, %c0_27] : memref<9x144x128xbf16, #tpu.memory_space<vmem>>, vector<1x144x128xbf16>
    %25 = vector.shape_cast %24 : vector<1x144x128xbf16> to vector<144x128xbf16>
    %cst_28 = arith.constant dense<0.000000e+00> : vector<128x128xf32>
    %26 = tpu.matmul %23, %25, %cst_28 {dimension_numbers = #tpu.dot_dimension_numbers<[1], [0], [0], [1], [0, 0, 1, 1], [], []>} : vector<128x144xbf16>, vector<144x128xbf16>, vector<128x128xf32> -> vector<128x128xf32>
    %27 = arith.addf %21, %26 : vector<128x128xf32>
    %c1_29 = arith.constant 1 : index
    %c0_30 = arith.constant 0 : index
    %c0_31 = arith.constant 0 : index
    %28 = vector.load %arg8[%c1_29, %c0_30, %c0_31] : memref<10x18x144xbf16, #tpu.memory_space<vmem>>, vector<8x16x144xbf16>
    %29 = vector.shape_cast %28 : vector<8x16x144xbf16> to vector<128x144xbf16>
    %c3 = arith.constant 3 : index
    %c0_32 = arith.constant 0 : index
    %c0_33 = arith.constant 0 : index
    %30 = vector.load %arg5[%c3, %c0_32, %c0_33] : memref<9x144x128xbf16, #tpu.memory_space<vmem>>, vector<1x144x128xbf16>
    %31 = vector.shape_cast %30 : vector<1x144x128xbf16> to vector<144x128xbf16>
    %cst_34 = arith.constant dense<0.000000e+00> : vector<128x128xf32>
    %32 = tpu.matmul %29, %31, %cst_34 {dimension_numbers = #tpu.dot_dimension_numbers<[1], [0], [0], [1], [0, 0, 1, 1], [], []>} : vector<128x144xbf16>, vector<144x128xbf16>, vector<128x128xf32> -> vector<128x128xf32>
    %33 = arith.addf %27, %32 : vector<128x128xf32>
    %c1_35 = arith.constant 1 : index
    %c1_36 = arith.constant 1 : index
    %c0_37 = arith.constant 0 : index
    %34 = vector.load %arg8[%c1_35, %c1_36, %c0_37] : memref<10x18x144xbf16, #tpu.memory_space<vmem>>, vector<8x16x144xbf16>
    %35 = vector.shape_cast %34 : vector<8x16x144xbf16> to vector<128x144xbf16>
    %c4 = arith.constant 4 : index
    %c0_38 = arith.constant 0 : index
    %c0_39 = arith.constant 0 : index
    %36 = vector.load %arg5[%c4, %c0_38, %c0_39] : memref<9x144x128xbf16, #tpu.memory_space<vmem>>, vector<1x144x128xbf16>
    %37 = vector.shape_cast %36 : vector<1x144x128xbf16> to vector<144x128xbf16>
    %cst_40 = arith.constant dense<0.000000e+00> : vector<128x128xf32>
    %38 = tpu.matmul %35, %37, %cst_40 {dimension_numbers = #tpu.dot_dimension_numbers<[1], [0], [0], [1], [0, 0, 1, 1], [], []>} : vector<128x144xbf16>, vector<144x128xbf16>, vector<128x128xf32> -> vector<128x128xf32>
    %39 = arith.addf %33, %38 : vector<128x128xf32>
    %c1_41 = arith.constant 1 : index
    %c2_42 = arith.constant 2 : index
    %c0_43 = arith.constant 0 : index
    %40 = vector.load %arg8[%c1_41, %c2_42, %c0_43] : memref<10x18x144xbf16, #tpu.memory_space<vmem>>, vector<8x16x144xbf16>
    %41 = vector.shape_cast %40 : vector<8x16x144xbf16> to vector<128x144xbf16>
    %c5 = arith.constant 5 : index
    %c0_44 = arith.constant 0 : index
    %c0_45 = arith.constant 0 : index
    %42 = vector.load %arg5[%c5, %c0_44, %c0_45] : memref<9x144x128xbf16, #tpu.memory_space<vmem>>, vector<1x144x128xbf16>
    %43 = vector.shape_cast %42 : vector<1x144x128xbf16> to vector<144x128xbf16>
    %cst_46 = arith.constant dense<0.000000e+00> : vector<128x128xf32>
    %44 = tpu.matmul %41, %43, %cst_46 {dimension_numbers = #tpu.dot_dimension_numbers<[1], [0], [0], [1], [0, 0, 1, 1], [], []>} : vector<128x144xbf16>, vector<144x128xbf16>, vector<128x128xf32> -> vector<128x128xf32>
    %45 = arith.addf %39, %44 : vector<128x128xf32>
    %c2_47 = arith.constant 2 : index
    %c0_48 = arith.constant 0 : index
    %c0_49 = arith.constant 0 : index
    %46 = vector.load %arg8[%c2_47, %c0_48, %c0_49] : memref<10x18x144xbf16, #tpu.memory_space<vmem>>, vector<8x16x144xbf16>
    %47 = vector.shape_cast %46 : vector<8x16x144xbf16> to vector<128x144xbf16>
    %c6 = arith.constant 6 : index
    %c0_50 = arith.constant 0 : index
    %c0_51 = arith.constant 0 : index
    %48 = vector.load %arg5[%c6, %c0_50, %c0_51] : memref<9x144x128xbf16, #tpu.memory_space<vmem>>, vector<1x144x128xbf16>
    %49 = vector.shape_cast %48 : vector<1x144x128xbf16> to vector<144x128xbf16>
    %cst_52 = arith.constant dense<0.000000e+00> : vector<128x128xf32>
    %50 = tpu.matmul %47, %49, %cst_52 {dimension_numbers = #tpu.dot_dimension_numbers<[1], [0], [0], [1], [0, 0, 1, 1], [], []>} : vector<128x144xbf16>, vector<144x128xbf16>, vector<128x128xf32> -> vector<128x128xf32>
    %51 = arith.addf %45, %50 : vector<128x128xf32>
    %c2_53 = arith.constant 2 : index
    %c1_54 = arith.constant 1 : index
    %c0_55 = arith.constant 0 : index
    %52 = vector.load %arg8[%c2_53, %c1_54, %c0_55] : memref<10x18x144xbf16, #tpu.memory_space<vmem>>, vector<8x16x144xbf16>
    %53 = vector.shape_cast %52 : vector<8x16x144xbf16> to vector<128x144xbf16>
    %c7 = arith.constant 7 : index
    %c0_56 = arith.constant 0 : index
    %c0_57 = arith.constant 0 : index
    %54 = vector.load %arg5[%c7, %c0_56, %c0_57] : memref<9x144x128xbf16, #tpu.memory_space<vmem>>, vector<1x144x128xbf16>
    %55 = vector.shape_cast %54 : vector<1x144x128xbf16> to vector<144x128xbf16>
    %cst_58 = arith.constant dense<0.000000e+00> : vector<128x128xf32>
    %56 = tpu.matmul %53, %55, %cst_58 {dimension_numbers = #tpu.dot_dimension_numbers<[1], [0], [0], [1], [0, 0, 1, 1], [], []>} : vector<128x144xbf16>, vector<144x128xbf16>, vector<128x128xf32> -> vector<128x128xf32>
    %57 = arith.addf %51, %56 : vector<128x128xf32>
    %c2_59 = arith.constant 2 : index
    %c2_60 = arith.constant 2 : index
    %c0_61 = arith.constant 0 : index
    %58 = vector.load %arg8[%c2_59, %c2_60, %c0_61] : memref<10x18x144xbf16, #tpu.memory_space<vmem>>, vector<8x16x144xbf16>
    %59 = vector.shape_cast %58 : vector<8x16x144xbf16> to vector<128x144xbf16>
    %c8_62 = arith.constant 8 : index
    %c0_63 = arith.constant 0 : index
    %c0_64 = arith.constant 0 : index
    %60 = vector.load %arg5[%c8_62, %c0_63, %c0_64] : memref<9x144x128xbf16, #tpu.memory_space<vmem>>, vector<1x144x128xbf16>
    %61 = vector.shape_cast %60 : vector<1x144x128xbf16> to vector<144x128xbf16>
    %cst_65 = arith.constant dense<0.000000e+00> : vector<128x128xf32>
    %62 = tpu.matmul %59, %61, %cst_65 {dimension_numbers = #tpu.dot_dimension_numbers<[1], [0], [0], [1], [0, 0, 1, 1], [], []>} : vector<128x144xbf16>, vector<144x128xbf16>, vector<128x128xf32> -> vector<128x128xf32>
    %63 = arith.addf %57, %62 : vector<128x128xf32>
    %64 = vector.shape_cast %63 : vector<128x128xf32> to vector<1x8x16x128xf32>
    %c0_66 = arith.constant 0 : index
    %c0_67 = arith.constant 0 : index
    %c0_68 = arith.constant 0 : index
    %c0_69 = arith.constant 0 : index
    %65 = vector.load %arg6[%c0_66, %c0_67, %c0_68, %c0_69] : memref<1x8x16x128xf32, #tpu.memory_space<vmem>>, vector<1x8x16x128xf32>
    tpu.vector_store %arg6[%c0_66, %c0_67, %c0_68, %c0_69], %64 {strides = array<i32>} : memref<1x8x16x128xf32, #tpu.memory_space<vmem>>, vector<1x8x16x128xf32>,
    %cst_70 = arith.constant dense<0.000000e+00> : vector<128xf32>
    %66 = vector.multi_reduction <add>, %63, %cst_70 [0] : vector<128x128xf32> to vector<128xf32>
    %67 = vector.shape_cast %66 : vector<128xf32> to vector<1x128xf32>
    %c0_71 = arith.constant 0 : index
    %c0_72 = arith.constant 0 : index
    %c0_73 = arith.constant 0 : index
    %c0_74 = arith.constant 0 : index
    %68 = vector.load %arg7[%c0_71, %c0_72, %c0_73, %c0_74] : memref<1x1x2x128xf32, #tpu.memory_space<vmem>>, vector<1x1x1x128xf32>
    %69 = vector.shape_cast %68 : vector<1x1x1x128xf32> to vector<1x128xf32>
    %70 = vector.shape_cast %67 : vector<1x128xf32> to vector<1x1x1x128xf32>
    tpu.vector_store %arg7[%c0_71, %c0_72, %c0_73, %c0_74], %70 {strides = array<i32>} : memref<1x1x2x128xf32, #tpu.memory_space<vmem>>, vector<1x1x1x128xf32>,
    %71 = arith.mulf %63, %63 : vector<128x128xf32>
    %cst_75 = arith.constant dense<0.000000e+00> : vector<128xf32>
    %72 = vector.multi_reduction <add>, %71, %cst_75 [0] : vector<128x128xf32> to vector<128xf32>
    %73 = vector.shape_cast %72 : vector<128xf32> to vector<1x128xf32>
    %c0_76 = arith.constant 0 : index
    %c0_77 = arith.constant 0 : index
    %c1_78 = arith.constant 1 : index
    %c0_79 = arith.constant 0 : index
    %74 = vector.load %arg7[%c0_76, %c0_77, %c1_78, %c0_79] : memref<1x1x2x128xf32, #tpu.memory_space<vmem>>, vector<1x1x1x128xf32>
    %75 = vector.shape_cast %74 : vector<1x1x1x128xf32> to vector<1x128xf32>
    %76 = vector.shape_cast %73 : vector<1x128xf32> to vector<1x1x1x128xf32>
    tpu.vector_store %arg7[%c0_76, %c0_77, %c1_78, %c0_79], %76 {strides = array<i32>} : memref<1x1x2x128xf32, #tpu.memory_space<vmem>>, vector<1x1x1x128xf32>,
    return
  }
  func.func @transform_0(%arg0: i32, %arg1: i32) -> (i32, i32, i32, i32) {
    %c0_i32 = arith.constant 0 : i32
    %c0_i32_0 = arith.constant 0 : i32
    %c0_i32_1 = arith.constant 0 : i32
    return %arg0, %arg1, %c0_i32, %c0_i32_0 : i32, i32, i32, i32
  }
  func.func @transform_1(%arg0: i32, %arg1: i32) -> (i32, i32, i32, i32) {
    %c8_i32 = arith.constant 8 : i32
    %0 = arith.muli %arg1, %c8_i32 : i32
    %c1_i32 = arith.constant 1 : i32
    %1 = arith.subi %0, %c1_i32 : i32
    %c0_i32 = arith.constant 0 : i32
    %2 = arith.maxsi %1, %c0_i32 : i32
    %c0_i32_0 = arith.constant 0 : i32
    %c0_i32_1 = arith.constant 0 : i32
    %c0_i32_2 = arith.constant 0 : i32
    return %arg0, %2, %c0_i32_0, %c0_i32_1 : i32, i32, i32, i32
  }
  func.func @transform_2(%arg0: i32, %arg1: i32) -> (i32, i32, i32, i32) {
    %c1_i32 = arith.constant 1 : i32
    %0 = arith.addi %arg1, %c1_i32 : i32
    %c8_i32 = arith.constant 8 : i32
    %1 = arith.muli %0, %c8_i32 : i32
    %c15_i32 = arith.constant 15 : i32
    %2 = arith.minsi %1, %c15_i32 : i32
    %c0_i32 = arith.constant 0 : i32
    %c0_i32_0 = arith.constant 0 : i32
    %c0_i32_1 = arith.constant 0 : i32
    return %arg0, %2, %c0_i32, %c0_i32_0 : i32, i32, i32, i32
  }
  func.func @transform_3(%arg0: i32, %arg1: i32) -> (i32, i32, i32) {
    %c0_i32 = arith.constant 0 : i32
    %c0_i32_0 = arith.constant 0 : i32
    %c0_i32_1 = arith.constant 0 : i32
    %c0_i32_2 = arith.constant 0 : i32
    return %c0_i32, %c0_i32_0, %c0_i32_1 : i32, i32, i32
  }
  func.func @transform_4(%arg0: i32, %arg1: i32) -> (i32, i32, i32, i32) {
    %c0_i32 = arith.constant 0 : i32
    %c0_i32_0 = arith.constant 0 : i32
    %c0_i32_1 = arith.constant 0 : i32
    return %arg0, %arg1, %c0_i32, %c0_i32_0 : i32, i32, i32, i32
  }
  func.func @transform_5(%arg0: i32, %arg1: i32) -> (i32, i32, i32, i32) {
    %c0_i32 = arith.constant 0 : i32
    %c0_i32_0 = arith.constant 0 : i32
    %c0_i32_1 = arith.constant 0 : i32
    return %arg0, %arg1, %c0_i32, %c0_i32_0 : i32, i32, i32, i32
  }
}

module attributes {stable_mosaic.version = 11 : i64} {
  func.func @_bn_leaky_kernel(%arg0: i32, %arg1: memref<16x2048xf32, #tpu.memory_space<vmem>>, %arg2: memref<1x2048xf32, #tpu.memory_space<vmem>>, %arg3: memref<1x2048xf32, #tpu.memory_space<vmem>>, %arg4: memref<16x2048xbf16, #tpu.memory_space<vmem>>) attributes {dimension_semantics = [#tpu.dimension_semantics<parallel>], iteration_bounds = array<i64: 2>, scalar_prefetch = 0 : i64, scratch_operands = 0 : i64, tpu.core_type = #tpu.core_type<tc>, window_params = [{transform_indices = @transform_0, window_bounds = array<i64: 16, 2048>}, {pipeline_mode = #tpu.pipeline_mode<synchronous>, transform_indices = @transform_1, window_bounds = array<i64: 1, 2048>}, {pipeline_mode = #tpu.pipeline_mode<synchronous>, transform_indices = @transform_2, window_bounds = array<i64: 1, 2048>}, {transform_indices = @transform_3, window_bounds = array<i64: 16, 2048>}]} {
    %c0 = arith.constant 0 : index
    %c0_0 = arith.constant 0 : index
    %0 = vector.load %arg1[%c0, %c0_0] : memref<16x2048xf32, #tpu.memory_space<vmem>>, vector<16x2048xf32>
    %c0_1 = arith.constant 0 : index
    %c0_2 = arith.constant 0 : index
    %1 = vector.load %arg2[%c0_1, %c0_2] : memref<1x2048xf32, #tpu.memory_space<vmem>>, vector<1x2048xf32>
    %2 = vector.broadcast %1 : vector<1x2048xf32> to vector<16x2048xf32>
    %3 = arith.mulf %0, %2 : vector<16x2048xf32>
    %c0_3 = arith.constant 0 : index
    %c0_4 = arith.constant 0 : index
    %4 = vector.load %arg3[%c0_3, %c0_4] : memref<1x2048xf32, #tpu.memory_space<vmem>>, vector<1x2048xf32>
    %5 = vector.broadcast %4 : vector<1x2048xf32> to vector<16x2048xf32>
    %6 = arith.addf %3, %5 : vector<16x2048xf32>
    %cst = arith.constant 0.000000e+00 : f32
    %7 = vector.broadcast %cst : f32 to vector<16x2048xf32>
    %8 = arith.cmpf oge, %6, %7 : vector<16x2048xf32>
    %cst_5 = arith.constant 0.00999999977 : f32
    %9 = vector.broadcast %cst_5 : f32 to vector<16x2048xf32>
    %10 = arith.mulf %9, %6 : vector<16x2048xf32>
    %11 = arith.select %8, %6, %10 : vector<16x2048xi1>, vector<16x2048xf32>
    %12 = arith.truncf %11 : vector<16x2048xf32> to vector<16x2048xbf16>
    %c0_6 = arith.constant 0 : index
    %c0_7 = arith.constant 0 : index
    %13 = vector.load %arg4[%c0_6, %c0_7] : memref<16x2048xbf16, #tpu.memory_space<vmem>>, vector<16x2048xbf16>
    tpu.vector_store %arg4[%c0_6, %c0_7], %12 {strides = array<i32>} : memref<16x2048xbf16, #tpu.memory_space<vmem>>, vector<16x2048xbf16>,
    return
  }
  func.func @transform_0(%arg0: i32) -> (i32, i32) {
    %c0_i32 = arith.constant 0 : i32
    %c0_i32_0 = arith.constant 0 : i32
    return %arg0, %c0_i32 : i32, i32
  }
  func.func @transform_1(%arg0: i32) -> (i32, i32) {
    %c0_i32 = arith.constant 0 : i32
    %c0_i32_0 = arith.constant 0 : i32
    %c0_i32_1 = arith.constant 0 : i32
    return %c0_i32, %c0_i32_0 : i32, i32
  }
  func.func @transform_2(%arg0: i32) -> (i32, i32) {
    %c0_i32 = arith.constant 0 : i32
    %c0_i32_0 = arith.constant 0 : i32
    %c0_i32_1 = arith.constant 0 : i32
    return %c0_i32, %c0_i32_0 : i32, i32
  }
  func.func @transform_3(%arg0: i32) -> (i32, i32) {
    %c0_i32 = arith.constant 0 : i32
    %c0_i32_0 = arith.constant 0 : i32
    return %arg0, %c0_i32 : i32, i32
  }
}

module attributes {stable_mosaic.version = 11 : i64} {
  func.func @_bn_leaky_kernel(%arg0: i32, %arg1: memref<16x2048xf32, #tpu.memory_space<vmem>>, %arg2: memref<1x2048xf32, #tpu.memory_space<vmem>>, %arg3: memref<1x2048xf32, #tpu.memory_space<vmem>>, %arg4: memref<16x2048xf32, #tpu.memory_space<vmem>>) attributes {dimension_semantics = [#tpu.dimension_semantics<parallel>], iteration_bounds = array<i64: 2>, scalar_prefetch = 0 : i64, scratch_operands = 0 : i64, tpu.core_type = #tpu.core_type<tc>, window_params = [{transform_indices = @transform_0, window_bounds = array<i64: 16, 2048>}, {pipeline_mode = #tpu.pipeline_mode<synchronous>, transform_indices = @transform_1, window_bounds = array<i64: 1, 2048>}, {pipeline_mode = #tpu.pipeline_mode<synchronous>, transform_indices = @transform_2, window_bounds = array<i64: 1, 2048>}, {transform_indices = @transform_3, window_bounds = array<i64: 16, 2048>}]} {
    %c0 = arith.constant 0 : index
    %c0_0 = arith.constant 0 : index
    %0 = vector.load %arg1[%c0, %c0_0] : memref<16x2048xf32, #tpu.memory_space<vmem>>, vector<16x2048xf32>
    %c0_1 = arith.constant 0 : index
    %c0_2 = arith.constant 0 : index
    %1 = vector.load %arg2[%c0_1, %c0_2] : memref<1x2048xf32, #tpu.memory_space<vmem>>, vector<1x2048xf32>
    %2 = vector.broadcast %1 : vector<1x2048xf32> to vector<16x2048xf32>
    %3 = arith.mulf %0, %2 : vector<16x2048xf32>
    %c0_3 = arith.constant 0 : index
    %c0_4 = arith.constant 0 : index
    %4 = vector.load %arg3[%c0_3, %c0_4] : memref<1x2048xf32, #tpu.memory_space<vmem>>, vector<1x2048xf32>
    %5 = vector.broadcast %4 : vector<1x2048xf32> to vector<16x2048xf32>
    %6 = arith.addf %3, %5 : vector<16x2048xf32>
    %cst = arith.constant 0.000000e+00 : f32
    %7 = vector.broadcast %cst : f32 to vector<16x2048xf32>
    %8 = arith.cmpf oge, %6, %7 : vector<16x2048xf32>
    %cst_5 = arith.constant 0.00999999977 : f32
    %9 = vector.broadcast %cst_5 : f32 to vector<16x2048xf32>
    %10 = arith.mulf %9, %6 : vector<16x2048xf32>
    %11 = arith.select %8, %6, %10 : vector<16x2048xi1>, vector<16x2048xf32>
    %c0_6 = arith.constant 0 : index
    %c0_7 = arith.constant 0 : index
    %12 = vector.load %arg4[%c0_6, %c0_7] : memref<16x2048xf32, #tpu.memory_space<vmem>>, vector<16x2048xf32>
    tpu.vector_store %arg4[%c0_6, %c0_7], %11 {strides = array<i32>} : memref<16x2048xf32, #tpu.memory_space<vmem>>, vector<16x2048xf32>,
    return
  }
  func.func @transform_0(%arg0: i32) -> (i32, i32) {
    %c0_i32 = arith.constant 0 : i32
    %c0_i32_0 = arith.constant 0 : i32
    return %arg0, %c0_i32 : i32, i32
  }
  func.func @transform_1(%arg0: i32) -> (i32, i32) {
    %c0_i32 = arith.constant 0 : i32
    %c0_i32_0 = arith.constant 0 : i32
    %c0_i32_1 = arith.constant 0 : i32
    return %c0_i32, %c0_i32_0 : i32, i32
  }
  func.func @transform_2(%arg0: i32) -> (i32, i32) {
    %c0_i32 = arith.constant 0 : i32
    %c0_i32_0 = arith.constant 0 : i32
    %c0_i32_1 = arith.constant 0 : i32
    return %c0_i32, %c0_i32_0 : i32, i32
  }
  func.func @transform_3(%arg0: i32) -> (i32, i32) {
    %c0_i32 = arith.constant 0 : i32
    %c0_i32_0 = arith.constant 0 : i32
    return %arg0, %c0_i32 : i32, i32
  }
}

</mosaic_0001>

<bundles_post_ra>
// kernel: tile.28
= control target key start
LH: loop header
LB: loop body
LE: loop exit
PB: predicated region body
PF: predicated region fallthrough
CT: control target
= control target key end

     0   :  { %s208_s0 = inlined_call_operand.vmem [shape: f32[8], index: 0, kind: input, shape index: {}]   ;;  %s209_s1 = inlined_call_operand.vmem [shape: f32[256,8], index: 1, kind: output, shape index: {}]  }
   0x1   :  { %v4_v0 = vld [vmem:[%s208_s0] ss:$0 sm:$0xff] }
   0x2   :  { %5 = vst [vmem:[%s209_s1] sm:$0xff] %v4_v0 }
   0x3   :  { %68 = vst [vmem:[%s209_s1 + $0x8] sm:$0xff] %v4_v0 }
   0x4   :  { %69 = vst [vmem:[%s209_s1 + $0x10] sm:$0xff] %v4_v0 }
   0x5   :  { %70 = vst [vmem:[%s209_s1 + $0x18] sm:$0xff] %v4_v0 }
   0x6   :  { %71 = vst [vmem:[%s209_s1 + $0x20] sm:$0xff] %v4_v0 }
   0x7   :  { %72 = vst [vmem:[%s209_s1 + $0x28] sm:$0xff] %v4_v0 }
   0x8   :  { %73 = vst [vmem:[%s209_s1 + $0x30] sm:$0xff] %v4_v0 }
   0x9   :  { %74 = vst [vmem:[%s209_s1 + $0x38] sm:$0xff] %v4_v0 }
   0xa   :  { %75 = vst [vmem:[%s209_s1 + $0x40] sm:$0xff] %v4_v0 }
   0xb   :  { %76 = vst [vmem:[%s209_s1 + $0x48] sm:$0xff] %v4_v0 }
   0xc   :  { %77 = vst [vmem:[%s209_s1 + $0x50] sm:$0xff] %v4_v0 }
   0xd   :  { %78 = vst [vmem:[%s209_s1 + $0x58] sm:$0xff] %v4_v0 }
   0xe   :  { %79 = vst [vmem:[%s209_s1 + $0x60] sm:$0xff] %v4_v0 }
   0xf   :  { %80 = vst [vmem:[%s209_s1 + $0x68] sm:$0xff] %v4_v0 }
  0x10   :  { %81 = vst [vmem:[%s209_s1 + $0x70] sm:$0xff] %v4_v0 }
  0x11   :  { %82 = vst [vmem:[%s209_s1 + $0x78] sm:$0xff] %v4_v0 }
  0x12   :  { %83 = vst [vmem:[%s209_s1 + $0x80] sm:$0xff] %v4_v0 }
  0x13   :  { %84 = vst [vmem:[%s209_s1 + $0x88] sm:$0xff] %v4_v0 }
  0x14   :  { %85 = vst [vmem:[%s209_s1 + $0x90] sm:$0xff] %v4_v0 }
  0x15   :  { %86 = vst [vmem:[%s209_s1 + $0x98] sm:$0xff] %v4_v0 }
  0x16   :  { %87 = vst [vmem:[%s209_s1 + $0xa0] sm:$0xff] %v4_v0 }
  0x17   :  { %88 = vst [vmem:[%s209_s1 + $0xa8] sm:$0xff] %v4_v0 }
  0x18   :  { %89 = vst [vmem:[%s209_s1 + $0xb0] sm:$0xff] %v4_v0 }
  0x19   :  { %90 = vst [vmem:[%s209_s1 + $0xb8] sm:$0xff] %v4_v0 }
  0x1a   :  { %91 = vst [vmem:[%s209_s1 + $0xc0] sm:$0xff] %v4_v0 }
  0x1b   :  { %92 = vst [vmem:[%s209_s1 + $0xc8] sm:$0xff] %v4_v0 }
  0x1c   :  { %93 = vst [vmem:[%s209_s1 + $0xd0] sm:$0xff] %v4_v0 }
  0x1d   :  { %94 = vst [vmem:[%s209_s1 + $0xd8] sm:$0xff] %v4_v0 }
  0x1e   :  { %95 = vst [vmem:[%s209_s1 + $0xe0] sm:$0xff] %v4_v0 }
  0x1f   :  { %96 = vst [vmem:[%s209_s1 + $0xe8] sm:$0xff] %v4_v0 }
  0x20   :  { %97 = vst [vmem:[%s209_s1 + $0xf0] sm:$0xff] %v4_v0 }
  0x21   :  { %98 = vst [vmem:[%s209_s1 + $0xf8] sm:$0xff] %v4_v0 }

// kernel: tile.29
= control target key start
LH: loop header
LB: loop body
LE: loop exit
PB: predicated region body
PF: predicated region fallthrough
CT: control target
= control target key end

     0   :  { %vm6_vm0 = vcmask 1043458   ;;  %vm10_vm1 = vcmask 1045508   ;;  %vm14_vm2 = vcmask 1047558   ;;  %s43_s6 = smov 3  ;;  %s46_s7 = smov 12  ;;  %vm16_vm3 = vcmask 64512   ;;  %s1589_s0 = inlined_call_operand.vmem [shape: f32[256,8], index: 0, kind: input, shape index: {}]   ;;  %s1590_s1 = inlined_call_operand.vmem [shape: f32[1,2048], index: 1, kind: output, shape index: {}]  }
   0x1   :  { %v862_v0 = vld [vmem:[%s1589_s0 + $0xf] ss:$16 sm:%s43_s6]   ;;  %s51_s12 = smov 48  ;;  %s56_s13 = smov 192  ;;  %vm62_vm4 = vcmask 1048512   ;;  %vm110_vm5 = vcmask 982912  }
   0x2   :  { %v863_v1 = vld [vmem:[%s1589_s0 + $0xf] ss:$16 sm:%s46_s7]   ;;  %s91_s18 = smov 3  ;;  %s94_s21 = smov 12  ;;  %vm158_vm6 = vcmask 917312   ;;  %vm206_vm7 = vcmask 851712  }
   0x3   :  { %v49_v2 = vsel %vm6_vm0, %v863_v1, %v862_v0  ;;  %v864_v3 = vld [vmem:[%s1589_s0 + $0xf] ss:$16 sm:%s51_s12]   ;;  %v870_v6 = vld [vmem:[%s1589_s0 + $0xe] ss:$16 sm:%s91_s18]   ;;  %s99_s22 = smov 48  ;;  %s104_s27 = smov 192 }
   0x4   :  { %v865_v4 = vld [vmem:[%s1589_s0 + $0xf] ss:$16 sm:%s56_s13]   ;;  %v54_v5 = vsel %vm10_vm1, %v864_v3, %v49_v2  ;;  %v871_v8 = vld [vmem:[%s1589_s0 + $0xe] ss:$16 sm:%s94_s21]   ;;  %s1012_s28 = smov 120   ;;  %s66_s2 = smov 3 }
   0x5   :  { %v59_v7 = vsel %vm14_vm2, %v865_v4, %v54_v5  ;;  %v872_v9 = vld [vmem:[%s1589_s0 + $0xe] ss:$16 sm:%s99_s22]   ;;  %v97_v10 = vsel %vm6_vm0, %v871_v8, %v870_v6  ;;  %s69_s3 = smov 12  ;;  %v866_v13 = vld [vmem:[%s1589_s0 + $0x8f] ss:$16 sm:%s66_s2]   ;;  %s74_s8 = smov 48 }
   0x6   :  { %60 = vrot.lane.b32.xlu0 %v59_v7, %s1012_s28  ;;  %v873_v11 = vld [vmem:[%s1589_s0 + $0xe] ss:$16 sm:%s104_s27]   ;;  %v102_v12 = vsel %vm10_vm1, %v872_v9, %v97_v10  ;;  %s79_s9 = smov 192  ;;  %s114_s14 = smov 3  ;;  %vm254_vm8 = vcmask 786112   ;;  %vm302_vm9 = vcmask 720512  }
   0x7   :  { %v867_v14 = vld [vmem:[%s1589_s0 + $0x8f] ss:$16 sm:%s69_s3]   ;;  %v107_v15 = vsel %vm14_vm2, %v873_v11, %v102_v12  ;;  %s117_s15 = smov 12  ;;  %s1013_s16 = smov 112   ;;  %v874_v20 = vld [vmem:[%s1589_s0 + $0x8e] ss:$16 sm:%s114_s14]  }
   0x8   :  { %v72_v16 = vsel %vm6_vm0, %v867_v14, %v866_v13  ;;  %v868_v17 = vld [vmem:[%s1589_s0 + $0x8f] ss:$16 sm:%s74_s8]   ;;  %108 = vrot.lane.b32.xlu1 %v107_v15, %s1013_s16  ;;  %s122_s19 = smov 48  ;;  %s127_s20 = smov 192  ;;  %vm350_vm10 = vcmask 654912   ;;  %vm398_vm11 = vcmask 589312  }
   0x9   :  { %v869_v18 = vld [vmem:[%s1589_s0 + $0x8f] ss:$16 sm:%s79_s9]   ;;  %v77_v19 = vsel %vm10_vm1, %v868_v17, %v72_v16  ;;  %v875_v21 = vld [vmem:[%s1589_s0 + $0x8e] ss:$16 sm:%s117_s15]   ;;  %s187_s25 = smov 3  ;;  %s190_s26 = smov 12 }
   0xa   :  { %v876_v22 = vld [vmem:[%s1589_s0 + $0x8e] ss:$16 sm:%s122_s19]   ;;  %v82_v23 = vsel %vm14_vm2, %v869_v18, %v77_v19  ;;  %v120_v24 = vsel %vm6_vm0, %v875_v21, %v874_v20  ;;  %v886_v26 = vld [vmem:[%s1589_s0 + $0xc] ss:$16 sm:%s187_s25]   ;;  %s195_s3 = smov 48  ;;  %s200_s6 = smov 192 }
   0xb   :  { %v877_v25 = vld [vmem:[%s1589_s0 + $0x8e] ss:$16 sm:%s127_s20]   ;;  %v125_v27 = vsel %vm10_vm1, %v876_v22, %v120_v24  ;;  %v887_v28 = vld [vmem:[%s1589_s0 + $0xc] ss:$16 sm:%s190_s26]   ;;  %s210_s7 = smov 3  ;;  %s213_s12 = smov 12 }
   0xc   :  { %v193_v29 = vsel %vm6_vm0, %v887_v28, %v886_v26  ;;  %v888_v30 = vld [vmem:[%s1589_s0 + $0xc] ss:$16 sm:%s195_s3]   ;;  %s218_s13 = smov 48  ;;  %v130_v32 = vsel %vm14_vm2, %v877_v25, %v125_v27  ;;  %s223_s15 = smov 192  ;;  %vm446_vm12 = vcmask 523712   ;;  %vm494_vm13 = vcmask 458112  }
   0xd   :  { %v890_v31 = vld [vmem:[%s1589_s0 + $0x8c] ss:$16 sm:%s210_s7]   ;;  %s258_s17 = smov 3  ;;  %s261_s18 = smov 12  ;;  %v198_v34 = vsel %vm10_vm1, %v888_v30, %v193_v29  ;;  %vm542_vm14 = vcmask 392512   ;;  %vm590_vm15 = vcmask 326912  }
   0xe   :  { %83 = vrot.lane.b32.xlu0 %v82_v23, %s1012_s28  ;;  %v891_v33 = vld [vmem:[%s1589_s0 + $0x8c] ss:$16 sm:%s213_s12]   ;;  %s266_s23 = smov 48  ;;  %s139_s27 = smov 3 }
   0xf   :  { %v889_v35 = vld [vmem:[%s1589_s0 + $0xc] ss:$16 sm:%s200_s6]   ;;  %v216_v36 = vsel %vm6_vm0, %v891_v33, %v890_v31  ;;  %v898_v39 = vld [vmem:[%s1589_s0 + $0x8b] ss:$16 sm:%s258_s17]   ;;  %s142_s29 = smov 12  ;;  %s147_s5 = smov 48 }
  0x10   :  { %v892_v37 = vld [vmem:[%s1589_s0 + $0x8c] ss:$16 sm:%s218_s13]   ;;  %131 = vrot.lane.b32.xlu1 %v130_v32, %s1013_s16  ;;  %s152_s6 = smov 192  ;;  %v203_v42 = vsel %vm14_vm2, %v889_v35, %v198_v34  ;;  %s271_s7 = smov 192 }
  0x11   :  { %v893_v38 = vld [vmem:[%s1589_s0 + $0x8c] ss:$16 sm:%s223_s15]   ;;  %v899_v40 = vld [vmem:[%s1589_s0 + $0x8b] ss:$16 sm:%s261_s18]   ;;  %v221_v43 = vsel %vm10_vm1, %v892_v37, %v216_v36  ;;  %s283_s12 = smov 3  ;;  %s286_s17 = smov 12 }
  0x12   :  { %v878_v41 = vld [vmem:[%s1589_s0 + $0xd] ss:$16 sm:%s139_s27]   ;;  %v900_v46 = vld [vmem:[%s1589_s0 + $0x8b] ss:$16 sm:%s266_s23]   ;;  %v264_v49 = vsel %vm6_vm0, %v899_v40, %v898_v39  ;;  %s291_s22 = smov 48  ;;  %s296_s23 = smov 192  ;;  %v226_v53 = vsel %vm14_vm2, %v893_v38, %v221_v43 }
  0x13   :  { %v879_v44 = vld [vmem:[%s1589_s0 + $0xd] ss:$16 sm:%s142_s29]   ;;  %v902_v51 = vld [vmem:[%s1589_s0 + $0xa] ss:$16 sm:%s283_s12]   ;;  %s1014_s16 = smov 96   ;;  %s331_s24 = smov 3  ;;  %v269_v56 = vsel %vm10_vm1, %v900_v46, %v264_v49 }
  0x14   :  { %v880_v45 = vld [vmem:[%s1589_s0 + $0xd] ss:$16 sm:%s147_s5]   ;;  %v145_v47 = vsel %vm6_vm0, %v879_v44, %v878_v41  ;;  %v903_v52 = vld [vmem:[%s1589_s0 + $0xa] ss:$16 sm:%s286_s17]   ;;  %s334_s25 = smov 12  ;;  %s1015_s29 = smov 104  }
  0x15   :  { %v881_v48 = vld [vmem:[%s1589_s0 + $0xd] ss:$16 sm:%s152_s6]   ;;  %v150_v50 = vsel %vm10_vm1, %v880_v45, %v145_v47  ;;  %v901_v55 = vld [vmem:[%s1589_s0 + $0x8b] ss:$16 sm:%s271_s7]   ;;  %v289_v57 = vsel %vm6_vm0, %v903_v52, %v902_v51  ;;  %s339_s5 = smov 48  ;;  %s162_s6 = smov 3 }
  0x16   :  { %204 = vrot.lane.b32.xlu0 %v203_v42, %s1014_s16  ;;  %v155_v54 = vsel %vm14_vm2, %v881_v48, %v150_v50  ;;  %v904_v58 = vld [vmem:[%s1589_s0 + $0xa] ss:$16 sm:%s291_s22]   ;;  %s165_s11 = smov 12  ;;  %s170_s12 = smov 48  ;;  %v274_v0 = vsel %vm14_vm2, %v901_v55, %v269_v56 }
  0x17   :  { %156 = vrot.lane.b32.xlu2 %v155_v54, %s1015_s29  ;;  %v910_v59 = vld [vmem:[%s1589_s0 + $0x9] ss:$16 sm:%s331_s24]   ;;  %s175_s17 = smov 192  ;;  %s354_s18 = smov 3  ;;  %v294_v1 = vsel %vm10_vm1, %v904_v58, %v289_v57 }
  0x18   :  { %227 = vrot.lane.b32.xlu1 %v226_v53, %s1014_s16  ;;  %v905_v60 = vld [vmem:[%s1589_s0 + $0xa] ss:$16 sm:%s296_s23]   ;;  %s344_s19 = smov 192  ;;  %s357_s16 = smov 12 }
  0x19   :  { %v911_v61 = vld [vmem:[%s1589_s0 + $0x9] ss:$16 sm:%s334_s25]   ;;  %v882_v62 = vld [vmem:[%s1589_s0 + $0x8d] ss:$16 sm:%s162_s6]   ;;  %s362_s26 = smov 48  ;;  %s402_s4 = smov 3  ;;  %v299_v11 = vsel %vm14_vm2, %v905_v60, %v294_v1 }
  0x1a   :  { %v883_v63 = vld [vmem:[%s1589_s0 + $0x8d] ss:$16 sm:%s165_s11]   ;;  %v912_v5 = vld [vmem:[%s1589_s0 + $0x9] ss:$16 sm:%s339_s5]   ;;  %v337_v7 = vsel %vm6_vm0, %v911_v61, %v910_v59  ;;  %s405_s5 = smov 12  ;;  %s1016_s6 = smov 88  }
  0x1b   :  { %v168_v2 = vsel %vm6_vm0, %v883_v63, %v882_v62  ;;  %v884_v3 = vld [vmem:[%s1589_s0 + $0x8d] ss:$16 sm:%s170_s12]   ;;  %v914_v9 = vld [vmem:[%s1589_s0 + $0x89] ss:$16 sm:%s354_s18]   ;;  %s367_s9 = smov 192  ;;  %s235_s11 = smov 3  ;;  %v342_v14 = vsel %vm10_vm1, %v912_v5, %v337_v7 }
  0x1c   :  { %v885_v4 = vld [vmem:[%s1589_s0 + $0x8d] ss:$16 sm:%s175_s17]   ;;  %v173_v6 = vsel %vm10_vm1, %v884_v3, %v168_v2  ;;  %v915_v10 = vld [vmem:[%s1589_s0 + $0x89] ss:$16 sm:%s357_s16]   ;;  %s238_s12 = smov 12  ;;  %s243_s17 = smov 48 }
  0x1d   :  { %v178_v8 = vsel %vm14_vm2, %v885_v4, %v173_v6  ;;  %v913_v12 = vld [vmem:[%s1589_s0 + $0x9] ss:$16 sm:%s344_s19]   ;;  %v360_v15 = vsel %vm6_vm0, %v915_v10, %v914_v9  ;;  %v922_v16 = vld [vmem:[%s1589_s0 + $0x88] ss:$16 sm:%s402_s4]   ;;  %s248_s18 = smov 192  ;;  %s1017_s19 = smov 80  }
  0x1e   :  { %275 = vrot.lane.b32.xlu0 %v274_v0, %s1016_s6  ;;  %v916_v13 = vld [vmem:[%s1589_s0 + $0x89] ss:$16 sm:%s362_s26]   ;;  %s410_s20 = smov 48  ;;  %s427_s26 = smov 3  ;;  %v347_v21 = vsel %vm14_vm2, %v913_v12, %v342_v14 }
  0x1f   :  { %179 = vrot.lane.b32.xlu2 %v178_v8, %s1015_s29  ;;  %v923_v17 = vld [vmem:[%s1589_s0 + $0x88] ss:$16 sm:%s405_s5]   ;;  %s430_s27 = smov 12  ;;  %v365_v22 = vsel %vm10_vm1, %v916_v13, %v360_v15  ;;  %s415_s3 = smov 192 }
  0x20   :  { %300 = vrot.lane.b32.xlu1 %v299_v11, %s1017_s19  ;;  %v894_v18 = vld [vmem:[%s1589_s0 + $0xb] ss:$16 sm:%s235_s11]   ;;  %v408_v28 = vsel %vm6_vm0, %v923_v17, %v922_v16  ;;  %s475_s13 = smov 3  ;;  %s478_s28 = smov 12 }
  0x21   :  { %v895_v19 = vld [vmem:[%s1589_s0 + $0xb] ss:$16 sm:%s238_s12]   ;;  %v917_v23 = vld [vmem:[%s1589_s0 + $0x89] ss:$16 sm:%s367_s9]   ;;  %s435_s9 = smov 48  ;;  %s1018_s14 = smov 72  }
  0x22   :  { %v896_v20 = vld [vmem:[%s1589_s0 + $0xb] ss:$16 sm:%s243_s17]   ;;  %v241_v24 = vsel %vm6_vm0, %v895_v19, %v894_v18  ;;  %v924_v26 = vld [vmem:[%s1589_s0 + $0x88] ss:$16 sm:%s410_s20]   ;;  %v370_v32 = vsel %vm14_vm2, %v917_v23, %v365_v22  ;;  %s309_s20 = smov 12  ;;  %s314_s22 = smov 48 }
  0x23   :  { %v897_v25 = vld [vmem:[%s1589_s0 + $0xb] ss:$16 sm:%s248_s18]   ;;  %v246_v27 = vsel %vm10_vm1, %v896_v20, %v241_v24  ;;  %v926_v30 = vld [vmem:[%s1589_s0 + $0x7] ss:$16 sm:%s427_s26]   ;;  %s306_s18 = smov 3  ;;  %s319_s23 = smov 192  ;;  %v413_v35 = vsel %vm10_vm1, %v924_v26, %v408_v28 }
  0x24   :  { %v251_v29 = vsel %vm14_vm2, %v897_v25, %v246_v27  ;;  %v927_v31 = vld [vmem:[%s1589_s0 + $0x7] ss:$16 sm:%s430_s27]   ;;  %v925_v33 = vld [vmem:[%s1589_s0 + $0x88] ss:$16 sm:%s415_s3]   ;;  %s440_s16 = smov 192  ;;  %s483_s3 = smov 48 }
  0x25   :  { %v928_v34 = vld [vmem:[%s1589_s0 + $0x7] ss:$16 sm:%s435_s9]   ;;  %v433_v36 = vsel %vm6_vm0, %v927_v31, %v926_v30  ;;  %v934_v37 = vld [vmem:[%s1589_s0 + $0x6] ss:$16 sm:%s475_s13]   ;;  %s498_s10 = smov 3  ;;  %s501_s11 = smov 12  ;;  %v418_v44 = vsel %vm14_vm2, %v925_v33, %v413_v35 }
  0x26   :  { %348 = vrot.lane.b32.xlu0 %v347_v21, %s1018_s14  ;;  %v935_v38 = vld [vmem:[%s1589_s0 + $0x6] ss:$16 sm:%s478_s28]   ;;  %v438_v45 = vsel %vm10_vm1, %v928_v34, %v433_v36  ;;  %s488_s28 = smov 192  ;;  %s506_s17 = smov 48 }
  0x27   :  { %252 = vrot.lane.b32.xlu2 %v251_v29, %s1016_s6  ;;  %v906_v39 = vld [vmem:[%s1589_s0 + $0x8a] ss:$16 sm:%s306_s18]   ;;  %s546_s18 = smov 3  ;;  %v481_v50 = vsel %vm6_vm0, %v935_v38, %v934_v37  ;;  %s1019_s24 = smov 64  }
  0x28   :  { %371 = vrot.lane.b32.xlu1 %v370_v32, %s1018_s14  ;;  %v907_v40 = vld [vmem:[%s1589_s0 + $0x8a] ss:$16 sm:%s309_s20]   ;;  %s387_s27 = smov 48  ;;  %s549_s2 = smov 12 }
  0x29   :  { %v312_v41 = vsel %vm6_vm0, %v907_v40, %v906_v39  ;;  %v908_v42 = vld [vmem:[%s1589_s0 + $0x8a] ss:$16 sm:%s314_s22]   ;;  %v929_v46 = vld [vmem:[%s1589_s0 + $0x7] ss:$16 sm:%s440_s16]   ;;  %s382_s16 = smov 12  ;;  %s511_s4 = smov 192 }
  0x2a   :  { %v909_v43 = vld [vmem:[%s1589_s0 + $0x8a] ss:$16 sm:%s319_s23]   ;;  %v317_v47 = vsel %vm10_vm1, %v908_v42, %v312_v41  ;;  %v936_v48 = vld [vmem:[%s1589_s0 + $0x6] ss:$16 sm:%s483_s3]   ;;  %s379_s23 = smov 3  ;;  %v443_v53 = vsel %vm14_vm2, %v929_v46, %v438_v45  ;;  %s392_s3 = smov 192 }
  0x2b   :  { %v322_v49 = vsel %vm14_vm2, %v909_v43, %v317_v47  ;;  %v938_v51 = vld [vmem:[%s1589_s0 + $0x86] ss:$16 sm:%s498_s10]   ;;  %v486_v56 = vsel %vm10_vm1, %v936_v48, %v481_v50  ;;  %v946_v58 = vld [vmem:[%s1589_s0 + $0x85] ss:$16 sm:%s546_s18]   ;;  %s554_s12 = smov 48  ;;  %s571_s20 = smov 3 }
  0x2c   :  { %v939_v52 = vld [vmem:[%s1589_s0 + $0x86] ss:$16 sm:%s501_s11]   ;;  %v918_v59 = vld [vmem:[%s1589_s0 + $0x8] ss:$16 sm:%s379_s23]   ;;  %s1020_s11 = smov 56   ;;  %s574_s6 = smov 12 }
  0x2d   :  { %v937_v54 = vld [vmem:[%s1589_s0 + $0x6] ss:$16 sm:%s488_s28]   ;;  %v504_v57 = vsel %vm6_vm0, %v939_v52, %v938_v51  ;;  %v919_v60 = vld [vmem:[%s1589_s0 + $0x8] ss:$16 sm:%s382_s16]   ;;  %s559_s23 = smov 192  ;;  %s579_s16 = smov 48 }
  0x2e   :  { %419 = vrot.lane.b32.xlu0 %v418_v44, %s1019_s24  ;;  %v940_v55 = vld [vmem:[%s1589_s0 + $0x86] ss:$16 sm:%s506_s17]   ;;  %v385_v61 = vsel %vm6_vm0, %v919_v60, %v918_v59  ;;  %v491_v2 = vsel %vm14_vm2, %v937_v54, %v486_v56  ;;  %s458_s5 = smov 48  ;;  %s1021_s7 = smov 48  }
  0x2f   :  { %323 = vrot.lane.b32.xlu2 %v322_v49, %s1017_s19  ;;  %v920_v62 = vld [vmem:[%s1589_s0 + $0x8] ss:$16 sm:%s387_s27]   ;;  %v509_v3 = vsel %vm10_vm1, %v940_v55, %v504_v57  ;;  %s450_s27 = smov 3  ;;  %s622_s13 = smov 12 }
  0x30   :  { %444 = vrot.lane.b32.xlu1 %v443_v53, %s1020_s11  ;;  %v947_v63 = vld [vmem:[%s1589_s0 + $0x85] ss:$16 sm:%s549_s2]   ;;  %v390_v0 = vsel %vm10_vm1, %v920_v62, %v385_v61  ;;  %s584_s15 = smov 192  ;;  %s627_s21 = smov 48 }
  0x31   :  { %v921_v1 = vld [vmem:[%s1589_s0 + $0x8] ss:$16 sm:%s392_s3]   ;;  %v941_v4 = vld [vmem:[%s1589_s0 + $0x86] ss:$16 sm:%s511_s4]   ;;  %v552_v7 = vsel %vm6_vm0, %v947_v63, %v946_v58  ;;  %s453_s4 = smov 12  ;;  %s642_s19 = smov 3 }
  0x32   :  { %v948_v5 = vld [vmem:[%s1589_s0 + $0x85] ss:$16 sm:%s554_s12]   ;;  %v395_v6 = vsel %vm14_vm2, %v921_v1, %v390_v0  ;;  %v950_v8 = vld [vmem:[%s1589_s0 + $0x4] ss:$16 sm:%s571_s20]   ;;  %v514_v10 = vsel %vm14_vm2, %v941_v4, %v509_v3  ;;  %s463_s12 = smov 192  ;;  %s645_s30 = smov 12 }
  0x33   :  { %v951_v9 = vld [vmem:[%s1589_s0 + $0x4] ss:$16 sm:%s574_s6]   ;;  %v949_v11 = vld [vmem:[%s1589_s0 + $0x85] ss:$16 sm:%s559_s23]   ;;  %v557_v14 = vsel %vm10_vm1, %v948_v5, %v552_v7  ;;  %s526_s9 = smov 12  ;;  %s531_s28 = smov 48 }
  0x34   :  { %v952_v12 = vld [vmem:[%s1589_s0 + $0x4] ss:$16 sm:%s579_s16]   ;;  %v930_v13 = vld [vmem:[%s1589_s0 + $0x87] ss:$16 sm:%s450_s27]   ;;  %v577_v15 = vsel %vm6_vm0, %v951_v9, %v950_v8  ;;  %v562_v23 = vsel %vm14_vm2, %v949_v11, %v557_v14  ;;  %s1022_s14 = smov 40   ;;  %s536_s6 = smov 192 }
  0x35   :  { %v931_v16 = vld [vmem:[%s1589_s0 + $0x87] ss:$16 sm:%s453_s4]   ;;  %v959_v21 = vld [vmem:[%s1589_s0 + $0x3] ss:$16 sm:%s622_s13]   ;;  %v582_v24 = vsel %vm10_vm1, %v952_v12, %v577_v15  ;;  %s632_s4 = smov 192  ;;  %s650_s13 = smov 48 }
  0x36   :  { %492 = vrot.lane.b32.xlu0 %v491_v2, %s1021_s7  ;;  %v932_v17 = vld [vmem:[%s1589_s0 + $0x87] ss:$16 sm:%s458_s5]   ;;  %v456_v18 = vsel %vm6_vm0, %v931_v16, %v930_v13  ;;  %s523_s5 = smov 3  ;;  %s655_s26 = smov 192 }
  0x37   :  { %396 = vrot.lane.b32.xlu2 %v395_v6, %s1019_s24  ;;  %s619_s24 = smov 3  ;;  %v933_v19 = vld [vmem:[%s1589_s0 + $0x87] ss:$16 sm:%s463_s12]   ;;  %v461_v22 = vsel %vm10_vm1, %v932_v17, %v456_v18  ;;  %s1023_s2 = smov 32  }
  0x38   :  { %515 = vrot.lane.b32.xlu1 %v514_v10, %s1021_s7  ;;  %v958_v20 = vld [vmem:[%s1589_s0 + $0x3] ss:$16 sm:%s619_s24]   ;;  %v466_v27 = vsel %vm14_vm2, %v933_v19, %v461_v22  ;;  %s698_s3 = smov 48  ;;  %s597_s7 = smov 12 }
  0x39   :  { %v953_v25 = vld [vmem:[%s1589_s0 + $0x4] ss:$16 sm:%s584_s15]   ;;  %v960_v26 = vld [vmem:[%s1589_s0 + $0x3] ss:$16 sm:%s627_s21]   ;;  %v625_v28 = vsel %vm6_vm0, %v959_v21, %v958_v20  ;;  %s693_s21 = smov 12  ;;  %s715_s12 = smov 3 }
  0x3a   :  { %v962_v29 = vld [vmem:[%s1589_s0 + $0x83] ss:$16 sm:%s642_s19]   ;;  %v587_v31 = vsel %vm14_vm2, %v953_v25, %v582_v24  ;;  %v942_v33 = vld [vmem:[%s1589_s0 + $0x5] ss:$16 sm:%s523_s5]   ;;  %v630_v35 = vsel %vm10_vm1, %v960_v26, %v625_v28  ;;  %s718_s24 = smov 12  ;;  %s602_s18 = smov 48 }
  0x3b   :  { %v963_v30 = vld [vmem:[%s1589_s0 + $0x83] ss:$16 sm:%s645_s30]   ;;  %v943_v34 = vld [vmem:[%s1589_s0 + $0x5] ss:$16 sm:%s526_s9]   ;;  %s594_s30 = smov 3  ;;  %s703_s22 = smov 192 }
  0x3c   :  { %v961_v32 = vld [vmem:[%s1589_s0 + $0x3] ss:$16 sm:%s632_s4]   ;;  %v648_v36 = vsel %vm6_vm0, %v963_v30, %v962_v29  ;;  %v529_v38 = vsel %vm6_vm0, %v943_v34, %v942_v33  ;;  %v944_v39 = vld [vmem:[%s1589_s0 + $0x5] ss:$16 sm:%s531_s28]   ;;  %s723_s27 = smov 48  ;;  %s1024_s19 = smov 24  }
  0x3d   :  { %v964_v37 = vld [vmem:[%s1589_s0 + $0x83] ss:$16 sm:%s650_s13]   ;;  %v534_v40 = vsel %vm10_vm1, %v944_v39, %v529_v38  ;;  %v945_v41 = vld [vmem:[%s1589_s0 + $0x5] ss:$16 sm:%s536_s6]   ;;  %v635_v44 = vsel %vm14_vm2, %v961_v32, %v630_v35  ;;  %s607_s4 = smov 192  ;;  %s667_s29 = smov 3 }
  0x3e   :  { %563 = vrot.lane.b32.xlu0 %v562_v23, %s1022_s14  ;;  %v971_v43 = vld [vmem:[%s1589_s0 + $0x82] ss:$16 sm:%s693_s21]   ;;  %v653_v45 = vsel %vm10_vm1, %v964_v37, %v648_v36  ;;  %v539_v49 = vsel %vm14_vm2, %v945_v41, %v534_v40  ;;  %s670_s10 = smov 12  ;;  %s675_s6 = smov 48 }
  0x3f   :  { %467 = vrot.lane.b32.xlu2 %v466_v27, %s1020_s11  ;;  %s690_s11 = smov 3  ;;  %v965_v46 = vld [vmem:[%s1589_s0 + $0x83] ss:$16 sm:%s655_s26]   ;;  %s680_s23 = smov 192 }
  0x40   :  { %588 = vrot.lane.b32.xlu1 %v587_v31, %s1023_s2  ;;  %v970_v42 = vld [vmem:[%s1589_s0 + $0x82] ss:$16 sm:%s690_s11]   ;;  %v658_v54 = vsel %vm14_vm2, %v965_v46, %v653_v45  ;;  %s1025_s11 = smov 16   ;;  %s741_s16 = smov 12 }
  0x41   :  { %v954_v47 = vld [vmem:[%s1589_s0 + $0x84] ss:$16 sm:%s594_s30]   ;;  %v972_v48 = vld [vmem:[%s1589_s0 + $0x82] ss:$16 sm:%s698_s3]   ;;  %v696_v51 = vsel %vm6_vm0, %v971_v43, %v970_v42  ;;  %s1026_s25 = smov 8   ;;  %s8_s30 = smov 48 }
  0x42   :  { %v955_v50 = vld [vmem:[%s1589_s0 + $0x84] ss:$16 sm:%s597_s7]   ;;  %v974_v52 = vld [vmem:[%s1589_s0 + $0x1] ss:$16 sm:%s715_s12]   ;;  %v701_v57 = vsel %vm10_vm1, %v972_v48, %v696_v51  ;;  %s12_s3 = smov 192  ;;  %s2_s8 = smov 3 }
  0x43   :  { %v975_v53 = vld [vmem:[%s1589_s0 + $0x1] ss:$16 sm:%s718_s24]   ;;  %v600_v55 = vsel %vm6_vm0, %v955_v50, %v954_v47  ;;  %v956_v56 = vld [vmem:[%s1589_s0 + $0x84] ss:$16 sm:%s602_s18]   ;;  %s4_s9 = smov 12  ;;  %s751_s15 = smov 192 }
  0x44   :  { %v973_v58 = vld [vmem:[%s1589_s0 + $0x82] ss:$16 sm:%s703_s22]   ;;  %v721_v59 = vsel %vm6_vm0, %v975_v53, %v974_v52  ;;  %v976_v60 = vld [vmem:[%s1589_s0 + $0x1] ss:$16 sm:%s723_s27]   ;;  %v605_v61 = vsel %vm10_vm1, %v956_v56, %v600_v55  ;;  %s20_s22 = smov 3 }
  0x45   :  { %v957_v62 = vld [vmem:[%s1589_s0 + $0x84] ss:$16 sm:%s607_s4]   ;;  %v706_v0 = vsel %vm14_vm2, %v973_v58, %v701_v57  ;;  %v726_v1 = vsel %vm10_vm1, %v976_v60, %v721_v59  ;;  %v966_v2 = vld [vmem:[%s1589_s0 + $0x2] ss:$16 sm:%s667_s29]  }
  0x46   :  { %636 = vrot.lane.b32.xlu0 %v635_v44, %s1024_s19  ;;  %v967_v3 = vld [vmem:[%s1589_s0 + $0x2] ss:$16 sm:%s670_s10]   ;;  %v610_v4 = vsel %vm14_vm2, %v957_v62, %v605_v61 }
  0x47   :  { %540 = vrot.lane.b32.xlu2 %v539_v49, %s1022_s14  ;;  %s728_s14 = smov 192  ;;  %v673_v6 = vsel %vm6_vm0, %v967_v3, %v966_v2  ;;  %v968_v7 = vld [vmem:[%s1589_s0 + $0x2] ss:$16 sm:%s675_s6]  }
  0x48   :  { %659 = vrot.lane.b32.xlu1 %v658_v54, %s1024_s19  ;;  %v977_v63 = vld [vmem:[%s1589_s0 + $0x1] ss:$16 sm:%s728_s14]   ;;  %v678_v8 = vsel %vm10_vm1, %v968_v7, %v673_v6  ;;  %s746_s19 = smov 48 }
  0x49   :  { %v731_v5 = vsel %vm14_vm2, %v977_v63, %v726_v1  ;;  %v969_v9 = vld [vmem:[%s1589_s0 + $0x2] ss:$16 sm:%s680_s23]   ;;  %v979_v11 = vld [vmem:[%s1589_s0 + $0x81] ss:$16 sm:%s741_s16]   ;;  %s23_s23 = smov 12  ;;  %s33_s16 = smov 192 }
  0x4a   :  { %v683_v12 = vsel %vm14_vm2, %v969_v9, %v678_v8  ;;  %v980_v13 = vld [vmem:[%s1589_s0 + $0x81] ss:$16 sm:%s746_s19]   ;;  %v9_v14 = vld [vmem:[%s1589_s0] ss:$16 sm:%s8_s30]  }
  0x4b   :  { %v13_v15 = vld [vmem:[%s1589_s0] ss:$16 sm:%s12_s3]   ;;  %v981_v22 = vld [vmem:[%s1589_s0 + $0x81] ss:$16 sm:%s751_s15]  }
  0x4c   :  { %v3_v17 = vld [vmem:[%s1589_s0] ss:$16 sm:%s2_s8]  }
  0x4d   :  { %v5_v18 = vld [vmem:[%s1589_s0] ss:$16 sm:%s4_s9]  }
  0x4e   :  { %707 = vrot.lane.b32.xlu0 %v706_v0, %s1025_s11  ;;  %v7_v19 = vsel %vm6_vm0, %v5_v18, %v3_v17  ;;  %v858_v25 = vld [vmem:[%s1589_s0 + $0x80] ss:$16 sm:%s20_s22]  }
  0x4f   :  { %611 = vrot.lane.b32.xlu2 %v610_v4, %s1023_s2  ;;  %s738_s2 = smov 3  ;;  %v11_v20 = vsel %vm10_vm1, %v9_v14, %v7_v19  ;;  %v859_v26 = vld [vmem:[%s1589_s0 + $0x80] ss:$16 sm:%s23_s23]  }
  0x50   :  { %732 = vrot.lane.b32.xlu1 %v731_v5, %s1026_s25  ;;  %v978_v10 = vld [vmem:[%s1589_s0 + $0x81] ss:$16 sm:%s738_s2]   ;;  %v15_v23 = vsel %vm14_vm2, %v13_v15, %v11_v20  ;;  %s28_s2 = smov 48  ;;  %v26_v29 = vsel %vm6_vm0, %v859_v26, %v858_v25 }
  0x51   :  { %v744_v16 = vsel %vm6_vm0, %v979_v11, %v978_v10  ;;  %17 = vst.msk [vmem:[#allocation0] ss:$8 sm:$0xf] %vm16_vm3, %v15_v23   ;;  %v860_v27 = vld [vmem:[%s1589_s0 + $0x80] ss:$16 sm:%s28_s2]   ;;  %vm638_vm0 = vcmask 261312  }
  0x52   :  { %v749_v21 = vsel %vm10_vm1, %v980_v13, %v744_v16  ;;  %18 = vst.msk [vmem:[#allocation0] ss:$8 sm:$0xf0] %vm16_vm3, %v15_v23   ;;  %v861_v28 = vld [vmem:[%s1589_s0 + $0x80] ss:$16 sm:%s33_s16]   ;;  %v31_v30 = vsel %vm10_vm1, %v860_v27, %v26_v29  ;;  %vm686_vm1 = vcmask 195712  }
  0x53   :  { %v754_v24 = vsel %vm14_vm2, %v981_v22, %v749_v21  ;;  %v36_v31 = vsel %vm14_vm2, %v861_v28, %v31_v30  ;;  %vm734_vm2 = vcmask 130112  }
  0x54   :  { %39 = vst.msk [vmem:[#allocation0 + $0x40] ss:$8 sm:$0xf] %vm16_vm3, %v36_v31  }
  0x55   :  { %41 = vst.msk [vmem:[#allocation0 + $0x40] ss:$8 sm:$0xf0] %vm16_vm3, %v36_v31  }
  0x57   :  { %684 = vrot.lane.b32.xlu2 %v683_v12, %s1025_s11 }
  0x5f   :  { %755 = vrot.lane.b32.xlu2 %v754_v24, %s1026_s25 }
  0x71   :  { %v157_v32 = vpop.permute.xlu2 %156  }
  0x78   :  { %v61_v33 = vpop.permute.xlu0 %60  }
  0x79   :  { %63 = vst.msk [vmem:[#allocation0] ss:$8 sm:$0xf] %vm62_vm4, %v61_v33   ;;  %v180_v34 = vpop.permute.xlu2 %179  }
  0x7a   :  { %64 = vst.msk [vmem:[#allocation0] ss:$8 sm:$0xf0] %vm62_vm4, %v61_v33   ;;  %v109_v35 = vpop.permute.xlu1 %108  }
  0x7b   :  { %111 = vst.msk [vmem:[#allocation0] ss:$8 sm:$0xf] %vm110_vm5, %v109_v35  }
  0x7c   :  { %112 = vst.msk [vmem:[#allocation0] ss:$8 sm:$0xf0] %vm110_vm5, %v109_v35  }
  0x7d   :  { %159 = vst.msk [vmem:[#allocation0] ss:$8 sm:$0xf] %vm158_vm6, %v157_v32  }
  0x7e   :  { %160 = vst.msk [vmem:[#allocation0] ss:$8 sm:$0xf0] %vm158_vm6, %v157_v32  }
  0x80   :  { %v84_v36 = vpop.permute.xlu0 %83  }
  0x81   :  { %87 = vst.msk [vmem:[#allocation0 + $0x40] ss:$8 sm:$0xf] %vm62_vm4, %v84_v36   ;;  %v253_v37 = vpop.permute.xlu2 %252  }
  0x82   :  { %89 = vst.msk [vmem:[#allocation0 + $0x40] ss:$8 sm:$0xf0] %vm62_vm4, %v84_v36   ;;  %v132_v38 = vpop.permute.xlu1 %131  }
  0x83   :  { %135 = vst.msk [vmem:[#allocation0 + $0x40] ss:$8 sm:$0xf] %vm110_vm5, %v132_v38  }
  0x84   :  { %137 = vst.msk [vmem:[#allocation0 + $0x40] ss:$8 sm:$0xf0] %vm110_vm5, %v132_v38  }
  0x85   :  { %183 = vst.msk [vmem:[#allocation0 + $0x40] ss:$8 sm:$0xf] %vm158_vm6, %v180_v34  }
  0x86   :  { %185 = vst.msk [vmem:[#allocation0 + $0x40] ss:$8 sm:$0xf0] %vm158_vm6, %v180_v34  }
  0x88   :  { %v205_v39 = vpop.permute.xlu0 %204  }
  0x89   :  { %207 = vst.msk [vmem:[#allocation0] ss:$8 sm:$0xf] %vm206_vm7, %v205_v39   ;;  %v324_v40 = vpop.permute.xlu2 %323  }
  0x8a   :  { %208 = vst.msk [vmem:[#allocation0] ss:$8 sm:$0xf0] %vm206_vm7, %v205_v39   ;;  %v228_v41 = vpop.permute.xlu1 %227  }
  0x8b   :  { %255 = vst.msk [vmem:[#allocation0] ss:$8 sm:$0xf] %vm254_vm8, %v253_v37  }
  0x8c   :  { %256 = vst.msk [vmem:[#allocation0] ss:$8 sm:$0xf0] %vm254_vm8, %v253_v37  }
  0x8d   :  { %231 = vst.msk [vmem:[#allocation0 + $0x40] ss:$8 sm:$0xf] %vm206_vm7, %v228_v41  }
  0x8e   :  { %233 = vst.msk [vmem:[#allocation0 + $0x40] ss:$8 sm:$0xf0] %vm206_vm7, %v228_v41  }
  0x90   :  { %v276_v42 = vpop.permute.xlu0 %275  }
  0x91   :  { %279 = vst.msk [vmem:[#allocation0 + $0x40] ss:$8 sm:$0xf] %vm254_vm8, %v276_v42   ;;  %v397_v43 = vpop.permute.xlu2 %396  }
  0x92   :  { %281 = vst.msk [vmem:[#allocation0 + $0x40] ss:$8 sm:$0xf0] %vm254_vm8, %v276_v42   ;;  %v301_v44 = vpop.permute.xlu1 %300  }
  0x93   :  { %327 = vst.msk [vmem:[#allocation0 + $0x40] ss:$8 sm:$0xf] %vm302_vm9, %v324_v40  }
  0x94   :  { %329 = vst.msk [vmem:[#allocation0 + $0x40] ss:$8 sm:$0xf0] %vm302_vm9, %v324_v40  }
  0x95   :  { %303 = vst.msk [vmem:[#allocation0] ss:$8 sm:$0xf] %vm302_vm9, %v301_v44  }
  0x96   :  { %304 = vst.msk [vmem:[#allocation0] ss:$8 sm:$0xf0] %vm302_vm9, %v301_v44  }
  0x98   :  { %v349_v45 = vpop.permute.xlu0 %348  }
  0x99   :  { %351 = vst.msk [vmem:[#allocation0] ss:$8 sm:$0xf] %vm350_vm10, %v349_v45   ;;  %v468_v46 = vpop.permute.xlu2 %467  }
  0x9a   :  { %352 = vst.msk [vmem:[#allocation0] ss:$8 sm:$0xf0] %vm350_vm10, %v349_v45   ;;  %v372_v47 = vpop.permute.xlu1 %371  }
  0x9b   :  { %399 = vst.msk [vmem:[#allocation0] ss:$8 sm:$0xf] %vm398_vm11, %v397_v43  }
  0x9c   :  { %400 = vst.msk [vmem:[#allocation0] ss:$8 sm:$0xf0] %vm398_vm11, %v397_v43  }
  0x9d   :  { %375 = vst.msk [vmem:[#allocation0 + $0x40] ss:$8 sm:$0xf] %vm350_vm10, %v372_v47  }
  0x9e   :  { %377 = vst.msk [vmem:[#allocation0 + $0x40] ss:$8 sm:$0xf0] %vm350_vm10, %v372_v47  }
  0xa0   :  { %v420_v48 = vpop.permute.xlu0 %419  }
  0xa1   :  { %423 = vst.msk [vmem:[#allocation0 + $0x40] ss:$8 sm:$0xf] %vm398_vm11, %v420_v48   ;;  %v541_v49 = vpop.permute.xlu2 %540  }
  0xa2   :  { %425 = vst.msk [vmem:[#allocation0 + $0x40] ss:$8 sm:$0xf0] %vm398_vm11, %v420_v48   ;;  %v445_v50 = vpop.permute.xlu1 %444  }
  0xa3   :  { %471 = vst.msk [vmem:[#allocation0 + $0x40] ss:$8 sm:$0xf] %vm446_vm12, %v468_v46  }
  0xa4   :  { %473 = vst.msk [vmem:[#allocation0 + $0x40] ss:$8 sm:$0xf0] %vm446_vm12, %v468_v46  }
  0xa5   :  { %447 = vst.msk [vmem:[#allocation0] ss:$8 sm:$0xf] %vm446_vm12, %v445_v50  }
  0xa6   :  { %448 = vst.msk [vmem:[#allocation0] ss:$8 sm:$0xf0] %vm446_vm12, %v445_v50  }
  0xa8   :  { %v493_v51 = vpop.permute.xlu0 %492  }
  0xa9   :  { %495 = vst.msk [vmem:[#allocation0] ss:$8 sm:$0xf] %vm494_vm13, %v493_v51   ;;  %v612_v52 = vpop.permute.xlu2 %611  }
  0xaa   :  { %496 = vst.msk [vmem:[#allocation0] ss:$8 sm:$0xf0] %vm494_vm13, %v493_v51   ;;  %v516_v53 = vpop.permute.xlu1 %515  }
  0xab   :  { %543 = vst.msk [vmem:[#allocation0] ss:$8 sm:$0xf] %vm542_vm14, %v541_v49  }
  0xac   :  { %544 = vst.msk [vmem:[#allocation0] ss:$8 sm:$0xf0] %vm542_vm14, %v541_v49  }
  0xad   :  { %519 = vst.msk [vmem:[#allocation0 + $0x40] ss:$8 sm:$0xf] %vm494_vm13, %v516_v53  }
  0xae   :  { %521 = vst.msk [vmem:[#allocation0 + $0x40] ss:$8 sm:$0xf0] %vm494_vm13, %v516_v53  }
  0xb0   :  { %v564_v54 = vpop.permute.xlu0 %563  }
  0xb1   :  { %567 = vst.msk [vmem:[#allocation0 + $0x40] ss:$8 sm:$0xf] %vm542_vm14, %v564_v54   ;;  %v685_v55 = vpop.permute.xlu2 %684  }
  0xb2   :  { %569 = vst.msk [vmem:[#allocation0 + $0x40] ss:$8 sm:$0xf0] %vm542_vm14, %v564_v54   ;;  %v589_v56 = vpop.permute.xlu1 %588  }
  0xb3   :  { %615 = vst.msk [vmem:[#allocation0 + $0x40] ss:$8 sm:$0xf] %vm590_vm15, %v612_v52  }
  0xb4   :  { %617 = vst.msk [vmem:[#allocation0 + $0x40] ss:$8 sm:$0xf0] %vm590_vm15, %v612_v52  }
  0xb5   :  { %591 = vst.msk [vmem:[#allocation0] ss:$8 sm:$0xf] %vm590_vm15, %v589_v56  }
  0xb6   :  { %592 = vst.msk [vmem:[#allocation0] ss:$8 sm:$0xf0] %vm590_vm15, %v589_v56  }
  0xb8   :  { %v637_v57 = vpop.permute.xlu0 %636  }
  0xb9   :  { %639 = vst.msk [vmem:[#allocation0] ss:$8 sm:$0xf] %vm638_vm0, %v637_v57   ;;  %v756_v58 = vpop.permute.xlu2 %755  }
  0xba   :  { %640 = vst.msk [vmem:[#allocation0] ss:$8 sm:$0xf0] %vm638_vm0, %v637_v57   ;;  %v660_v59 = vpop.permute.xlu1 %659  }
  0xbb   :  { %687 = vst.msk [vmem:[#allocation0] ss:$8 sm:$0xf] %vm686_vm1, %v685_v55  }
  0xbc   :  { %688 = vst.msk [vmem:[#allocation0] ss:$8 sm:$0xf0] %vm686_vm1, %v685_v55  }
  0xbd   :  { %663 = vst.msk [vmem:[#allocation0 + $0x40] ss:$8 sm:$0xf] %vm638_vm0, %v660_v59  }
  0xbe   :  { %665 = vst.msk [vmem:[#allocation0 + $0x40] ss:$8 sm:$0xf0] %vm638_vm0, %v660_v59  }
  0xc0   :  { %v708_v60 = vpop.permute.xlu0 %707  }
  0xc1   :  { %711 = vst.msk [vmem:[#allocation0 + $0x40] ss:$8 sm:$0xf] %vm686_vm1, %v708_v60  }
  0xc2   :  { %713 = vst.msk [vmem:[#allocation0 + $0x40] ss:$8 sm:$0xf0] %vm686_vm1, %v708_v60   ;;  %v733_v61 = vpop.permute.xlu1 %732  }
  0xc3   :  { %759 = vst.msk [vmem:[#allocation0 + $0x40] ss:$8 sm:$0xf] %vm734_vm2, %v756_v58  }
  0xc4   :  { %761 = vst.msk [vmem:[#allocation0 + $0x40] ss:$8 sm:$0xf0] %vm734_vm2, %v756_v58  }
  0xc5   :  { %735 = vst.msk [vmem:[#allocation0] ss:$8 sm:$0xf] %vm734_vm2, %v733_v61  }
  0xc6   :  { %736 = vst.msk [vmem:[#allocation0] ss:$8 sm:$0xf0] %vm734_vm2, %v733_v61  }
  0xca   :  { %v811_v62 = vld [vmem:[#allocation0 + $0x40] sm:$0x1]  ;;  %v817_v63 = vld [vmem:[#allocation0 + $0x48] sm:$0x1]  ;;  %v823_v0 = vld [vmem:[#allocation0 + $0x50] sm:$0x1] }
  0xcb   :  { %989 = vst [vmem:[%s1590_s1 + $0x8] sm:$0x1] %v811_v62  ;;  %v829_v1 = vld [vmem:[#allocation0 + $0x58] sm:$0x1]  ;;  %v835_v2 = vld [vmem:[#allocation0 + $0x60] sm:$0x1] }
  0xcc   :  { %990 = vst [vmem:[%s1590_s1 + $0x9] sm:$0x1] %v817_v63  ;;  %v841_v3 = vld [vmem:[#allocation0 + $0x68] sm:$0x1]  ;;  %v847_v4 = vld [vmem:[#allocation0 + $0x70] sm:$0x1] }
  0xcd   :  { %991 = vst [vmem:[%s1590_s1 + $0xa] sm:$0x1] %v823_v0  ;;  %v853_v5 = vld [vmem:[#allocation0 + $0x78] sm:$0x1]  ;;  %v764_v6 = vld [vmem:[#allocation0] sm:$0x1] }
  0xce   :  { %992 = vst [vmem:[%s1590_s1 + $0xb] sm:$0x1] %v829_v1  ;;  %v769_v7 = vld [vmem:[#allocation0 + $0x8] sm:$0x1]  ;;  %v775_v8 = vld [vmem:[#allocation0 + $0x10] sm:$0x1] }
  0xcf   :  { %993 = vst [vmem:[%s1590_s1 + $0xc] sm:$0x1] %v835_v2  ;;  %v781_v9 = vld [vmem:[#allocation0 + $0x18] sm:$0x1]  ;;  %v787_v10 = vld [vmem:[#allocation0 + $0x20] sm:$0x1] }
  0xd0   :  { %994 = vst [vmem:[%s1590_s1 + $0xd] sm:$0x1] %v841_v3  ;;  %v793_v11 = vld [vmem:[#allocation0 + $0x28] sm:$0x1]  ;;  %v799_v12 = vld [vmem:[#allocation0 + $0x30] sm:$0x1] }
  0xd1   :  { %995 = vst [vmem:[%s1590_s1 + $0xe] sm:$0x1] %v847_v4  ;;  %v805_v13 = vld [vmem:[#allocation0 + $0x38] sm:$0x1] }
  0xd2   :  { %996 = vst [vmem:[%s1590_s1 + $0xf] sm:$0x1] %v853_v5 }
  0xd3   :  { %767 = vst [vmem:[%s1590_s1] sm:$0x1] %v764_v6 }
  0xd4   :  { %982 = vst [vmem:[%s1590_s1 + $0x1] sm:$0x1] %v769_v7 }
  0xd5   :  { %983 = vst [vmem:[%s1590_s1 + $0x2] sm:$0x1] %v775_v8 }
  0xd6   :  { %984 = vst [vmem:[%s1590_s1 + $0x3] sm:$0x1] %v781_v9 }
  0xd7   :  { %985 = vst [vmem:[%s1590_s1 + $0x4] sm:$0x1] %v787_v10 }
  0xd8   :  { %986 = vst [vmem:[%s1590_s1 + $0x5] sm:$0x1] %v793_v11 }
  0xd9   :  { %987 = vst [vmem:[%s1590_s1 + $0x6] sm:$0x1] %v799_v12 }
  0xda   :  { %988 = vst [vmem:[%s1590_s1 + $0x7] sm:$0x1] %v805_v13 }

// kernel: residual_inner_forward.5
= control target key start
LH: loop header
LB: loop body
LE: loop exit
PB: predicated region body
PF: predicated region fallthrough
CT: control target
= control target key end

     0   :  { %s584_s12 = smov 0   ;;  %s838_s0 = inlined_call_operand.vmem [shape: f32[32,2048], index: 0, kind: input, shape index: {}]   ;;  %s839_s1 = inlined_call_operand.vmem [shape: f32[1,2048], index: 1, kind: input, shape index: {}]   ;;  %s840_s2 = inlined_call_operand.vmem [shape: f32[1,2048], index: 2, kind: input, shape index: {}]   ;;  %s841_s3 = inlined_call_operand.vmem [shape: bf16[32,2048], index: 3, kind: output, shape index: {}]  }
   0x1 LB: > { %s533_s13 = sadd.s32 4294967295, %s562_s12   ;;  %p537_p0 = scmp.ge.s32.totalorder %s562_s12, 1  ;;  %s562_s12 = sphi %s584_s12, %s13_s12  }
   0x2   : > { %p139_p1 = scmp.lt.s32.totalorder %s562_s12, 3 }
   0x4   : > { %p140_p2 = pnand %p537_p0, %p139_p1 }
   0x5   : > { %s538_s14 = sshll.u32 (!%p140_p2), %s533_s13, 1 }
   0x6   : > { %143 = sbr.rel (%p140_p2) target bundleno = 69 (0x45), region = 32  ;;  %p166_p3 = scmp.lt.s32.totalorder (!%p140_p2), %s538_s14, 3 }
   0xb   : > { %v595_v0 = vld [vmem:[%s839_s1] sm:$0xff]  ;;  %v613_v10 = vld [vmem:[%s839_s1 + $0x8] sm:$0xff]  ;;  %s843_s14 = smov (!%p166_p3, %s538_s14), 3 }
   0xc   : > { %v600_v1 = vld [vmem:[%s840_s2] sm:$0xff]  ;;  %v215_v2 = vperm.slane %v595_v0, 0  ;;  %v216_v3 = vperm.slane %v595_v0, 1  ;;  %v217_v6 = vperm.slane %v595_v0, 2  ;;  %v218_v7 = vperm.slane %v595_v0, 3  ;;  %v618_v11 = vld [vmem:[%s840_s2 + $0x8] sm:$0xff] }
   0xd   : > { %v283_v4 = vperm.slane %v600_v1, 0  ;;  %v284_v5 = vperm.slane %v600_v1, 1  ;;  %v285_v8 = vperm.slane %v600_v1, 2  ;;  %v286_v9 = vperm.slane %v600_v1, 3  ;;  %s546_s23 = sshll.u32 %s843_s14, 7  ;;  %s547_s27 = sshll.u32 %s843_s14, 6 }
   0xe   : > { %v219_v12 = vperm.slane %v595_v0, 4  ;;  %v220_v13 = vperm.slane %v595_v0, 5  ;;  %v287_v14 = vperm.slane %v600_v1, 4  ;;  %v288_v15 = vperm.slane %v600_v1, 5  ;;  %s638_s26 = scalar_lea.vmem %s838_s0, %s546_s23  ;;  %s689_s30 = scalar_lea.vmem %s841_s3, %s547_s27 }
   0xf   : > { %v221_v16 = vperm.slane %v595_v0, 6  ;;  %v222_v17 = vperm.slane %v595_v0, 7  ;;  %v289_v18 = vperm.slane %v600_v1, 6  ;;  %v290_v19 = vperm.slane %v600_v1, 7  ;;  %v179_v28 = vld [vmem:[%s638_s26] sm:$0xff]  ;;  %v180_v29 = vld [vmem:[%s638_s26 + $0x8] sm:$0xff] }
  0x10   : > { %v223_v20 = vperm.slane %v613_v10, 0  ;;  %v224_v21 = vperm.slane %v613_v10, 1  ;;  %v291_v22 = vperm.slane %v618_v11, 0  ;;  %v292_v23 = vperm.slane %v618_v11, 1  ;;  %v181_v30 = vld [vmem:[%s638_s26 + $0x10] sm:$0xff]  ;;  %v182_v36 = vld [vmem:[%s638_s26 + $0x18] sm:$0xff] }
  0x11   : > { %v225_v24 = vperm.slane %v613_v10, 2  ;;  %v226_v25 = vperm.slane %v613_v10, 3  ;;  %v293_v26 = vperm.slane %v618_v11, 2  ;;  %v294_v27 = vperm.slane %v618_v11, 3  ;;  %v183_v38 = vld [vmem:[%s638_s26 + $0x20] sm:$0xff]  ;;  %v184_v39 = vld [vmem:[%s638_s26 + $0x28] sm:$0xff] }
  0x12   : > { %v227_v31 = vperm.slane %v613_v10, 4  ;;  %v228_v32 = vperm.slane %v613_v10, 5  ;;  %v295_v33 = vperm.slane %v618_v11, 4  ;;  %v247_v34 = vmul.f32 %v215_v2, %v179_v28  ;;  %v185_v44 = vld [vmem:[%s638_s26 + $0x30] sm:$0xff]  ;;  %v186_v45 = vld [vmem:[%s638_s26 + $0x38] sm:$0xff]  ;;  %v187_v61 = vld [vmem:[%s638_s26 + $0x40] sm:$0xff] }
  0x13   : > { %v248_v35 = vmul.f32 %v216_v3, %v180_v29  ;;  %v249_v37 = vmul.f32 %v217_v6, %v181_v30  ;;  %v296_v40 = vperm.slane %v618_v11, 5  ;;  %v250_v41 = vmul.f32 %v218_v7, %v182_v36  ;;  %v188_v62 = vld [vmem:[%s638_s26 + $0x48] sm:$0xff]  ;;  %v189_v63 = vld [vmem:[%s638_s26 + $0x50] sm:$0xff] }
  0x14   : > { %v251_v42 = vmul.f32 %v219_v12, %v183_v38  ;;  %v252_v43 = vmul.f32 %v220_v13, %v184_v39  ;;  %v229_v46 = vperm.slane %v613_v10, 6  ;;  %v315_v47 = vadd.f32 %v283_v4, %v247_v34 }
  0x15   : > { %v316_v48 = vadd.f32 %v284_v5, %v248_v35  ;;  %v317_v49 = vadd.f32 %v285_v8, %v249_v37  ;;  %v253_v50 = vmul.f32 %v221_v16, %v185_v44  ;;  %v318_v51 = vadd.f32 %v286_v9, %v250_v41 }
  0x16   : > { %v319_v52 = vadd.f32 %v287_v14, %v251_v42  ;;  %v320_v53 = vadd.f32 %v288_v15, %v252_v43  ;;  %v254_v54 = vmul.f32 %v222_v17, %v186_v45  ;;  %vm347_vm0 = vcmp.ge.f32.partialorder %v315_v47, 0.0  ;;  %v190_v43 = vld [vmem:[%s638_s26 + $0x58] sm:$0xff]  ;;  %v191_v45 = vld [vmem:[%s638_s26 + $0x60] sm:$0xff] }
  0x17   : > { %vm348_vm1 = vcmp.ge.f32.partialorder %v316_v48, 0.0  ;;  %v379_v55 = vmul.f32 0.01, %v315_v47  ;;  %v380_v56 = vmul.f32 0.01, %v316_v48  ;;  %vm349_vm2 = vcmp.ge.f32.partialorder %v317_v49, 0.0 }
  0x18   : > { %vm350_vm3 = vcmp.ge.f32.partialorder %v318_v51, 0.0  ;;  %v381_v57 = vmul.f32 0.01, %v317_v49  ;;  %v382_v58 = vmul.f32 0.01, %v318_v51  ;;  %vm351_vm4 = vcmp.ge.f32.partialorder %v319_v52, 0.0 }
  0x19   : > { %v411_v59 = vsel %vm347_vm0, %v315_v47, %v379_v55  ;;  %v412_v60 = vsel %vm348_vm1, %v316_v48, %v380_v56  ;;  %vm352_vm5 = vcmp.ge.f32.partialorder %v320_v53, 0.0  ;;  %v383_v34 = vmul.f32 0.01, %v319_v52 }
  0x1a   : > { %v443_v28 = vpack.c.bf16 %v412_v60, %v411_v59  ;;  %v413_v29 = vsel %vm349_vm2, %v317_v49, %v381_v57  ;;  %v414_v30 = vsel %vm350_vm3, %v318_v51, %v382_v58  ;;  %v384_v36 = vmul.f32 0.01, %v320_v53 }
  0x1b   : > { %v444_v35 = vpack.c.bf16 %v414_v30, %v413_v29  ;;  %v321_v37 = vadd.f32 %v289_v18, %v253_v50  ;;  %v322_v38 = vadd.f32 %v290_v19, %v254_v54  ;;  %v415_v39 = vsel %vm351_vm4, %v319_v52, %v383_v34  ;;  %v193_v34 = vld [vmem:[%s638_s26 + $0x70] sm:$0xff] }
  0x1c   : > { %459 = vst [vmem:[%s689_s30] sm:$0xff] %v443_v28  ;;  %v255_v41 = vmul.f32 %v223_v20, %v187_v61  ;;  %v256_v42 = vmul.f32 %v224_v21, %v188_v62  ;;  %v257_v44 = vmul.f32 %v225_v24, %v189_v63  ;;  %v416_v47 = vsel %vm352_vm5, %v320_v53, %v384_v36  ;;  %v192_v53 = vld [vmem:[%s638_s26 + $0x68] sm:$0xff] }
  0x1d   : > { %460 = vst [vmem:[%s689_s30 + $0x8] sm:$0xff] %v444_v35  ;;  %vm353_vm6 = vcmp.ge.f32.partialorder %v321_v37, 0.0  ;;  %vm354_vm7 = vcmp.ge.f32.partialorder %v322_v38, 0.0  ;;  %v385_v48 = vmul.f32 0.01, %v321_v37  ;;  %v445_v49 = vpack.c.bf16 %v416_v47, %v415_v39  ;;  %v194_v35 = vld [vmem:[%s638_s26 + $0x78] sm:$0xff] }
  0x1e   : > { %v386_v50 = vmul.f32 0.01, %v322_v38  ;;  %v323_v51 = vadd.f32 %v291_v22, %v255_v41  ;;  %v324_v52 = vadd.f32 %v292_v23, %v256_v42  ;;  %v258_v55 = vmul.f32 %v226_v25, %v190_v43  ;;  %v195_v43 = vld [vmem:[%s638_s26 + $0x80] sm:$0xff] }
  0x1f   : > { %v417_v54 = vsel %vm353_vm6, %v321_v37, %v385_v48  ;;  %v325_v56 = vadd.f32 %v293_v26, %v257_v44  ;;  %v259_v57 = vmul.f32 %v227_v31, %v191_v45  ;;  %461 = vst [vmem:[%s689_s30 + $0x10] sm:$0xff] %v445_v49  ;;  %v260_v29 = vmul.f32 %v228_v32, %v192_v53  ;;  %v196_v44 = vld [vmem:[%s638_s26 + $0x88] sm:$0xff] }
  0x20   : > { %v418_v58 = vsel %vm354_vm7, %v322_v38, %v386_v50  ;;  %vm355_vm8 = vcmp.ge.f32.partialorder %v323_v51, 0.0  ;;  %vm356_vm9 = vcmp.ge.f32.partialorder %v324_v52, 0.0  ;;  %v387_v59 = vmul.f32 0.01, %v323_v51  ;;  %v197_v50 = vld [vmem:[%s638_s26 + $0x90] sm:$0xff] }
  0x21   : > { %v446_v60 = vpack.c.bf16 %v418_v58, %v417_v54  ;;  %v388_v61 = vmul.f32 0.01, %v324_v52  ;;  %v326_v62 = vadd.f32 %v294_v27, %v258_v55  ;;  %vm357_vm10 = vcmp.ge.f32.partialorder %v325_v56, 0.0 }
  0x22   : > { %v419_v63 = vsel %vm355_vm8, %v323_v51, %v387_v59  ;;  %v389_v28 = vmul.f32 0.01, %v325_v56  ;;  %v327_v30 = vadd.f32 %v295_v33, %v259_v57  ;;  %v230_v38 = vperm.slane %v613_v10, 7  ;;  %v198_v51 = vld [vmem:[%s638_s26 + $0x98] sm:$0xff] }
  0x23   : > { %462 = vst [vmem:[%s689_s30 + $0x18] sm:$0xff] %v446_v60  ;;  %v420_v36 = vsel %vm356_vm9, %v324_v52, %v388_v61  ;;  %vm358_vm11 = vcmp.ge.f32.partialorder %v326_v62, 0.0  ;;  %v390_v37 = vmul.f32 0.01, %v326_v62  ;;  %v328_v42 = vadd.f32 %v296_v40, %v260_v29 }
  0x24   : > { %v447_v39 = vpack.c.bf16 %v420_v36, %v419_v63  ;;  %v421_v41 = vsel %vm357_vm10, %v325_v56, %v389_v28  ;;  %vm359_vm12 = vcmp.ge.f32.partialorder %v327_v30, 0.0  ;;  %v391_v47 = vmul.f32 0.01, %v327_v30 }
  0x25   : > { %v422_v45 = vsel %vm358_vm11, %v326_v62, %v390_v37  ;;  %v261_v48 = vmul.f32 %v229_v46, %v193_v34  ;;  %v262_v49 = vmul.f32 %v230_v38, %v194_v35  ;;  %vm360_vm13 = vcmp.ge.f32.partialorder %v328_v42, 0.0  ;;  %v200_v34 = vld [vmem:[%s638_s26 + $0xa8] sm:$0xff]  ;;  %v201_v37 = vld [vmem:[%s638_s26 + $0xb0] sm:$0xff] }
  0x26   : > { %463 = vst [vmem:[%s689_s30 + $0x20] sm:$0xff] %v447_v39  ;;  %v448_v52 = vpack.c.bf16 %v422_v45, %v421_v41  ;;  %v392_v54 = vmul.f32 0.01, %v328_v42  ;;  %v297_v55 = vperm.slane %v618_v11, 6  ;;  %v423_v56 = vsel %vm359_vm12, %v327_v30, %v391_v47  ;;  %v202_v41 = vld [vmem:[%s638_s26 + $0xb8] sm:$0xff]  ;;  %v203_v47 = vld [vmem:[%s638_s26 + $0xc0] sm:$0xff] }
  0x27   : > { %v298_v53 = vperm.slane %v618_v11, 7  ;;  %v263_v57 = vmul.f32 %v215_v2, %v195_v43  ;;  %v264_v58 = vmul.f32 %v216_v3, %v196_v44  ;;  %v265_v61 = vmul.f32 %v217_v6, %v197_v50 }
  0x28   : > { %464 = vst [vmem:[%s689_s30 + $0x28] sm:$0xff] %v448_v52  ;;  %v424_v59 = vsel %vm360_vm13, %v328_v42, %v392_v54  ;;  %v329_v60 = vadd.f32 %v297_v55, %v261_v48  ;;  %v266_v62 = vmul.f32 %v218_v7, %v198_v51  ;;  %v199_v7 = vld [vmem:[%s638_s26 + $0xa0] sm:$0xff]  ;;  %v204_v48 = vld [vmem:[%s638_s26 + $0xc8] sm:$0xff]  ;;  %v268_v54 = vmul.f32 %v220_v13, %v200_v34  ;;  %v210_v34 = vld [vmem:[%s638_s26 + $0xf8] sm:$0xff] }
  0x29   : > { %v449_v63 = vpack.c.bf16 %v424_v59, %v423_v56  ;;  %v330_v2 = vadd.f32 %v298_v53, %v262_v49  ;;  %v331_v28 = vadd.f32 %v283_v4, %v263_v57  ;;  %v332_v3 = vadd.f32 %v284_v5, %v264_v58  ;;  %v205_v49 = vld [vmem:[%s638_s26 + $0xd0] sm:$0xff] }
  0x2a   : > { %vm361_vm14 = vcmp.ge.f32.partialorder %v329_v60, 0.0  ;;  %v393_v29 = vmul.f32 0.01, %v329_v60  ;;  %v333_v30 = vadd.f32 %v285_v8, %v265_v61  ;;  %v334_v6 = vadd.f32 %v286_v9, %v266_v62  ;;  %v206_v62 = vld [vmem:[%s638_s26 + $0xd8] sm:$0xff] }
  0x2b   : > { %465 = vst [vmem:[%s689_s30 + $0x30] sm:$0xff] %v449_v63  ;;  %vm362_vm15 = vcmp.ge.f32.partialorder %v330_v2, 0.0  ;;  %v394_v35 = vmul.f32 0.01, %v330_v2  ;;  %vm363_vm0 = vcmp.ge.f32.partialorder %v331_v28, 0.0  ;;  %vm364_vm1 = vcmp.ge.f32.partialorder %v332_v3, 0.0 }
  0x2c   : > { %v425_v4 = vsel %vm361_vm14, %v329_v60, %v393_v29  ;;  %v395_v5 = vmul.f32 0.01, %v331_v28  ;;  %v396_v36 = vmul.f32 0.01, %v332_v3  ;;  %vm365_vm2 = vcmp.ge.f32.partialorder %v333_v30, 0.0 }
  0x2d   : > { %v426_v8 = vsel %vm362_vm15, %v330_v2, %v394_v35  ;;  %vm366_vm3 = vcmp.ge.f32.partialorder %v334_v6, 0.0  ;;  %v397_v9 = vmul.f32 0.01, %v333_v30  ;;  %v398_v39 = vmul.f32 0.01, %v334_v6 }
  0x2e   : > { %v450_v42 = vpack.c.bf16 %v426_v8, %v425_v4  ;;  %v427_v43 = vsel %vm363_vm0, %v331_v28, %v395_v5  ;;  %v428_v44 = vsel %vm364_vm1, %v332_v3, %v396_v36  ;;  %v267_v45 = vmul.f32 %v219_v12, %v199_v7  ;;  %v209_v7 = vld [vmem:[%s638_s26 + $0xf0] sm:$0xff] }
  0x2f   : > { %v451_v50 = vpack.c.bf16 %v428_v44, %v427_v43  ;;  %v429_v51 = vsel %vm365_vm2, %v333_v30, %v397_v9  ;;  %v430_v52 = vsel %vm366_vm3, %v334_v6, %v398_v39  ;;  %v269_v58 = vmul.f32 %v221_v16, %v201_v37 }
  0x30   : > { %466 = vst [vmem:[%s689_s30 + $0x38] sm:$0xff] %v450_v42  ;;  %v452_v56 = vpack.c.bf16 %v430_v52, %v429_v51  ;;  %v335_v57 = vadd.f32 %v287_v14, %v267_v45  ;;  %v270_v12 = vmul.f32 %v222_v17, %v202_v41  ;;  %v336_v59 = vadd.f32 %v288_v15, %v268_v54 }
  0x31   : > { %467 = vst [vmem:[%s689_s30 + $0x40] sm:$0xff] %v451_v50  ;;  %v271_v60 = vmul.f32 %v223_v20, %v203_v47  ;;  %v272_v13 = vmul.f32 %v224_v21, %v204_v48  ;;  %v273_v14 = vmul.f32 %v225_v24, %v205_v49  ;;  %v337_v0 = vadd.f32 %v289_v18, %v269_v58  ;;  %v207_v18 = vld [vmem:[%s638_s26 + $0xe0] sm:$0xff] }
  0x32   : > { %468 = vst [vmem:[%s689_s30 + $0x48] sm:$0xff] %v452_v56  ;;  %vm367_vm4 = vcmp.ge.f32.partialorder %v335_v57, 0.0  ;;  %v399_v16 = vmul.f32 0.01, %v335_v57  ;;  %v338_v15 = vadd.f32 %v290_v19, %v270_v12  ;;  %vm368_vm5 = vcmp.ge.f32.partialorder %v336_v59, 0.0  ;;  %v208_v19 = vld [vmem:[%s638_s26 + $0xe8] sm:$0xff] }
  0x33   : > { %v400_v17 = vmul.f32 0.01, %v336_v59  ;;  %v339_v20 = vadd.f32 %v291_v22, %v271_v60  ;;  %v340_v21 = vadd.f32 %v292_v23, %v272_v13  ;;  %vm369_vm6 = vcmp.ge.f32.partialorder %v337_v0, 0.0 }
  0x34   : > { %v431_v61 = vsel %vm367_vm4, %v335_v57, %v399_v16  ;;  %vm370_vm7 = vcmp.ge.f32.partialorder %v338_v15, 0.0  ;;  %v401_v24 = vmul.f32 0.01, %v337_v0  ;;  %v402_v63 = vmul.f32 0.01, %v338_v15 }
  0x35   : > { %v432_v1 = vsel %vm368_vm5, %v336_v59, %v400_v17  ;;  %vm371_vm8 = vcmp.ge.f32.partialorder %v339_v20, 0.0  ;;  %vm372_vm9 = vcmp.ge.f32.partialorder %v340_v21, 0.0  ;;  %v403_v22 = vmul.f32 0.01, %v339_v20 }
  0x36   : > { %v453_v2 = vpack.c.bf16 %v432_v1, %v431_v61  ;;  %v433_v28 = vsel %vm369_vm6, %v337_v0, %v401_v24  ;;  %v404_v3 = vmul.f32 0.01, %v340_v21  ;;  %v434_v23 = vsel %vm370_vm7, %v338_v15, %v402_v63 }
  0x37   : > { %v274_v29 = vmul.f32 %v226_v25, %v206_v62  ;;  %v341_v30 = vadd.f32 %v293_v26, %v273_v14  ;;  %v275_v6 = vmul.f32 %v227_v31, %v207_v18  ;;  %v454_v35 = vpack.c.bf16 %v434_v23, %v433_v28 }
  0x38   : > { %469 = vst [vmem:[%s689_s30 + $0x50] sm:$0xff] %v453_v2  ;;  %v435_v4 = vsel %vm371_vm8, %v339_v20, %v403_v22  ;;  %v436_v5 = vsel %vm372_vm9, %v340_v21, %v404_v3  ;;  %v276_v36 = vmul.f32 %v228_v32, %v208_v19  ;;  %v277_v9 = vmul.f32 %v229_v46, %v209_v7 }
  0x39   : > { %v455_v37 = vpack.c.bf16 %v436_v5, %v435_v4  ;;  %v342_v25 = vadd.f32 %v294_v27, %v274_v29  ;;  %vm373_vm10 = vcmp.ge.f32.partialorder %v341_v30, 0.0  ;;  %v405_v8 = vmul.f32 0.01, %v341_v30  ;;  %470 = vst [vmem:[%s689_s30 + $0x58] sm:$0xff] %v454_v35 }
  0x3a   : > { %v343_v26 = vadd.f32 %v295_v33, %v275_v6  ;;  %v344_v31 = vadd.f32 %v296_v40, %v276_v36  ;;  %v278_v39 = vmul.f32 %v230_v38, %v210_v34  ;;  %v345_v40 = vadd.f32 %v297_v55, %v277_v9 }
  0x3b   : > { %471 = vst [vmem:[%s689_s30 + $0x60] sm:$0xff] %v455_v37  ;;  %vm374_vm11 = vcmp.ge.f32.partialorder %v342_v25, 0.0  ;;  %v406_v32 = vmul.f32 0.01, %v342_v25  ;;  %v437_v27 = vsel %vm373_vm10, %v341_v30, %v405_v8 }
  0x3c   : > { %vm375_vm12 = vcmp.ge.f32.partialorder %v343_v26, 0.0  ;;  %vm376_vm13 = vcmp.ge.f32.partialorder %v344_v31, 0.0  ;;  %v407_v41 = vmul.f32 0.01, %v343_v26  ;;  %v408_v42 = vmul.f32 0.01, %v344_v31 }
  0x3d   : > { %v438_v33 = vsel %vm374_vm11, %v342_v25, %v406_v32  ;;  %v346_v46 = vadd.f32 %v298_v53, %v278_v39  ;;  %vm377_vm14 = vcmp.ge.f32.partialorder %v345_v40, 0.0  ;;  %v409_v45 = vmul.f32 0.01, %v345_v40 }
  0x3e   : > { %v456_v10 = vpack.c.bf16 %v438_v33, %v437_v27  ;;  %v439_v38 = vsel %vm375_vm12, %v343_v26, %v407_v41  ;;  %v440_v43 = vsel %vm376_vm13, %v344_v31, %v408_v42 }
  0x3f   : > { %v457_v44 = vpack.c.bf16 %v440_v43, %v439_v38  ;;  %vm378_vm15 = vcmp.ge.f32.partialorder %v346_v46, 0.0  ;;  %v410_v47 = vmul.f32 0.01, %v346_v46  ;;  %v441_v48 = vsel %vm377_vm14, %v345_v40, %v409_v45 }
  0x40   : > { %472 = vst [vmem:[%s689_s30 + $0x68] sm:$0xff] %v456_v10 }
  0x41   : > { %473 = vst [vmem:[%s689_s30 + $0x70] sm:$0xff] %v457_v44  ;;  %v442_v49 = vsel %vm378_vm15, %v346_v46, %v410_v47 }
  0x42   : > { %v458_v50 = vpack.c.bf16 %v442_v49, %v441_v48 }
  0x44   : > { %474 = vst [vmem:[%s689_s30 + $0x78] sm:$0xff] %v458_v50 }
  0x45 PF: > { %s13_s12 = sadd.s32 1, %s562_s12  }
  0x46   : > { %p10_p4 = scmp.ge.s32.totalorder %s13_s12, 4  }
  0x48   :  { %12 = sbr.rel (!%p10_p4) target bundleno = 1 (0x1), region = 62 }

// kernel: residual_inner_forward.7
= control target key start
LH: loop header
LB: loop body
LE: loop exit
PB: predicated region body
PF: predicated region fallthrough
CT: control target
= control target key end

     0   :  { %s584_s12 = smov 0   ;;  %s856_s0 = inlined_call_operand.vmem [shape: f32[32,2048], index: 0, kind: input, shape index: {}]   ;;  %s857_s1 = inlined_call_operand.vmem [shape: f32[1,2048], index: 1, kind: input, shape index: {}]   ;;  %s858_s2 = inlined_call_operand.vmem [shape: f32[1,2048], index: 2, kind: input, shape index: {}]   ;;  %s859_s3 = inlined_call_operand.vmem [shape: f32[32,2048], index: 3, kind: output, shape index: {}]  }
   0x1 LB: > { %s533_s13 = sadd.s32 4294967295, %s562_s12   ;;  %p537_p0 = scmp.ge.s32.totalorder %s562_s12, 1  ;;  %s562_s12 = sphi %s584_s12, %s13_s12  }
   0x2   : > { %p139_p1 = scmp.lt.s32.totalorder %s562_s12, 3 }
   0x4   : > { %p140_p2 = pnand %p537_p0, %p139_p1 }
   0x5   : > { %s538_s14 = sshll.u32 (!%p140_p2), %s533_s13, 1 }
   0x6   : > { %143 = sbr.rel (%p140_p2) target bundleno = 65 (0x41), region = 32  ;;  %p166_p3 = scmp.lt.s32.totalorder (!%p140_p2), %s538_s14, 3 }
   0xb   : > { %v595_v0 = vld [vmem:[%s857_s1] sm:$0xff]  ;;  %v613_v10 = vld [vmem:[%s857_s1 + $0x8] sm:$0xff]  ;;  %s861_s14 = smov (!%p166_p3, %s538_s14), 3 }
   0xc   : > { %v600_v1 = vld [vmem:[%s858_s2] sm:$0xff]  ;;  %v215_v2 = vperm.slane %v595_v0, 0  ;;  %v216_v4 = vperm.slane %v595_v0, 1  ;;  %v217_v6 = vperm.slane %v595_v0, 2  ;;  %v218_v8 = vperm.slane %v595_v0, 3  ;;  %v618_v11 = vld [vmem:[%s858_s2 + $0x8] sm:$0xff] }
   0xd   : > { %v283_v3 = vperm.slane %v600_v1, 0  ;;  %v284_v5 = vperm.slane %v600_v1, 1  ;;  %v285_v7 = vperm.slane %v600_v1, 2  ;;  %v286_v9 = vperm.slane %v600_v1, 3  ;;  %s546_s23 = sshll.u32 %s861_s14, 7 }
   0xe   : > { %v219_v12 = vperm.slane %v595_v0, 4  ;;  %v287_v13 = vperm.slane %v600_v1, 4  ;;  %v220_v14 = vperm.slane %v595_v0, 5  ;;  %v288_v15 = vperm.slane %v600_v1, 5  ;;  %s640_s26 = scalar_lea.vmem %s856_s0, %s546_s23  ;;  %s693_s29 = scalar_lea.vmem %s859_s3, %s546_s23 }
   0xf   : > { %v221_v16 = vperm.slane %v595_v0, 6  ;;  %v289_v17 = vperm.slane %v600_v1, 6  ;;  %v222_v18 = vperm.slane %v595_v0, 7  ;;  %v290_v19 = vperm.slane %v600_v1, 7  ;;  %v179_v28 = vld [vmem:[%s640_s26] sm:$0xff]  ;;  %v180_v29 = vld [vmem:[%s640_s26 + $0x8] sm:$0xff] }
  0x10   : > { %v223_v20 = vperm.slane %v613_v10, 0  ;;  %v291_v21 = vperm.slane %v618_v11, 0  ;;  %v224_v22 = vperm.slane %v613_v10, 1  ;;  %v292_v23 = vperm.slane %v618_v11, 1  ;;  %v181_v30 = vld [vmem:[%s640_s26 + $0x10] sm:$0xff]  ;;  %v182_v37 = vld [vmem:[%s640_s26 + $0x18] sm:$0xff] }
  0x11   : > { %v225_v24 = vperm.slane %v613_v10, 2  ;;  %v293_v25 = vperm.slane %v618_v11, 2  ;;  %v226_v26 = vperm.slane %v613_v10, 3  ;;  %v294_v27 = vperm.slane %v618_v11, 3  ;;  %v183_v38 = vld [vmem:[%s640_s26 + $0x20] sm:$0xff]  ;;  %v184_v39 = vld [vmem:[%s640_s26 + $0x28] sm:$0xff] }
  0x12   : > { %v227_v31 = vperm.slane %v613_v10, 4  ;;  %v295_v32 = vperm.slane %v618_v11, 4  ;;  %v228_v33 = vperm.slane %v613_v10, 5  ;;  %v247_v34 = vmul.f32 %v215_v2, %v179_v28  ;;  %v185_v44 = vld [vmem:[%s640_s26 + $0x30] sm:$0xff]  ;;  %v186_v45 = vld [vmem:[%s640_s26 + $0x38] sm:$0xff]  ;;  %v187_v55 = vld [vmem:[%s640_s26 + $0x40] sm:$0xff] }
  0x13   : > { %v248_v35 = vmul.f32 %v216_v4, %v180_v29  ;;  %v249_v36 = vmul.f32 %v217_v6, %v181_v30  ;;  %v296_v40 = vperm.slane %v618_v11, 5  ;;  %v250_v41 = vmul.f32 %v218_v8, %v182_v37  ;;  %v188_v63 = vld [vmem:[%s640_s26 + $0x48] sm:$0xff]  ;;  %v189_v28 = vld [vmem:[%s640_s26 + $0x50] sm:$0xff]  ;;  %v190_v29 = vld [vmem:[%s640_s26 + $0x58] sm:$0xff] }
  0x14   : > { %v251_v42 = vmul.f32 %v219_v12, %v183_v38  ;;  %v252_v43 = vmul.f32 %v220_v14, %v184_v39  ;;  %v229_v46 = vperm.slane %v613_v10, 6  ;;  %v315_v47 = vadd.f32 %v283_v3, %v247_v34  ;;  %v208_v1 = vld [vmem:[%s640_s26 + $0xe8] sm:$0xff] }
  0x15   : > { %v316_v48 = vadd.f32 %v284_v5, %v248_v35  ;;  %v317_v49 = vadd.f32 %v285_v7, %v249_v36  ;;  %v253_v50 = vmul.f32 %v221_v16, %v185_v44  ;;  %v318_v51 = vadd.f32 %v286_v9, %v250_v41 }
  0x16   : > { %v319_v52 = vadd.f32 %v287_v13, %v251_v42  ;;  %v320_v53 = vadd.f32 %v288_v15, %v252_v43  ;;  %v254_v54 = vmul.f32 %v222_v18, %v186_v45  ;;  %vm347_vm0 = vcmp.ge.f32.partialorder %v315_v47, 0.0  ;;  %v191_v45 = vld [vmem:[%s640_s26 + $0x60] sm:$0xff] }
  0x17   : > { %v379_v56 = vmul.f32 0.01, %v315_v47  ;;  %vm348_vm1 = vcmp.ge.f32.partialorder %v316_v48, 0.0  ;;  %v380_v57 = vmul.f32 0.01, %v316_v48  ;;  %vm349_vm2 = vcmp.ge.f32.partialorder %v317_v49, 0.0 }
  0x18   : > { %v381_v58 = vmul.f32 0.01, %v317_v49  ;;  %vm350_vm3 = vcmp.ge.f32.partialorder %v318_v51, 0.0  ;;  %v382_v59 = vmul.f32 0.01, %v318_v51  ;;  %vm351_vm4 = vcmp.ge.f32.partialorder %v319_v52, 0.0 }
  0x19   : > { %v411_v60 = vsel %vm347_vm0, %v315_v47, %v379_v56  ;;  %v412_v61 = vsel %vm348_vm1, %v316_v48, %v380_v57  ;;  %v383_v62 = vmul.f32 0.01, %v319_v52  ;;  %vm352_vm5 = vcmp.ge.f32.partialorder %v320_v53, 0.0  ;;  %v192_v56 = vld [vmem:[%s640_s26 + $0x68] sm:$0xff]  ;;  %v193_v57 = vld [vmem:[%s640_s26 + $0x70] sm:$0xff] }
  0x1a   : > { %443 = vst [vmem:[%s693_s29] sm:$0xff] %v411_v60  ;;  %v413_v30 = vsel %vm349_vm2, %v317_v49, %v381_v58  ;;  %v414_v34 = vsel %vm350_vm3, %v318_v51, %v382_v59  ;;  %v384_v35 = vmul.f32 0.01, %v320_v53  ;;  %v321_v37 = vadd.f32 %v289_v17, %v253_v50 }
  0x1b   : > { %444 = vst [vmem:[%s693_s29 + $0x8] sm:$0xff] %v412_v61  ;;  %v415_v36 = vsel %vm351_vm4, %v319_v52, %v383_v62  ;;  %v322_v38 = vadd.f32 %v290_v19, %v254_v54  ;;  %v255_v39 = vmul.f32 %v223_v20, %v187_v55  ;;  %v256_v42 = vmul.f32 %v224_v22, %v188_v63 }
  0x1c   : > { %445 = vst [vmem:[%s693_s29 + $0x10] sm:$0xff] %v413_v30  ;;  %v416_v41 = vsel %vm352_vm5, %v320_v53, %v384_v35  ;;  %v257_v43 = vmul.f32 %v225_v24, %v189_v28  ;;  %v258_v44 = vmul.f32 %v226_v26, %v190_v29  ;;  %vm353_vm6 = vcmp.ge.f32.partialorder %v321_v37, 0.0  ;;  %v195_v35 = vld [vmem:[%s640_s26 + $0x80] sm:$0xff] }
  0x1d   : > { %446 = vst [vmem:[%s693_s29 + $0x18] sm:$0xff] %v414_v34  ;;  %v385_v47 = vmul.f32 0.01, %v321_v37  ;;  %vm354_vm7 = vcmp.ge.f32.partialorder %v322_v38, 0.0  ;;  %v323_v48 = vadd.f32 %v291_v21, %v255_v39  ;;  %v386_v49 = vmul.f32 0.01, %v322_v38 }
  0x1e   : > { %447 = vst [vmem:[%s693_s29 + $0x20] sm:$0xff] %v415_v36  ;;  %v324_v50 = vadd.f32 %v292_v23, %v256_v42  ;;  %v325_v51 = vadd.f32 %v293_v25, %v257_v43  ;;  %v326_v52 = vadd.f32 %v294_v27, %v258_v44  ;;  %v259_v55 = vmul.f32 %v227_v31, %v191_v45  ;;  %v194_v34 = vld [vmem:[%s640_s26 + $0x78] sm:$0xff]  ;;  %v196_v36 = vld [vmem:[%s640_s26 + $0x88] sm:$0xff]  ;;  %v197_v42 = vld [vmem:[%s640_s26 + $0x90] sm:$0xff] }
  0x1f   : > { %448 = vst [vmem:[%s693_s29 + $0x28] sm:$0xff] %v416_v41  ;;  %v417_v53 = vsel %vm353_vm6, %v321_v37, %v385_v47  ;;  %vm355_vm8 = vcmp.ge.f32.partialorder %v323_v48, 0.0  ;;  %v387_v54 = vmul.f32 0.01, %v323_v48  ;;  %v418_v58 = vsel %vm354_vm7, %v322_v38, %v386_v49 }
  0x20   : > { %449 = vst [vmem:[%s693_s29 + $0x30] sm:$0xff] %v417_v53  ;;  %vm356_vm9 = vcmp.ge.f32.partialorder %v324_v50, 0.0  ;;  %v388_v59 = vmul.f32 0.01, %v324_v50  ;;  %vm357_vm10 = vcmp.ge.f32.partialorder %v325_v51, 0.0  ;;  %vm358_vm11 = vcmp.ge.f32.partialorder %v326_v52, 0.0 }
  0x21   : > { %450 = vst [vmem:[%s693_s29 + $0x38] sm:$0xff] %v418_v58  ;;  %v419_v60 = vsel %vm355_vm8, %v323_v48, %v387_v54  ;;  %v389_v61 = vmul.f32 0.01, %v325_v51  ;;  %v390_v62 = vmul.f32 0.01, %v326_v52  ;;  %v327_v28 = vadd.f32 %v295_v32, %v259_v55 }
  0x22   : > { %451 = vst [vmem:[%s693_s29 + $0x40] sm:$0xff] %v419_v60  ;;  %v420_v63 = vsel %vm356_vm9, %v324_v50, %v388_v59  ;;  %v260_v29 = vmul.f32 %v228_v33, %v192_v56  ;;  %v261_v30 = vmul.f32 %v229_v46, %v193_v57  ;;  %v297_v39 = vperm.slane %v618_v11, 6  ;;  %v199_v59 = vld [vmem:[%s640_s26 + $0xa0] sm:$0xff]  ;;  %v200_v60 = vld [vmem:[%s640_s26 + $0xa8] sm:$0xff] }
  0x23   : > { %452 = vst [vmem:[%s693_s29 + $0x48] sm:$0xff] %v420_v63  ;;  %v421_v37 = vsel %vm357_vm10, %v325_v51, %v389_v61  ;;  %v422_v38 = vsel %vm358_vm11, %v326_v52, %v390_v62  ;;  %v230_v41 = vperm.slane %v613_v10, 7  ;;  %vm359_vm12 = vcmp.ge.f32.partialorder %v327_v28, 0.0  ;;  %v198_v51 = vld [vmem:[%s640_s26 + $0x98] sm:$0xff]  ;;  %v201_v62 = vld [vmem:[%s640_s26 + $0xb0] sm:$0xff] }
  0x24   : > { %453 = vst [vmem:[%s693_s29 + $0x50] sm:$0xff] %v421_v37  ;;  %v391_v43 = vmul.f32 0.01, %v327_v28  ;;  %v328_v44 = vadd.f32 %v296_v40, %v260_v29  ;;  %v298_v45 = vperm.slane %v618_v11, 7  ;;  %v329_v47 = vadd.f32 %v297_v39, %v261_v30  ;;  %v202_v30 = vld [vmem:[%s640_s26 + $0xb8] sm:$0xff] }
  0x25   : > { %454 = vst [vmem:[%s693_s29 + $0x58] sm:$0xff] %v422_v38  ;;  %v262_v48 = vmul.f32 %v230_v41, %v194_v34  ;;  %v263_v49 = vmul.f32 %v215_v2, %v195_v35  ;;  %v264_v50 = vmul.f32 %v216_v4, %v196_v36  ;;  %v265_v54 = vmul.f32 %v217_v6, %v197_v42  ;;  %v203_v34 = vld [vmem:[%s640_s26 + $0xc0] sm:$0xff]  ;;  %v204_v35 = vld [vmem:[%s640_s26 + $0xc8] sm:$0xff] }
  0x26   : > { %v423_v52 = vsel %vm359_vm12, %v327_v28, %v391_v43  ;;  %vm360_vm13 = vcmp.ge.f32.partialorder %v328_v44, 0.0  ;;  %v392_v53 = vmul.f32 0.01, %v328_v44  ;;  %vm361_vm14 = vcmp.ge.f32.partialorder %v329_v47, 0.0 }
  0x27   : > { %455 = vst [vmem:[%s693_s29 + $0x60] sm:$0xff] %v423_v52  ;;  %v393_v55 = vmul.f32 0.01, %v329_v47  ;;  %v330_v2 = vadd.f32 %v298_v45, %v262_v48  ;;  %v331_v4 = vadd.f32 %v283_v3, %v263_v49  ;;  %v332_v57 = vadd.f32 %v284_v5, %v264_v50 }
  0x28   : > { %v424_v56 = vsel %vm360_vm13, %v328_v44, %v392_v53  ;;  %v333_v58 = vadd.f32 %v285_v7, %v265_v54  ;;  %v266_v6 = vmul.f32 %v218_v8, %v198_v51  ;;  %v267_v29 = vmul.f32 %v219_v12, %v199_v59  ;;  %v205_v44 = vld [vmem:[%s640_s26 + $0xd0] sm:$0xff]  ;;  %v206_v51 = vld [vmem:[%s640_s26 + $0xd8] sm:$0xff] }
  0x29   : > { %456 = vst [vmem:[%s693_s29 + $0x68] sm:$0xff] %v424_v56  ;;  %v425_v61 = vsel %vm361_vm14, %v329_v47, %v393_v55  ;;  %vm362_vm15 = vcmp.ge.f32.partialorder %v330_v2, 0.0  ;;  %v394_v3 = vmul.f32 0.01, %v330_v2  ;;  %vm363_vm0 = vcmp.ge.f32.partialorder %v331_v4, 0.0  ;;  %v209_v54 = vld [vmem:[%s640_s26 + $0xf0] sm:$0xff] }
  0x2a   : > { %457 = vst [vmem:[%s693_s29 + $0x70] sm:$0xff] %v425_v61  ;;  %v395_v5 = vmul.f32 0.01, %v331_v4  ;;  %vm364_vm1 = vcmp.ge.f32.partialorder %v332_v57, 0.0  ;;  %v396_v7 = vmul.f32 0.01, %v332_v57  ;;  %v334_v8 = vadd.f32 %v286_v9, %v266_v6 }
  0x2b   : > { %v426_v63 = vsel %vm362_vm15, %v330_v2, %v394_v3  ;;  %vm365_vm2 = vcmp.ge.f32.partialorder %v333_v58, 0.0  ;;  %v397_v28 = vmul.f32 0.01, %v333_v58  ;;  %v335_v42 = vadd.f32 %v287_v13, %v267_v29  ;;  %v210_v55 = vld [vmem:[%s640_s26 + $0xf8] sm:$0xff] }
  0x2c   : > { %458 = vst [vmem:[%s693_s29 + $0x78] sm:$0xff] %v426_v63  ;;  %v427_v36 = vsel %vm363_vm0, %v331_v4, %v395_v5  ;;  %v428_v37 = vsel %vm364_vm1, %v332_v57, %v396_v7  ;;  %vm366_vm3 = vcmp.ge.f32.partialorder %v334_v8, 0.0  ;;  %v398_v38 = vmul.f32 0.01, %v334_v8 }
  0x2d   : > { %459 = vst [vmem:[%s693_s29 + $0x80] sm:$0xff] %v427_v36  ;;  %v429_v9 = vsel %vm365_vm2, %v333_v58, %v397_v28  ;;  %v268_v43 = vmul.f32 %v220_v14, %v200_v60  ;;  %v269_v12 = vmul.f32 %v221_v16, %v201_v62  ;;  %v270_v48 = vmul.f32 %v222_v18, %v202_v30 }
  0x2e   : > { %460 = vst [vmem:[%s693_s29 + $0x88] sm:$0xff] %v428_v37  ;;  %v430_v47 = vsel %vm366_vm3, %v334_v8, %v398_v38  ;;  %v271_v49 = vmul.f32 %v223_v20, %v203_v34  ;;  %v272_v50 = vmul.f32 %v224_v22, %v204_v35  ;;  %vm367_vm4 = vcmp.ge.f32.partialorder %v335_v42, 0.0 }
  0x2f   : > { %461 = vst [vmem:[%s693_s29 + $0x90] sm:$0xff] %v429_v9  ;;  %v399_v13 = vmul.f32 0.01, %v335_v42  ;;  %v336_v14 = vadd.f32 %v288_v15, %v268_v43  ;;  %v337_v16 = vadd.f32 %v289_v17, %v269_v12  ;;  %v338_v0 = vadd.f32 %v290_v19, %v270_v48  ;;  %v207_v17 = vld [vmem:[%s640_s26 + $0xe0] sm:$0xff] }
  0x30   : > { %462 = vst [vmem:[%s693_s29 + $0x98] sm:$0xff] %v430_v47  ;;  %v339_v18 = vadd.f32 %v291_v21, %v271_v49  ;;  %v340_v20 = vadd.f32 %v292_v23, %v272_v50  ;;  %v273_v22 = vmul.f32 %v225_v24, %v205_v44  ;;  %v275_v6 = vmul.f32 %v227_v31, %v207_v17 }
  0x31   : > { %v431_v52 = vsel %vm367_vm4, %v335_v42, %v399_v13  ;;  %vm368_vm5 = vcmp.ge.f32.partialorder %v336_v14, 0.0  ;;  %v400_v15 = vmul.f32 0.01, %v336_v14  ;;  %vm369_vm6 = vcmp.ge.f32.partialorder %v337_v16, 0.0 }
  0x32   : > { %463 = vst [vmem:[%s693_s29 + $0xa0] sm:$0xff] %v431_v52  ;;  %v401_v19 = vmul.f32 0.01, %v337_v16  ;;  %vm370_vm7 = vcmp.ge.f32.partialorder %v338_v0, 0.0  ;;  %v402_v21 = vmul.f32 0.01, %v338_v0  ;;  %v341_v23 = vadd.f32 %v293_v25, %v273_v22 }
  0x33   : > { %v432_v53 = vsel %vm368_vm5, %v336_v14, %v400_v15  ;;  %vm371_vm8 = vcmp.ge.f32.partialorder %v339_v18, 0.0  ;;  %v403_v24 = vmul.f32 0.01, %v339_v18  ;;  %vm372_vm9 = vcmp.ge.f32.partialorder %v340_v20, 0.0 }
  0x34   : > { %464 = vst [vmem:[%s693_s29 + $0xa8] sm:$0xff] %v432_v53  ;;  %v433_v2 = vsel %vm369_vm6, %v337_v16, %v401_v19  ;;  %v434_v4 = vsel %vm370_vm7, %v338_v0, %v402_v21  ;;  %v404_v56 = vmul.f32 0.01, %v340_v20  ;;  %vm373_vm10 = vcmp.ge.f32.partialorder %v341_v23, 0.0 }
  0x35   : > { %465 = vst [vmem:[%s693_s29 + $0xb0] sm:$0xff] %v433_v2  ;;  %v435_v57 = vsel %vm371_vm8, %v339_v18, %v403_v24  ;;  %v405_v58 = vmul.f32 0.01, %v341_v23  ;;  %v274_v25 = vmul.f32 %v226_v26, %v206_v51  ;;  %v276_v60 = vmul.f32 %v228_v33, %v208_v1 }
  0x36   : > { %466 = vst [vmem:[%s693_s29 + $0xb8] sm:$0xff] %v434_v4  ;;  %v436_v59 = vsel %vm372_vm9, %v340_v20, %v404_v56  ;;  %v277_v61 = vmul.f32 %v229_v46, %v209_v54  ;;  %v278_v3 = vmul.f32 %v230_v41, %v210_v55  ;;  %v343_v26 = vadd.f32 %v295_v32, %v275_v6 }
  0x37   : > { %467 = vst [vmem:[%s693_s29 + $0xc0] sm:$0xff] %v435_v57  ;;  %v437_v62 = vsel %vm373_vm10, %v341_v23, %v405_v58  ;;  %v342_v5 = vadd.f32 %v294_v27, %v274_v25  ;;  %v344_v31 = vadd.f32 %v296_v40, %v276_v60 }
  0x38   : > { %468 = vst [vmem:[%s693_s29 + $0xc8] sm:$0xff] %v436_v59  ;;  %v345_v33 = vadd.f32 %v297_v39, %v277_v61  ;;  %v346_v10 = vadd.f32 %v298_v45, %v278_v3  ;;  %vm375_vm12 = vcmp.ge.f32.partialorder %v343_v26, 0.0  ;;  %v407_v27 = vmul.f32 0.01, %v343_v26 }
  0x39   : > { %469 = vst [vmem:[%s693_s29 + $0xd0] sm:$0xff] %v437_v62  ;;  %vm374_vm11 = vcmp.ge.f32.partialorder %v342_v5, 0.0  ;;  %v406_v46 = vmul.f32 0.01, %v342_v5  ;;  %vm376_vm13 = vcmp.ge.f32.partialorder %v344_v31, 0.0 }
  0x3a   : > { %v408_v32 = vmul.f32 0.01, %v344_v31  ;;  %vm377_vm14 = vcmp.ge.f32.partialorder %v345_v33, 0.0  ;;  %v409_v40 = vmul.f32 0.01, %v345_v33  ;;  %vm378_vm15 = vcmp.ge.f32.partialorder %v346_v10, 0.0 }
  0x3b   : > { %v438_v41 = vsel %vm374_vm11, %v342_v5, %v406_v46  ;;  %v410_v7 = vmul.f32 0.01, %v346_v10  ;;  %v439_v39 = vsel %vm375_vm12, %v343_v26, %v407_v27 }
  0x3c   : > { %470 = vst [vmem:[%s693_s29 + $0xd8] sm:$0xff] %v438_v41  ;;  %v440_v11 = vsel %vm376_vm13, %v344_v31, %v408_v32  ;;  %v441_v45 = vsel %vm377_vm14, %v345_v33, %v409_v40 }
  0x3d   : > { %471 = vst [vmem:[%s693_s29 + $0xe0] sm:$0xff] %v439_v39  ;;  %v442_v8 = vsel %vm378_vm15, %v346_v10, %v410_v7 }
  0x3e   : > { %472 = vst [vmem:[%s693_s29 + $0xe8] sm:$0xff] %v440_v11 }
  0x3f   : > { %473 = vst [vmem:[%s693_s29 + $0xf0] sm:$0xff] %v441_v45 }
  0x40   : > { %474 = vst [vmem:[%s693_s29 + $0xf8] sm:$0xff] %v442_v8 }
  0x41 PF: > { %s13_s12 = sadd.s32 1, %s562_s12  }
  0x42   : > { %p10_p4 = scmp.ge.s32.totalorder %s13_s12, 4  }
  0x44   :  { %12 = sbr.rel (!%p10_p4) target bundleno = 1 (0x1), region = 62 }

// kernel: residual_inner_forward.4
= control target key start
LH: loop header
LB: loop body
LE: loop exit
PB: predicated region body
PF: predicated region fallthrough
CT: control target
= control target key end

     0   :  { %s5574_s18 = smov 0   ;;  %s5576_s19 = smov 0   ;;  %s7104_s0 = inlined_call_operand.vmem [shape: bf16[2,16,16,128], index: 0, kind: input, shape index: {}, may-alias: {0,1,2}]   ;;  %s7105_s1 = inlined_call_operand.vmem [shape: bf16[2,16,16,128], index: 1, kind: input, shape index: {}, may-alias: {0,1,2}]   ;;  %s7106_s2 = inlined_call_operand.vmem [shape: bf16[2,16,16,128], index: 2, kind: input, shape index: {}, may-alias: {0,1,2}]   ;;  %s7107_s3 = inlined_call_operand.vmem [shape: bf16[9,144,128], index: 3, kind: input, shape index: {}]   ;;  %s7108_s4 = inlined_call_operand.vmem [shape: f32[2,16,16,128], index: 4, kind: output, shape index: {0}]   ;;  %s7109_s5 = inlined_call_operand.vmem [shape: f32[2,2,2,128], index: 5, kind: output, shape index: {1}]  }
   0x1   :  { %s5578_s20 = smov 0   ;;  %s5580_s21 = smov 0  }
   0x2   :  { %s5582_s22 = smov 0  }
   0x3 LB: > { %s25_s23 = sadd.s32 1, %s5530_s20  ;;  %s28_s24 = sadd.s32 1, %s5534_s21  ;;  %s5538_s22 = sphi %s5582_s22, %s16_s22   ;;  %s5534_s21 = sphi %s5580_s21, %s7176_s21   ;;  %s5530_s20 = sphi %s5578_s20, %s7175_s20   ;;  %s5526_s19 = sphi %s5576_s19, %s7174_s19   ;;  %s5522_s18 = sphi %s5574_s18, %s7173_s18  }
   0x4   : > { %p26_p0 = scmp.ge.s32.totalorder %s25_s23, 2  ;;  %p4527_p1 = scmp.ge.s32.totalorder %s5538_s22, 1 }
   0x5   : > { %p278_p2 = scmp.lt.s32.totalorder %s5538_s22, 5 }
   0x6   : > { %s7178_s23 = smov (%p26_p0, %s25_s23), 0  ;;  %s7180_s24 = smov (!%p26_p0, %s28_s24), %s5534_s21 }
   0x7   : > { %p279_p3 = pnand %p4527_p1, %p278_p2  ;;  %p30_p4 = scmp.ge.s32.totalorder %s7180_s24, 2 }
   0x9   : > { %s7182_s24 = smov (%p30_p4, %s7180_s24), 0  ;;  %282 = sbr.rel (%p279_p3) target bundleno = 1233 (0x4d1), region = 36 }
   0xe   : > { %s4528_s25 = sshll.u32 %s5522_s18, 3  ;;  %p351_p5 = scmp.lt.s32.totalorder %s5526_s19, 1  ;;  %vm467_vm0 = vsmask.f32 256  ;;  %vm468_vm1 = vsmask.f32 4368 }
   0xf   : > { %p353_p6 = scmp.lt.s32.totalorder %s4528_s25, 15  ;;  %s4533_s26 = sadd.s32 4294967295, %s4528_s25  ;;  %vm5667_vm2 = vmor %vm467_vm0, %vm468_vm1  ;;  %vm420_vm3 = vcmask 1040384   ;;  %vm421_vm4 = vcmask 126980   ;;  %vm415_vm6 = vcmask 1043456   ;;  %vm416_vm7 = vcmask 130052  }
  0x10   : > { %s7184_s19 = smov (!%p351_p5, %s5526_s19), 1  ;;  %p363_p7 = scmp.gt.s32.totalorder %s4533_s26, 0  ;;  %vm5710_vm5 = vmor %vm421_vm4, %vm420_vm3  ;;  %vm742_vm9 = vcmask 1040448   ;;  %vm744_vm10 = vcmask 61444   ;;  %vm745_vm11 = vsmask.f32 4352 }
  0x11   : > { %s354_s27 = scalar_select %p353_p6, %s4528_s25, 15  ;;  %vm5774_vm8 = vmor %vm416_vm7, %vm415_vm6  ;;  %vm678_vm14 = vcmask 64512   ;;  %vm729_vm1 = vsmask.f32 7938  ;;  %vm731_vm3 = vcmask 64516  }
  0x12   : > { %s5610_s28 = sshll.u32 %s7184_s19, 5  ;;  %p4534_p8 = scmp.lt.s32.totalorder %s4533_s26, 15  ;;  %vm743_vm12 = vmand %vm742_vm9, %vm467_vm0  ;;  %vm728_vm0 = vcmask 1043520   ;;  %vm732_vm4 = vsmask.f32 7954 }
  0x13   : > { %s4529_s29 = sshll.u32 %s354_s27, 1  ;;  %s5322_s6 = sadd.s32 8, %s4528_s25  ;;  %vm746_vm13 = vmand %vm744_vm10, %vm745_vm11 }
  0x14   : > { %s357_s30 = sadd.s32 %s5610_s28, %s4529_s29  ;;  %p5613_p9 = scmp.lt.s32.totalorder %s5322_s6, 15  ;;  %vm5824_vm15 = vmor %vm746_vm13, %vm743_vm12 }
  0x15   : > { %s4531_s7 = sshll.u32 %s357_s30, 2  ;;  %s4552_s12 = sshll.u32 %s357_s30, 3  ;;  %vm730_vm6 = vmand %vm728_vm0, %vm729_vm1 }
  0x16   : > { %s5620_s11 = scalar_lea.vmem %s7104_s0, %s4531_s7  ;;  %s7186_s26 = smov (!%p363_p7, %s4533_s26), 0  ;;  %vm733_vm7 = vmand %vm731_vm3, %vm732_vm4 }
  0x17   : > { %v452_v0 = vld [vmem:[%s5620_s11 + $0x4] sm:$0xf]  ;;  %v451_v1 = vld [vmem:[%s5620_s11] sm:$0xf]  ;;  %s7188_s6 = smov (!%p5613_p9, %s5322_s6), 15  ;;  %s7190_s26 = smov (!%p4534_p8, %s7186_s26), 15 }
  0x18   : > { %v479_v2 = vshrl.u32 %v452_v0, 16  ;;  %v471_v3 = vshrl.u32 %v451_v1, 16  ;;  %v474_v4 = vshll.u32 %v451_v1, 16  ;;  %v453_v5 = vld [vmem:[%s5620_s11 + $0x8] sm:$0xf]  ;;  %s7192_s6 = smov (!%p5613_p9, %s7188_s6), 15  ;;  %s5633_s16 = scalar_lea.vmem %s7108_s4, %s4552_s12 }
  0x19   : > { %v455_v8 = vld [vmem:[%s5620_s11 + $0x10] sm:$0xf]  ;;  %s4539_s13 = sshll.u32 %s7190_s26, 1  ;;  %s4546_s25 = sshll.u32 %s7192_s6, 1  ;;  %v454_v9 = vld [vmem:[%s5620_s11 + $0xc] sm:$0xf] }
  0x1a   : > { %v481_v6 = vrot.slane %v479_v2, 7  ;;  %v473_v7 = vrot.slane %v471_v3, 7  ;;  %s371_s17 = sadd.s32 %s4539_s13, %s5610_s28  ;;  %s388_s29 = sadd.s32 %s4546_s25, %s5610_s28  ;;  %v488_v12 = vshrl.u32 %v453_v5, 16  ;;  %v505_v13 = vshrl.u32 %v455_v8, 16  ;;  %v456_v15 = vld [vmem:[%s5620_s11 + $0x14] sm:$0xf] }
  0x1b   : > { %s4541_s27 = sshll.u32 %s371_s17, 2  ;;  %s4548_s8 = sshll.u32 %s388_s29, 2  ;;  %v496_v14 = vshrl.u32 %v454_v9, 16  ;;  %v491_v18 = vshll.u32 %v453_v5, 16  ;;  %v508_v20 = vshll.u32 %v455_v8, 16  ;;  %v513_v21 = vshrl.u32 %v456_v15, 16 }
  0x1c   : > { %v486_v10 = vrot.slane %v481_v6, 4  ;;  %v476_v11 = vor.u32 %v474_v4, %v473_v7  ;;  %s5641_s26 = scalar_lea.vmem %s7105_s1, %s4541_s27  ;;  %s5646_s12 = scalar_lea.vmem %s7106_s2, %s4548_s8  ;;  %v490_v17 = vrot.slane %v488_v12, 7  ;;  %v507_v19 = vrot.slane %v505_v13, 7  ;;  %v5663_v34 = vld [vmem:[%s5620_s11 + $0x1c] sm:$0xf] }
  0x1d   : > { %p408_p10 = scmp.lt.s32.totalorder %s5522_s18, 1  ;;  %s4553_s6 = sshll.u32 %s7184_s19, 1  ;;  %v498_v16 = vrot.slane %v496_v14, 7  ;;  %v482_v25 = vshll.u32 %v452_v0, 16  ;;  %v515_v26 = vrot.slane %v513_v21, 7  ;;  %v516_v27 = vshll.u32 %v456_v15, 16 }
  0x1e   : > { %s5540_s13 = smov 8   ;;  %v493_v23 = vor.u32 %v491_v18, %v490_v17  ;;  %v510_v24 = vor.u32 %v508_v20, %v507_v19  ;;  %v499_v29 = vshll.u32 %v454_v9, 16  ;;  %v477_v31 = vrot.slane %v473_v7, 4  ;;  %v457_v35 = vld [vmem:[%s5620_s11 + $0x18] sm:$0xf]  ;;  %p4555_p11 = scmp.le.s32.totalorder %s5522_s18, 0 }
  0x1f   : > { %s409_s28 = scalar_select %p408_p10, %s5522_s18, 1  ;;  %610 = vrot.lane.b32.xlu1 %v486_v10, %s5540_s13  ;;  %606 = vrot.lane.b32.xlu0 %v476_v11, %s5540_s13  ;;  %v503_v22 = vrot.slane %v498_v16, 4  ;;  %v520_v28 = vrot.slane %v515_v26, 4  ;;  %v484_v30 = vor.u32 %v482_v25, %v481_v6  ;;  %v511_v32 = vrot.slane %v507_v19, 4  ;;  %v459_v41 = vld [vmem:[%s5620_s11 + $0x20] sm:$0xf] }
  0x20   : > { %v518_v33 = vor.u32 %v516_v27, %v515_v26  ;;  %v501_v37 = vor.u32 %v499_v29, %v498_v16  ;;  %v530_v38 = vshrl.u32 %v5663_v34, 16  ;;  %v522_v39 = vshrl.u32 %v457_v35, 16  ;;  %v461_v49 = vld [vmem:[%s5620_s11 + $0x28] sm:$0xf]  ;;  %v5688_v50 = vld [vmem:[%s5620_s11 + $0x24] sm:$0xf] }
  0x21   : > { %s411_s14 = sadd.s32 %s4553_s6, %s409_s28  ;;  %616 = vrot.lane.b32.xlu2 %v503_v22, %s5540_s13  ;;  %v494_v40 = vrot.slane %v490_v17, 4  ;;  %v485_v43 = vsel %vm5667_vm2, %v477_v31, %v484_v30  ;;  %v539_v44 = vshrl.u32 %v459_v41, 16  ;;  %v525_v47 = vshll.u32 %v457_v35, 16  ;;  %v5697_v57 = vld [vmem:[%s5620_s11 + $0x2c] sm:$0xf] }
  0x22   : > { %s4554_s15 = sshll.u32 %s411_s14, 1  ;;  %v519_v42 = vsel %vm5667_vm2, %v511_v32, %v518_v33  ;;  %v5680_v45 = vrot.slane %v530_v38, 7  ;;  %v5682_v46 = vrot.slane %v522_v39, 7  ;;  %v542_v52 = vshll.u32 %v459_v41, 16  ;;  %v464_v63 = vld [vmem:[%s5620_s11 + $0x34] sm:$0xf] }
  0x23   : > { %s5658_s19 = scalar_lea.vmem %s7109_s5, %s4554_s15  ;;  %v502_v48 = vsel %vm5667_vm2, %v494_v40, %v501_v37  ;;  %v5691_v51 = vrot.slane %v539_v44, 7  ;;  %v556_v55 = vshrl.u32 %v461_v49, 16  ;;  %v547_v56 = vshrl.u32 %v5688_v50, 16  ;;  %v463_v0 = vld [vmem:[%s5620_s11 + $0x30] sm:$0xf] }
  0x24   : > { %v537_v53 = vrot.slane %v5680_v45, 4  ;;  %v527_v54 = vor.u32 %v525_v47, %v5682_v46  ;;  %v564_v59 = vshrl.u32 %v5697_v57, 16  ;;  %v559_v61 = vshll.u32 %v461_v49, 16  ;;  %v465_v6 = vld [vmem:[%s5620_s11 + $0x38] sm:$0xf] }
  0x25   : > { %v544_v58 = vor.u32 %v542_v52, %v5691_v51  ;;  %v5703_v60 = vrot.slane %v556_v55, 7  ;;  %v549_v62 = vrot.slane %v547_v56, 7  ;;  %v581_v4 = vshrl.u32 %v464_v63, 16  ;;  %v466_v14 = vld [vmem:[%s5620_s11 + $0x3c] sm:$0xf]  ;;  %s5542_s11 = smov (!%p4555_p11), 8  }
  0x26   : > { %v566_v1 = vrot.slane %v564_v59, 7  ;;  %v573_v5 = vshrl.u32 %v463_v0, 16  ;;  %v5541_v8 = vmov 0   ;;  %v590_v10 = vshrl.u32 %v465_v6, 16 }
  0x27   : > { %612 = vrot.lane.b32.xlu1 %v493_v23, %s5540_s13  ;;  %618 = vrot.lane.b32.xlu0 %v510_v24, %s5540_s13  ;;  %v561_v2 = vor.u32 %v559_v61, %v5703_v60  ;;  %v554_v3 = vrot.slane %v549_v62, 4  ;;  %423 = vst.msk [vmem:[#allocation2 + $0x10] sm:$0x11] %vm5710_vm5, %v5541_v8  ;;  %v583_v11 = vrot.slane %v581_v4, 7  ;;  %v576_v13 = vshll.u32 %v463_v0, 16 }
  0x28   : > { %429 = vst.msk [vmem:[#allocation2 + $0x40] sm:$0x11] %vm5710_vm5, %v5541_v8  ;;  %v571_v9 = vrot.slane %v566_v1, 4  ;;  %v575_v12 = vrot.slane %v573_v5, 7  ;;  %v592_v15 = vrot.slane %v590_v10, 7  ;;  %v593_v16 = vshll.u32 %v465_v6, 16 }
  0x29   : > { %622 = vrot.lane.b32.xlu2 %v520_v28, %s5540_s13  ;;  %450 = vst.msk [vmem:[#allocation2 + $0xe8] sm:$0x11] %vm5710_vm5, %v5541_v8  ;;  %v588_v17 = vrot.slane %v583_v11, 4  ;;  %v598_v19 = vshrl.u32 %v466_v14, 16  ;;  %v533_v20 = vshll.u32 %v5663_v34, 16  ;;  %v550_v23 = vshll.u32 %v5688_v50, 16 }
  0x2a   : > { %426 = vst.msk [vmem:[#allocation2 + $0x28] sm:$0x11] %vm5710_vm5, %v5541_v8  ;;  %v578_v18 = vor.u32 %v576_v13, %v575_v12  ;;  %v595_v21 = vor.u32 %v593_v16, %v592_v15  ;;  %v528_v24 = vrot.slane %v5682_v46, 4  ;;  %v545_v27 = vrot.slane %v5691_v51, 4 }
  0x2b   : > { %432 = vst.msk [vmem:[#allocation2 + $0x58] sm:$0x11] %vm5710_vm5, %v5541_v8  ;;  %v600_v22 = vrot.slane %v598_v19, 7  ;;  %v535_v25 = vor.u32 %v533_v20, %v5680_v45  ;;  %v552_v28 = vor.u32 %v550_v23, %v549_v62  ;;  %v584_v30 = vshll.u32 %v464_v63, 16 }
  0x2c   : > { %435 = vst.msk [vmem:[#allocation2 + $0x70] sm:$0x11] %vm5710_vm5, %v5541_v8  ;;  %v567_v31 = vshll.u32 %v5697_v57, 16  ;;  %v601_v33 = vshll.u32 %v466_v14, 16  ;;  %v579_v34 = vrot.slane %v575_v12, 4  ;;  %v562_v37 = vrot.slane %v5703_v60, 4 }
  0x2d   : > { %438 = vst.msk [vmem:[#allocation2 + $0x88] sm:$0x11] %vm5710_vm5, %v5541_v8  ;;  %v605_v26 = vrot.slane %v600_v22, 4  ;;  %v536_v29 = vsel %vm5667_vm2, %v528_v24, %v535_v25  ;;  %v553_v32 = vsel %vm5667_vm2, %v545_v27, %v552_v28  ;;  %v586_v35 = vor.u32 %v584_v30, %v583_v11 }
  0x2e   : > { %441 = vst.msk [vmem:[#allocation2 + $0xa0] sm:$0x11] %vm5710_vm5, %v5541_v8  ;;  %v569_v38 = vor.u32 %v567_v31, %v566_v1  ;;  %v596_v39 = vrot.slane %v592_v15, 4  ;;  %v603_v40 = vor.u32 %v601_v33, %v600_v22 }
  0x2f   : > { %620 = vrot.lane.b32.xlu1 %v519_v42, %s5540_s13  ;;  %608 = vrot.lane.b32.xlu0 %v485_v43, %s5540_s13  ;;  %444 = vst.msk [vmem:[#allocation2 + $0xb8] sm:$0x11] %vm5710_vm5, %v5541_v8  ;;  %v587_v41 = vsel %vm5667_vm2, %v579_v34, %v586_v35  ;;  %v755_v47 = vld [vmem:[#allocation2 + $0x40] sm:$0x11] }
  0x30   : > { %447 = vst.msk [vmem:[#allocation2 + $0xd0] sm:$0x11] %vm5710_vm5, %v5541_v8  ;;  %v570_v42 = vsel %vm5667_vm2, %v562_v37, %v569_v38  ;;  %v604_v43 = vsel %vm5667_vm2, %v596_v39, %v603_v40  ;;  %vm5849_vm5 = vmor %vm731_vm3, %vm728_vm0 }
  0x31   : > { %614 = vrot.lane.b32.xlu2 %v502_v48, %s5540_s13  ;;  %418 = vst.msk [vmem:[#allocation2] sm:$0xff] %vm5774_vm8, %v5541_v8  ;;  %v748_v62 = vld [vmem:[#allocation2 + $0x28] sm:$0x11] }
  0x32   : > { %419 = vst.msk [vmem:[#allocation2 + $0x8] sm:$0xff] %vm5774_vm8, %v5541_v8  ;;  %v762_v52 = vld [vmem:[#allocation2 + $0x58] sm:$0x11] }
  0x33   : > { %424 = vst.msk [vmem:[#allocation2 + $0x18] sm:$0xff] %vm5774_vm8, %v5541_v8 }
  0x34   : > { %448 = vst.msk [vmem:[#allocation2 + $0xd8] sm:$0xff] %vm5774_vm8, %v5541_v8 }
  0x35   : > { %449 = vst.msk [vmem:[#allocation2 + $0xe0] sm:$0xff] %vm5774_vm8, %v5541_v8  ;;  %v783_v23 = vld [vmem:[#allocation2 + $0xa0] sm:$0x11] }
  0x36   : > { %425 = vst.msk [vmem:[#allocation2 + $0x20] sm:$0xff] %vm5774_vm8, %v5541_v8 }
  0x37   : > { %628 = vrot.lane.b32.xlu1 %v537_v53, %s5540_s13  ;;  %624 = vrot.lane.b32.xlu0 %v527_v54, %s5540_s13  ;;  %427 = vst.msk [vmem:[#allocation2 + $0x30] sm:$0xff] %vm5774_vm8, %v5541_v8 }
  0x38   : > { %428 = vst.msk [vmem:[#allocation2 + $0x38] sm:$0xff] %vm5774_vm8, %v5541_v8 }
  0x39   : > { %630 = vrot.lane.b32.xlu2 %v544_v58, %s5540_s13  ;;  %430 = vst.msk [vmem:[#allocation2 + $0x48] sm:$0xff] %vm5774_vm8, %v5541_v8 }
  0x3a   : > { %431 = vst.msk [vmem:[#allocation2 + $0x50] sm:$0xff] %vm5774_vm8, %v5541_v8  ;;  %v735_v1 = vld [vmem:[#allocation2 + $0x18] sm:$0xff] }
  0x3b   : > { %433 = vst.msk [vmem:[#allocation2 + $0x60] sm:$0xff] %vm5774_vm8, %v5541_v8 }
  0x3c   : > { %434 = vst.msk [vmem:[#allocation2 + $0x68] sm:$0xff] %vm5774_vm8, %v5541_v8 }
  0x3d   : > { %436 = vst.msk [vmem:[#allocation2 + $0x78] sm:$0xff] %vm5774_vm8, %v5541_v8 }
  0x3e   : > { %437 = vst.msk [vmem:[#allocation2 + $0x80] sm:$0xff] %vm5774_vm8, %v5541_v8  ;;  %v751_v14 = vld [vmem:[#allocation2 + $0x30] sm:$0xff] }
  0x3f   : > { %636 = vrot.lane.b32.xlu1 %v561_v2, %s5540_s13  ;;  %634 = vrot.lane.b32.xlu0 %v554_v3, %s5540_s13  ;;  %439 = vst.msk [vmem:[#allocation2 + $0x90] sm:$0xff] %vm5774_vm8, %v5541_v8 }
  0x40   : > { %440 = vst.msk [vmem:[#allocation2 + $0x98] sm:$0xff] %vm5774_vm8, %v5541_v8  ;;  %v758_v16 = vld [vmem:[#allocation2 + $0x48] sm:$0xff] }
  0x41   : > { %640 = vrot.lane.b32.xlu2 %v571_v9, %s5540_s13  ;;  %442 = vst.msk [vmem:[#allocation2 + $0xa8] sm:$0xff] %vm5774_vm8, %v5541_v8 }
  0x42   : > { %443 = vst.msk [vmem:[#allocation2 + $0xb0] sm:$0xff] %vm5774_vm8, %v5541_v8 }
  0x43   : > { %445 = vst.msk [vmem:[#allocation2 + $0xc0] sm:$0xff] %vm5774_vm8, %v5541_v8 }
  0x44   : > { %446 = vst.msk [vmem:[#allocation2 + $0xc8] sm:$0xff] %vm5774_vm8, %v5541_v8  ;;  %vm5856_vm8 = vmor %vm733_vm7, %vm730_vm6  ;;  %v772_v8 = vld [vmem:[#allocation2 + $0x78] sm:$0xff] }
  0x47   : > { %646 = vrot.lane.b32.xlu1 %v588_v17, %s5540_s13  ;;  %642 = vrot.lane.b32.xlu0 %v578_v18, %s5540_s13 }
  0x49   : > { %648 = vrot.lane.b32.xlu2 %v595_v21, %s5540_s13 }
  0x4a   : > { %v793_v34 = vld [vmem:[#allocation2 + $0xc0] sm:$0xff] }
  0x4f   : > { %626 = vrot.lane.b32.xlu1 %v536_v29, %s5540_s13  ;;  %652 = vrot.lane.b32.xlu0 %v605_v26, %s5540_s13 }
  0x51   : > { %632 = vrot.lane.b32.xlu2 %v553_v32, %s5540_s13 }
  0x57   : > { %644 = vrot.lane.b32.xlu1 %v587_v41, %s5540_s13  ;;  %638 = vrot.lane.b32.xlu0 %v570_v42, %s5540_s13  ;;  %v769_v41 = vld [vmem:[#allocation2 + $0x70] sm:$0x11] }
  0x59   : > { %650 = vrot.lane.b32.xlu2 %v604_v43, %s5540_s13  ;;  %v765_v43 = vld [vmem:[#allocation2 + $0x60] sm:$0xff] }
  0x7b   : > { %v617_v45 = vpop.permute.xlu2 %616 }
  0x7c   : > { %v659_v48 = vrot.slane %v617_v45, 4 }
  0x7e   : > { %v684_v49 = vsel %vm678_vm14, %v659_v48, %v617_v45 }
  0x7f   : > { %v756_v50 = vsel %vm5824_vm15, %v684_v49, %v755_v47 }
  0x80   : > { %757 = vst [vmem:[#allocation2 + $0x40] sm:$0x11] %v756_v50 }
  0x83   : > { %v623_v51 = vpop.permute.xlu2 %622 }
  0x84   : > { %v662_v53 = vrot.slane %v623_v51, 4 }
  0x86   : > { %v687_v54 = vsel %vm678_vm14, %v662_v53, %v623_v51 }
  0x87   : > { %v763_v55 = vsel %vm5824_vm15, %v687_v54, %v762_v52 }
  0x88   : > { %764 = vst [vmem:[#allocation2 + $0x58] sm:$0x11] %v763_v55  ;;  %v779_v55 = vld [vmem:[#allocation2 + $0x90] sm:$0xff] }
  0x8b   : > { %v615_v56 = vpop.permute.xlu2 %614 }
  0x8c   : > { %v658_v58 = vrot.slane %v615_v56, 4 }
  0x8e   : > { %v683_v59 = vsel %vm678_vm14, %v658_v58, %v615_v56  ;;  %v776_v58 = vld [vmem:[#allocation2 + $0x88] sm:$0x11] }
  0x8f   : > { %754 = vst.msk [vmem:[#allocation2 + $0x38] sm:$0xff] %vm5849_vm5, %v683_v59 }
  0x91   : > { %v611_v60 = vpop.permute.xlu1 %610  ;;  %v607_v61 = vpop.permute.xlu0 %606 }
  0x92   : > { %v656_v63 = vrot.slane %v611_v60, 4  ;;  %v654_v2 = vrot.slane %v607_v61, 4 }
  0x93   : > { %v631_v5 = vpop.permute.xlu2 %630 }
  0x94   : > { %v681_v3 = vsel %vm678_vm14, %v656_v63, %v611_v60  ;;  %v679_v4 = vsel %vm678_vm14, %v654_v2, %v607_v61  ;;  %v666_v9 = vrot.slane %v631_v5, 4 }
  0x95   : > { %v749_v6 = vsel %vm5824_vm15, %v681_v3, %v748_v62  ;;  %v736_v7 = vsel %vm5856_vm8, %v679_v4, %v735_v1 }
  0x96   : > { %750 = vst [vmem:[#allocation2 + $0x28] sm:$0x11] %v749_v6  ;;  %v691_v10 = vsel %vm678_vm14, %v666_v9, %v631_v5  ;;  %v790_v6 = vld [vmem:[#allocation2 + $0xb8] sm:$0x11] }
  0x97   : > { %737 = vst [vmem:[#allocation2 + $0x18] sm:$0xff] %v736_v7  ;;  %v773_v11 = vsel %vm5856_vm8, %v691_v10, %v772_v8  ;;  %v786_v8 = vld [vmem:[#allocation2 + $0xa8] sm:$0xff] }
  0x98   : > { %774 = vst [vmem:[#allocation2 + $0x78] sm:$0xff] %v773_v11 }
  0x99   : > { %v613_v12 = vpop.permute.xlu1 %612  ;;  %v619_v13 = vpop.permute.xlu0 %618 }
  0x9a   : > { %v657_v15 = vrot.slane %v613_v12, 4  ;;  %v660_v17 = vrot.slane %v619_v13, 4 }
  0x9b   : > { %v641_v20 = vpop.permute.xlu2 %640 }
  0x9c   : > { %v682_v18 = vsel %vm678_vm14, %v657_v15, %v613_v12  ;;  %v685_v19 = vsel %vm678_vm14, %v660_v17, %v619_v13  ;;  %v671_v24 = vrot.slane %v641_v20, 4  ;;  %v797_v17 = vld [vmem:[#allocation2 + $0xd0] sm:$0x11] }
  0x9d   : > { %v752_v21 = vsel %vm5856_vm8, %v682_v18, %v751_v14  ;;  %v759_v22 = vsel %vm5856_vm8, %v685_v19, %v758_v16 }
  0x9e   : > { %753 = vst [vmem:[#allocation2 + $0x30] sm:$0xff] %v752_v21  ;;  %v696_v25 = vsel %vm678_vm14, %v671_v24, %v641_v20 }
  0x9f   : > { %760 = vst [vmem:[#allocation2 + $0x48] sm:$0xff] %v759_v22  ;;  %v784_v26 = vsel %vm5824_vm15, %v696_v25, %v783_v23 }
  0xa0   : > { %785 = vst [vmem:[#allocation2 + $0xa0] sm:$0x11] %v784_v26 }
  0xa1   : > { %v621_v27 = vpop.permute.xlu1 %620  ;;  %v609_v28 = vpop.permute.xlu0 %608 }
  0xa2   : > { %v661_v29 = vrot.slane %v621_v27, 4  ;;  %v655_v30 = vrot.slane %v609_v28, 4 }
  0xa3   : > { %v649_v33 = vpop.permute.xlu2 %648 }
  0xa4   : > { %v686_v31 = vsel %vm678_vm14, %v661_v29, %v621_v27  ;;  %v680_v32 = vsel %vm678_vm14, %v655_v30, %v609_v28  ;;  %v675_v35 = vrot.slane %v649_v33, 4 }
  0xa5   : > { %761 = vst.msk [vmem:[#allocation2 + $0x50] sm:$0xff] %vm5849_vm5, %v686_v31 }
  0xa6   : > { %741 = vst.msk [vmem:[#allocation2 + $0x20] sm:$0xff] %vm5849_vm5, %v680_v32  ;;  %v700_v37 = vsel %vm678_vm14, %v675_v35, %v649_v33 }
  0xa7   : > { %v794_v38 = vsel %vm5856_vm8, %v700_v37, %v793_v34 }
  0xa8   : > { %795 = vst [vmem:[#allocation2 + $0xc0] sm:$0xff] %v794_v38 }
  0xa9   : > { %v629_v39 = vpop.permute.xlu1 %628  ;;  %v625_v40 = vpop.permute.xlu0 %624 }
  0xaa   : > { %v665_v42 = vrot.slane %v629_v39, 4  ;;  %v663_v44 = vrot.slane %v625_v40, 4 }
  0xab   : > { %v633_v48 = vpop.permute.xlu2 %632 }
  0xac   : > { %v690_v45 = vsel %vm678_vm14, %v665_v42, %v629_v39  ;;  %v688_v47 = vsel %vm678_vm14, %v663_v44, %v625_v40  ;;  %v667_v51 = vrot.slane %v633_v48, 4 }
  0xad   : > { %v770_v49 = vsel %vm5824_vm15, %v690_v45, %v769_v41  ;;  %v766_v50 = vsel %vm5856_vm8, %v688_v47, %v765_v43 }
  0xae   : > { %771 = vst [vmem:[#allocation2 + $0x70] sm:$0x11] %v770_v49  ;;  %v692_v52 = vsel %vm678_vm14, %v667_v51, %v633_v48 }
  0xaf   : > { %767 = vst [vmem:[#allocation2 + $0x60] sm:$0xff] %v766_v50 }
  0xb0   : > { %775 = vst.msk [vmem:[#allocation2 + $0x80] sm:$0xff] %vm5849_vm5, %v692_v52 }
  0xb1   : > { %v637_v53 = vpop.permute.xlu1 %636  ;;  %v635_v54 = vpop.permute.xlu0 %634 }
  0xb2   : > { %v669_v56 = vrot.slane %v637_v53, 4  ;;  %v668_v59 = vrot.slane %v635_v54, 4 }
  0xb3   : > { %v651_v62 = vpop.permute.xlu2 %650 }
  0xb4   : > { %v694_v60 = vsel %vm678_vm14, %v669_v56, %v637_v53  ;;  %v693_v61 = vsel %vm678_vm14, %v668_v59, %v635_v54  ;;  %v676_v2 = vrot.slane %v651_v62, 4 }
  0xb5   : > { %v780_v63 = vsel %vm5856_vm8, %v694_v60, %v779_v55  ;;  %v777_v1 = vsel %vm5824_vm15, %v693_v61, %v776_v58 }
  0xb6   : > { %781 = vst [vmem:[#allocation2 + $0x90] sm:$0xff] %v780_v63  ;;  %v701_v3 = vsel %vm678_vm14, %v676_v2, %v651_v62 }
  0xb7   : > { %778 = vst [vmem:[#allocation2 + $0x88] sm:$0x11] %v777_v1 }
  0xb8   : > { %796 = vst.msk [vmem:[#allocation2 + $0xc8] sm:$0xff] %vm5849_vm5, %v701_v3 }
  0xb9   : > { %v647_v4 = vpop.permute.xlu1 %646  ;;  %v643_v5 = vpop.permute.xlu0 %642 }
  0xba   : > { %v674_v7 = vrot.slane %v647_v4, 4  ;;  %v672_v9 = vrot.slane %v643_v5, 4 }
  0xbc   : > { %v699_v10 = vsel %vm678_vm14, %v674_v7, %v647_v4  ;;  %v697_v11 = vsel %vm678_vm14, %v672_v9, %v643_v5 }
  0xbd   : > { %v791_v12 = vsel %vm5824_vm15, %v699_v10, %v790_v6  ;;  %v787_v13 = vsel %vm5856_vm8, %v697_v11, %v786_v8 }
  0xbe   : > { %792 = vst [vmem:[#allocation2 + $0xb8] sm:$0x11] %v791_v12 }
  0xbf   : > { %788 = vst [vmem:[#allocation2 + $0xa8] sm:$0xff] %v787_v13 }
  0xc1   : > { %v627_v14 = vpop.permute.xlu1 %626  ;;  %v653_v15 = vpop.permute.xlu0 %652 }
  0xc2   : > { %v664_v16 = vrot.slane %v627_v14, 4  ;;  %v677_v18 = vrot.slane %v653_v15, 4 }
  0xc4   : > { %v689_v19 = vsel %vm678_vm14, %v664_v16, %v627_v14  ;;  %v702_v20 = vsel %vm678_vm14, %v677_v18, %v653_v15 }
  0xc5   : > { %768 = vst.msk [vmem:[#allocation2 + $0x68] sm:$0xff] %vm5849_vm5, %v689_v19  ;;  %v798_v21 = vsel %vm5824_vm15, %v702_v20, %v797_v17 }
  0xc6   : > { %799 = vst [vmem:[#allocation2 + $0xd0] sm:$0x11] %v798_v21 }
  0xc9   : > { %v645_v22 = vpop.permute.xlu1 %644  ;;  %v639_v23 = vpop.permute.xlu0 %638 }
  0xca   : > { %v673_v24 = vrot.slane %v645_v22, 4  ;;  %v670_v25 = vrot.slane %v639_v23, 4  ;;  %803 = sbr.rel (%p4555_p11) target bundleno = 342 (0x156), region = 40 }
  0xcc   : > { %v698_v26 = vsel %vm678_vm14, %v673_v24, %v645_v22  ;;  %v695_v27 = vsel %vm678_vm14, %v670_v25, %v639_v23 }
  0xcd   : > { %789 = vst.msk [vmem:[#allocation2 + $0xb0] sm:$0xff] %vm5849_vm5, %v698_v26 }
  0xce   : > { %782 = vst.msk [vmem:[#allocation2 + $0x98] sm:$0xff] %vm5849_vm5, %v695_v27 }
  0xcf   : > { %v804_v28 = vld [vmem:[%s5641_s26] sm:$0xf]  ;;  %v805_v29 = vld [vmem:[%s5641_s26 + $0x4] sm:$0xf]  ;;  %v842_v52 = vld [vmem:[#allocation2 + $0x10] sm:$0x11] }
  0xd0   : > { %v807_v30 = vshrl.u32 %v804_v28, 16  ;;  %v810_v31 = vshll.u32 %v804_v28, 16  ;;  %v815_v32 = vshrl.u32 %v805_v29, 16  ;;  %v818_v33 = vshll.u32 %v805_v29, 16  ;;  %v838_v43 = vld [vmem:[#allocation2] sm:$0xff] }
  0xd2   : > { %v809_v34 = vrot.slane %v807_v30, 7  ;;  %v817_v35 = vrot.slane %v815_v32, 7 }
  0xd4   : > { %v812_v37 = vor.u32 %v810_v31, %v809_v34  ;;  %v813_v38 = vrot.slane %v809_v34, 4  ;;  %v820_v39 = vor.u32 %v818_v33, %v817_v35  ;;  %v822_v41 = vrot.slane %v817_v35, 4 }
  0xd6   : > { %823 = vrot.lane.b32.xlu0 %v812_v37, %s5542_s11  ;;  %v821_v40 = vsel %vm5667_vm2, %v813_v38, %v820_v39 }
  0xd7   : > { %825 = vrot.lane.b32.xlu1 %v821_v40, %s5542_s11 }
  0xde   : > { %827 = vrot.lane.b32.xlu0 %v822_v41, %s5542_s11 }
 0x148   : > { %v824_v42 = vpop.permute.xlu0 %823 }
 0x149   : > { %v829_v44 = vrot.slane %v824_v42, 4  ;;  %v826_v45 = vpop.permute.xlu1 %825 }
 0x14a   : > { %v830_v47 = vrot.slane %v826_v45, 4 }
 0x14b   : > { %v832_v48 = vsel %vm678_vm14, %v829_v44, %v824_v42 }
 0x14c   : > { %v839_v49 = vsel %vm5856_vm8, %v832_v48, %v838_v43  ;;  %v833_v50 = vsel %vm678_vm14, %v830_v47, %v826_v45 }
 0x14d   : > { %840 = vst [vmem:[#allocation2] sm:$0xff] %v839_v49 }
 0x14e   : > { %841 = vst.msk [vmem:[#allocation2 + $0x8] sm:$0xff] %vm5849_vm5, %v833_v50 }
 0x150   : > { %v828_v51 = vpop.permute.xlu0 %827 }
 0x151   : > { %v831_v53 = vrot.slane %v828_v51, 4 }
 0x153   : > { %v834_v54 = vsel %vm678_vm14, %v831_v53, %v828_v51 }
 0x154   : > { %v843_v55 = vsel %vm5824_vm15, %v834_v54, %v842_v52 }
 0x155   : > { %844 = vst [vmem:[#allocation2 + $0x10] sm:$0x11] %v843_v55 }
 0x156 PF: > { %p4556_p12 = scmp.ge.s32.totalorder %s5522_s18, 1 }
 0x157   : > { %s5543_s27 = smov (!%p4556_p12), 8  }
 0x158   : > { %848 = sbr.rel (%p4556_p12) target bundleno = 484 (0x1e4), region = 44 }
 0x15d   : > { %v849_v56 = vld [vmem:[%s5646_s12] sm:$0xf]  ;;  %v850_v58 = vld [vmem:[%s5646_s12 + $0x4] sm:$0xf]  ;;  %v884_v8 = vld [vmem:[#allocation2 + $0xd8] sm:$0xff] }
 0x15e   : > { %v852_v59 = vshrl.u32 %v849_v56, 16  ;;  %v855_v60 = vshll.u32 %v849_v56, 16  ;;  %v860_v61 = vshrl.u32 %v850_v58, 16  ;;  %v863_v62 = vshll.u32 %v850_v58, 16  ;;  %v888_v15 = vld [vmem:[#allocation2 + $0xe8] sm:$0x11] }
 0x160   : > { %v854_v63 = vrot.slane %v852_v59, 7  ;;  %v862_v1 = vrot.slane %v860_v61, 7 }
 0x162   : > { %v857_v2 = vor.u32 %v855_v60, %v854_v63  ;;  %v858_v3 = vrot.slane %v854_v63, 4  ;;  %v865_v4 = vor.u32 %v863_v62, %v862_v1  ;;  %v867_v6 = vrot.slane %v862_v1, 4 }
 0x164   : > { %868 = vrot.lane.b32.xlu0 %v857_v2, %s5543_s27  ;;  %v866_v5 = vsel %vm5667_vm2, %v858_v3, %v865_v4 }
 0x165   : > { %870 = vrot.lane.b32.xlu1 %v866_v5, %s5543_s27 }
 0x16c   : > { %872 = vrot.lane.b32.xlu0 %v867_v6, %s5543_s27 }
 0x1d6   : > { %v869_v7 = vpop.permute.xlu0 %868 }
 0x1d7   : > { %v874_v9 = vrot.slane %v869_v7, 4  ;;  %v871_v10 = vpop.permute.xlu1 %870 }
 0x1d8   : > { %v875_v11 = vrot.slane %v871_v10, 4 }
 0x1d9   : > { %v877_v12 = vsel %vm678_vm14, %v874_v9, %v869_v7 }
 0x1da   : > { %v885_v13 = vsel %vm5856_vm8, %v877_v12, %v884_v8  ;;  %v878_v14 = vsel %vm678_vm14, %v875_v11, %v871_v10 }
 0x1db   : > { %886 = vst [vmem:[#allocation2 + $0xd8] sm:$0xff] %v885_v13 }
 0x1dc   : > { %887 = vst.msk [vmem:[#allocation2 + $0xe0] sm:$0xff] %vm5849_vm5, %v878_v14 }
 0x1de   : > { %v873_v36 = vpop.permute.xlu0 %872 }
 0x1df   : > { %v876_v16 = vrot.slane %v873_v36, 4 }
 0x1e1   : > { %v879_v17 = vsel %vm678_vm14, %v876_v16, %v873_v36 }
 0x1e2   : > { %v889_v18 = vsel %vm5824_vm15, %v879_v17, %v888_v15 }
 0x1e3   : > { %890 = vst [vmem:[#allocation2 + $0xe8] sm:$0x11] %v889_v18 }
 0x1e4 PF: > { %v5355_v0 = vld [vmem:[%s7107_s3 + $0x80] sm:$0xff]  ;;  %v5346_v19 = vld [vmem:[%s7107_s3 + $0x38] sm:$0xff]  ;;  %v5329_v20 = vld [vmem:[#allocation2 + $0x4c] sm:$0xf]  ;;  %vm1257_vm2 = vcmask 130048   ;;  %vm1652_vm12 = vcmask 1042432  }
 0x1e5   : > { %v5960_v57 = vld [vmem:[%s7107_s3 + $0x40] sm:$0xff]  ;;  %v4647_v21 = vld [vmem:[#allocation2 + $0x50] sm:$0xf0]  ;;  %1282 = vmatpush.bf16.msra.mxu0 %v5355_v0  ;;  %1530 = vmatpush.bf16.msra.mxu2 %v5346_v19  ;;  %v5354_v22 = vld [vmem:[%s7107_s3 + $0x78] sm:$0xff]  ;;  %vm933_vm9 = vsmask.f32 3328 }
 0x1e6   : > { %v4650_v46 = vor.u32 %v5329_v20, %v4647_v21  ;;  %v5365_v23 = vld [vmem:[%s7107_s3 + $0xd0] sm:$0xff]  ;;  %5453 = vmatpush.bf16.msra.mxu3 %v5960_v57  ;;  %v5975_v25 = vld [vmem:[%s7107_s3 + $0x88] sm:$0xff]  ;;  %v5979_v28 = vld [vmem:[#allocation2 + $0x58] sm:$0x11]  ;;  %vm934_vm10 = vsmask.f32 7440 }
 0x1e7   : > { %v5345_v24 = vld [vmem:[%s7107_s3 + $0x30] sm:$0xff]  ;;  %v897_v26 = vld [vmem:[#allocation2 + $0x48] sm:$0xff]  ;;  %5452 = vmatpush.bf16.msra.mxu1 %v5975_v25  ;;  %v1028_v33 = vshll.u32 %v5979_v28, 16  ;;  %vm5997_vm11 = vmor %vm933_vm9, %vm934_vm10  ;;  %vm1653_vm13 = vcmask 1046532  }
 0x1e8   : > { %v5977_v27 = vld [vmem:[#allocation2 + $0x50] sm:$0xff]  ;;  %v1009_v29 = vshrl.u32 %v897_v26, 16  ;;  %v1012_v30 = vshll.u32 %v897_v26, 16  ;;  %v5364_v34 = vld [vmem:[%s7107_s3 + $0xc8] sm:$0xff]  ;;  %v5363_v44 = vld [vmem:[%s7107_s3 + $0xc0] sm:$0xff] }
 0x1e9   : > { %v1018_v31 = vshll.u32 %v5977_v27, 16  ;;  %v1022_v32 = vshrl.u32 %v5977_v27, 16  ;;  %4722 = vmatmul.msk.bf16.vlgmr.msra.gmra.mxu3 %vm1257_vm2, %v4650_v46  ;;  %1283 = vmatpush.bf16.msra.mxu0 %v5354_v22  ;;  %v5353_v35 = vld [vmem:[%s7107_s3 + $0x70] sm:$0xff]  ;;  %v5344_v39 = vld [vmem:[%s7107_s3 + $0x28] sm:$0xff]  ;;  %v1030_v47 = vrot.slane %v1028_v33, 5  ;;  %v899_v49 = vld [vmem:[#allocation2 + $0x60] sm:$0xff] }
 0x1ea   : > { %1920 = vmatpush.bf16.msrb.mxu3 %v5365_v23  ;;  %v1011_v37 = vrot.slane %v1009_v29, 4  ;;  %v1014_v38 = vrot.slane %v1012_v30, 5  ;;  %1531 = vmatpush.bf16.msra.mxu2 %v5345_v24  ;;  %v5352_v48 = vld [vmem:[%s7107_s3 + $0x68] sm:$0xff]  ;;  %v6009_v52 = vld [vmem:[#allocation2 + $0x70] sm:$0x11]  ;;  %v1033_v53 = vshrl.u32 %v899_v49, 16  ;;  %vm6207_vm14 = vmor %vm1652_vm12, %vm1653_vm13 }
 0x1eb   : > { %v1020_v40 = vrot.slane %v1018_v31, 5  ;;  %v1024_v41 = vrot.slane %v1022_v32, 4  ;;  %1864 = vmatpush.bf16.msrb.mxu1 %v5364_v34  ;;  %v6007_v50 = vld [vmem:[#allocation2 + $0x68] sm:$0xff]  ;;  %v1036_v54 = vshll.u32 %v899_v49, 16  ;;  %v5343_v58 = vld [vmem:[%s7107_s3 + $0x20] sm:$0xff]  ;;  %v1052_v7 = vshll.u32 %v6009_v52, 16 }
 0x1ec   : > { %v1015_v43 = vor.u32 %v1014_v38, %v1011_v37  ;;  %v1042_v55 = vshll.u32 %v6007_v50, 16  ;;  %v1046_v59 = vshrl.u32 %v6007_v50, 16  ;;  %v891_v60 = vld [vmem:[#allocation2] sm:$0xff]  ;;  %v1035_v62 = vrot.slane %v1033_v53, 4  ;;  %v6020_v2 = vld [vmem:[#allocation2 + $0x8] sm:$0xff]  ;;  %v5362_v14 = vld [vmem:[%s7107_s3 + $0xb8] sm:$0xff] }
 0x1ed   : > { %v1025_v45 = vor.u32 %v1024_v41, %v1020_v40  ;;  %1284 = vmatpush.bf16.msra.mxu0 %v5353_v35  ;;  %v1038_v63 = vrot.slane %v1036_v54, 5  ;;  %v6022_v3 = vld [vmem:[#allocation2 + $0x10] sm:$0x11]  ;;  %v5351_v9 = vld [vmem:[%s7107_s3 + $0x60] sm:$0xff]  ;;  %v937_v12 = vshrl.u32 %v891_v60, 16  ;;  %v940_v13 = vshll.u32 %v891_v60, 16 }
 0x1ee   : > { %v1016_v51 = vrot.slane %v1015_v43, 4  ;;  %1532 = vmatpush.bf16.msra.mxu2 %v5344_v39  ;;  %v1044_v1 = vrot.slane %v1042_v55, 5  ;;  %v1048_v6 = vrot.slane %v1046_v59, 4  ;;  %v5331_v10 = vld [vmem:[#allocation2 + $0x64] sm:$0xf]  ;;  %v5342_v36 = vld [vmem:[%s7107_s3 + $0x18] sm:$0xff] }
 0x1ef   : > { %v1026_v56 = vrot.slane %v1025_v45, 4  ;;  %1865 = vmatpush.bf16.msrb.mxu1 %v5363_v44  ;;  %v1039_v11 = vor.u32 %v1038_v63, %v1035_v62  ;;  %v4655_v15 = vld [vmem:[#allocation2 + $0x68] sm:$0xf0]  ;;  %v946_v17 = vshll.u32 %v6020_v2, 16  ;;  %v950_v18 = vshrl.u32 %v6020_v2, 16  ;;  %v5361_v46 = vld [vmem:[%s7107_s3 + $0xb0] sm:$0xff] }
 0x1f0   : > { %v6018_v61 = vsel %vm5997_vm11, %v1016_v51, %v1020_v40  ;;  %v1049_v16 = vor.u32 %v1048_v6, %v1044_v1  ;;  %v956_v0 = vshll.u32 %v6022_v3, 16  ;;  %v939_v20 = vrot.slane %v937_v12, 4  ;;  %v901_v24 = vld [vmem:[#allocation2 + $0x78] sm:$0xff]  ;;  %v6050_v32 = vld [vmem:[#allocation2 + $0x80] sm:$0xff]  ;;  %v5341_v33 = vld [vmem:[%s7107_s3 + $0x10] sm:$0xff] }
 0x1f1   : > { %v6026_v4 = vsel %vm5997_vm11, %v1026_v56, %v1030_v47  ;;  %v1160_v5 = vunpack.c.h.b16 %v6018_v61  ;;  %1285 = vmatpush.bf16.msra.mxu0 %v5352_v48  ;;  %v942_v21 = vrot.slane %v940_v13, 5  ;;  %v948_v22 = vrot.slane %v946_v17, 5  ;;  %v5350_v29 = vld [vmem:[%s7107_s3 + $0x58] sm:$0xff]  ;;  %v5349_v47 = vld [vmem:[%s7107_s3 + $0x50] sm:$0xff]  ;;  %v5360_v51 = vld [vmem:[%s7107_s3 + $0xa8] sm:$0xff] }
 0x1f2   : > { %v1162_v8 = vunpack.c.h.b16 %v6026_v4  ;;  %1533 = vmatpush.bf16.msra.mxu2 %v5343_v58  ;;  %v952_v23 = vrot.slane %v950_v18, 4  ;;  %v4658_v26 = vor.u32 %v5331_v10, %v4655_v15  ;;  %v1054_v30 = vrot.slane %v1052_v7, 5  ;;  %v893_v49 = vld [vmem:[#allocation2 + $0x18] sm:$0xff]  ;;  %v5340_v53 = vld [vmem:[%s7107_s3 + $0x8] sm:$0xff]  ;;  %v6083_v58 = vld [vmem:[#allocation2 + $0x20] sm:$0xff] }
 0x1f3   : > { %1866 = vmatpush.bf16.msrb.mxu1 %v5362_v14  ;;  %v943_v31 = vor.u32 %v942_v21, %v939_v20  ;;  %v1040_v34 = vrot.slane %v1039_v11, 4  ;;  %v1050_v35 = vrot.slane %v1049_v16, 4  ;;  %v958_v38 = vrot.slane %v956_v0, 5  ;;  %v6085_v59 = vld [vmem:[#allocation2 + $0x88] sm:$0x11]  ;;  %v5339_v15 = vld [vmem:[%s7107_s3] sm:$0xff] }
 0x1f4   : > { %v1186_v19 = vpack.c.b16 %v1162_v8, %v1160_v5  ;;  %v953_v37 = vor.u32 %v952_v23, %v948_v22  ;;  %v1057_v40 = vshrl.u32 %v901_v24, 16  ;;  %v1060_v43 = vshll.u32 %v901_v24, 16  ;;  %v4621_v12 = vld [vmem:[#allocation2] sm:$0xf]  ;;  %v6094_v13 = vld [vmem:[#allocation2 + $0x28] sm:$0x11] }
 0x1f5   : > { %1286 = vmatpush.bf16.msra.mxu0 %v5351_v9  ;;  %v944_v39 = vrot.slane %v943_v31, 4  ;;  %v1066_v44 = vshll.u32 %v6050_v32, 16  ;;  %v1070_v45 = vshrl.u32 %v6050_v32, 16  ;;  %v6073_v54 = vsel %vm5997_vm11, %v1040_v34, %v1044_v1  ;;  %v5348_v1 = vld [vmem:[%s7107_s3 + $0x48] sm:$0xff]  ;;  %v5333_v31 = vld [vmem:[#allocation2 + $0x7c] sm:$0xf] }
 0x1f6   : > { %4614 = vmatmul.msk.bf16.vlgmr.msra.gmra.mxu1 %vm1257_vm2, %v1186_v19  ;;  %1534 = vmatpush.bf16.msra.mxu2 %v5342_v36  ;;  %v954_v41 = vrot.slane %v953_v37, 4  ;;  %v6077_v55 = vsel %vm5997_vm11, %v1050_v35, %v1054_v30  ;;  %v1059_v60 = vrot.slane %v1057_v40, 4  ;;  %v1062_v62 = vrot.slane %v1060_v43, 5  ;;  %v5324_v16 = vld [vmem:[#allocation2 + $0x4] sm:$0xf0] }
 0x1f7   : > { %1867 = vmatpush.bf16.msrb.mxu1 %v5361_v46  ;;  %v6063_v48 = vsel %vm5997_vm11, %v944_v39, %v948_v22  ;;  %v1068_v63 = vrot.slane %v1066_v44, 5  ;;  %v1072_v5 = vrot.slane %v1070_v45, 4  ;;  %v961_v8 = vshrl.u32 %v893_v49, 16  ;;  %v6108_v44 = vld [vmem:[#allocation2 + $0x98] sm:$0xff] }
 0x1f8   : > { %v6081_v56 = vsel %vm5997_vm11, %v954_v41, %v958_v38  ;;  %v1147_v6 = vunpack.c.l.b16 %v6063_v48  ;;  %v964_v9 = vshll.u32 %v893_v49, 16  ;;  %v1164_v10 = vunpack.c.h.b16 %v6073_v54  ;;  %v903_v41 = vld [vmem:[#allocation2 + $0x90] sm:$0xff]  ;;  %v6113_v45 = vld [vmem:[#allocation2 + $0x38] sm:$0xff] }
 0x1f9   : > { %4723 = vmatmul.msk.bf16.gmra.mxu3 %vm1257_vm2, %v4658_v26  ;;  %1287 = vmatpush.bf16.msra.mxu0 %v5350_v29  ;;  %v1149_v7 = vunpack.c.l.b16 %v6081_v56  ;;  %v1166_v11 = vunpack.c.h.b16 %v6077_v55  ;;  %v970_v14 = vshll.u32 %v6083_v58, 16  ;;  %v974_v36 = vshrl.u32 %v6083_v58, 16 }
 0x1fa   : > { %1535 = vmatpush.bf16.msra.mxu2 %v5341_v33  ;;  %v1076_v17 = vshll.u32 %v6085_v59, 16  ;;  %v963_v18 = vrot.slane %v961_v8, 4  ;;  %v966_v0 = vrot.slane %v964_v9, 5  ;;  %v1063_v19 = vor.u32 %v1062_v62, %v1059_v60  ;;  %v4663_v33 = vld [vmem:[#allocation2 + $0x80] sm:$0xf0]  ;;  %v5358_v9 = vld [vmem:[%s7107_s3 + $0x98] sm:$0xff] }
 0x1fb   : > { %1868 = vmatpush.bf16.msrb.mxu1 %v5360_v51  ;;  %v1073_v20 = vor.u32 %v1072_v5, %v1068_v63  ;;  %v972_v21 = vrot.slane %v970_v14, 5  ;;  %v976_v46 = vrot.slane %v974_v36, 4  ;;  %v1179_v22 = vpack.c.b16 %v1149_v7, %v1147_v6 }
 0x1fc   : > { %v967_v23 = vor.u32 %v966_v0, %v963_v18  ;;  %v980_v24 = vshll.u32 %v6094_v13, 16  ;;  %v1188_v26 = vpack.c.b16 %v1166_v11, %v1164_v10  ;;  %v4622_v29 = vor.u32 %v5324_v16, %v4621_v12  ;;  %v4629_v16 = vld [vmem:[#allocation2 + $0x18] sm:$0xf] }
 0x1fd   : > { %1288 = vmatpush.bf16.msra.mxu0 %v5349_v47  ;;  %v977_v30 = vor.u32 %v976_v46, %v972_v21  ;;  %v1064_v34 = vrot.slane %v1063_v19, 4  ;;  %v1074_v35 = vrot.slane %v1073_v20, 4  ;;  %v1078_v37 = vrot.slane %v1076_v17, 5  ;;  %v5326_v17 = vld [vmem:[#allocation2 + $0x1c] sm:$0xf0] }
 0x1fe   : > { %1536 = vmatpush.bf16.msra.mxu2 %v5340_v53  ;;  %v968_v38 = vrot.slane %v967_v23, 4  ;;  %v982_v40 = vrot.slane %v980_v24, 5  ;;  %v4666_v43 = vor.u32 %v5333_v31, %v4663_v33  ;;  %v1081_v51 = vshrl.u32 %v903_v41, 16  ;;  %v6144_v19 = vld [vmem:[#allocation2 + $0xa0] sm:$0x11] }
 0x1ff   : > { %v6105_v39 = vrot.slane %v977_v30, 4  ;;  %v6117_v47 = vsel %vm5997_vm11, %v1064_v34, %v1068_v63  ;;  %v6121_v49 = vsel %vm5997_vm11, %v1074_v35, %v1078_v37  ;;  %v1084_v53 = vshll.u32 %v903_v41, 16  ;;  %v6146_v23 = vld [vmem:[#allocation2 + $0x40] sm:$0x11]  ;;  %v5335_v33 = vld [vmem:[#allocation2 + $0x94] sm:$0xf] }
 0x200   : > { %v6125_v60 = vsel %vm5997_vm11, %v968_v38, %v972_v21  ;;  %v1090_v5 = vshll.u32 %v6108_v44, 16  ;;  %v1094_v63 = vshrl.u32 %v6108_v44, 16  ;;  %v994_v7 = vshll.u32 %v6113_v45, 16  ;;  %v4671_v34 = vld [vmem:[#allocation2 + $0x98] sm:$0xf0] }
 0x201   : > { %1289 = vmatpush.bf16.msra.mxu0 %v5348_v1  ;;  %v6130_v62 = vsel %vm5997_vm11, %v6105_v39, %v982_v40  ;;  %v998_v8 = vshrl.u32 %v6113_v45, 16  ;;  %v1168_v10 = vunpack.c.h.b16 %v6117_v47  ;;  %v1170_v11 = vunpack.c.h.b16 %v6121_v49 }
 0x202   : > { %1537 = vmatpush.bf16.msra.mxu2 %v5339_v15  ;;  %v1083_v12 = vrot.slane %v1081_v51, 4  ;;  %v1086_v14 = vrot.slane %v1084_v53, 5  ;;  %v1151_v36 = vunpack.c.l.b16 %v6125_v60  ;;  %v1153_v15 = vunpack.c.l.b16 %v6130_v62 }
 0x203   : > { %v1092_v18 = vrot.slane %v1090_v5, 5  ;;  %v1096_v0 = vrot.slane %v1094_v63, 4  ;;  %v996_v46 = vrot.slane %v994_v7, 5  ;;  %v4630_v24 = vor.u32 %v5326_v17, %v4629_v16  ;;  %v5357_v63 = vld [vmem:[%s7107_s3 + $0x90] sm:$0xff] }
 0x204   : > { %1290 = vmatmul.bf16.vlgmr.msra.gmra.mxu0 %v1179_v22  ;;  %v1000_v22 = vrot.slane %v998_v8, 4  ;;  %v1087_v30 = vor.u32 %v1086_v14, %v1083_v12  ;;  %v1100_v31 = vshll.u32 %v6144_v19, 16  ;;  %v1004_v40 = vshll.u32 %v6146_v23, 16 }
 0x205   : > { %1338 = vmatpush.bf16.msrb.mxu0 %v5975_v25  ;;  %1538 = vmatmul.bf16.vlgmr.msra.gmra.mxu2 %v4622_v29  ;;  %v5359_v25 = vld [vmem:[%s7107_s3 + $0xa0] sm:$0xff]  ;;  %v1181_v29 = vpack.c.b16 %v1153_v15, %v1151_v36  ;;  %v1097_v35 = vor.u32 %v1096_v0, %v1092_v18  ;;  %v4674_v41 = vor.u32 %v5335_v33, %v4671_v34 }
 0x206   : > { %1586 = vmatpush.bf16.msrb.mxu2 %v5960_v57  ;;  %4615 = vmatmul.msk.bf16.gmra.mxu1 %vm1257_vm2, %v1188_v26  ;;  %v895_v57 = vld [vmem:[#allocation2 + $0x30] sm:$0xff]  ;;  %v1190_v26 = vpack.c.b16 %v1170_v11, %v1168_v10  ;;  %v1001_v38 = vor.u32 %v1000_v22, %v996_v46  ;;  %v1006_v5 = vrot.slane %v1004_v40, 5  ;;  %v5399_v11 = vld [vmem:[%s7107_s3 + $0x160] sm:$0xff] }
 0x207   : > { %1869 = vmatpush.bf16.msrb.mxu1 %v5359_v25  ;;  %v985_v1 = vshrl.u32 %v895_v57, 16  ;;  %v988_v6 = vshll.u32 %v895_v57, 16  ;;  %v1102_v25 = vrot.slane %v1100_v31, 5  ;;  %v1098_v57 = vrot.slane %v1097_v35, 4  ;;  %2702 = vmatpush.bf16.msra.mxu3 %v5399_v11  ;;  %v5337_v35 = vld [vmem:[#allocation2 + $0xac] sm:$0xf] }
 0x208   : > { %v6153_v53 = vrot.slane %v1001_v38, 4  ;;  %v1660_v11 = vrot.slane %v6022_v3, 5  ;;  %v1161_v3 = vunpack.c.l.b16 %v6026_v4  ;;  %v5397_v4 = vld [vmem:[%s7107_s3 + $0x150] sm:$0xff] }
 0x209   : > { %4724 = vmatmul.msk.bf16.gmra.mxu3 %vm1257_vm2, %v4666_v43  ;;  %v987_v20 = vrot.slane %v985_v1, 4  ;;  %v990_v21 = vrot.slane %v988_v6, 5  ;;  %v1088_v43 = vrot.slane %v1087_v30, 4  ;;  %v905_v1 = vld [vmem:[#allocation2 + $0xa8] sm:$0xff]  ;;  %v6158_v6 = vld [vmem:[#allocation2 + $0xb0] sm:$0xff]  ;;  %v6167_v8 = vsel %vm5997_vm11, %v1098_v57, %v1102_v25  ;;  %v5398_v25 = vld [vmem:[%s7107_s3 + $0x158] sm:$0xff] }
 0x20a   : > { %v6176_v10 = vsel %vm5997_vm11, %v6153_v53, %v1006_v5  ;;  %v1105_v12 = vshrl.u32 %v905_v1, 16  ;;  %v1108_v14 = vshll.u32 %v905_v1, 16  ;;  %v1114_v15 = vshll.u32 %v6158_v6, 16  ;;  %v6187_v30 = vld [vmem:[#allocation2 + $0xb8] sm:$0x11] }
 0x20b   : > { %1870 = vmatpush.bf16.msrb.mxu1 %v5358_v9  ;;  %v991_v37 = vor.u32 %v990_v21, %v987_v20  ;;  %v6163_v7 = vsel %vm5997_vm11, %v1088_v43, %v1092_v18  ;;  %v1118_v16 = vshrl.u32 %v6158_v6, 16  ;;  %v1157_v18 = vunpack.c.l.b16 %v6176_v10  ;;  %v4637_v21 = vld [vmem:[#allocation2 + $0x30] sm:$0xf]  ;;  %v1628_v1 = vld [vmem:[#allocation2] sm:$0xee] }
 0x20c   : > { %v1172_v0 = vunpack.c.h.b16 %v6163_v7  ;;  %v1174_v20 = vunpack.c.h.b16 %v6167_v8  ;;  %v1107_v22 = vrot.slane %v1105_v12, 4  ;;  %v1657_v57 = vrot.slane %v6020_v2, 5 }
 0x20d   : > { %v992_v51 = vrot.slane %v991_v37, 4  ;;  %v4679_v37 = vld [vmem:[#allocation2 + $0xb0] sm:$0xf0]  ;;  %v4727_v2 = vrot.slane %v1628_v1, 9 }
 0x20e   : > { %v1192_v33 = vpack.c.b16 %v1174_v20, %v1172_v0  ;;  %v4682_v43 = vor.u32 %v5337_v35, %v4679_v37  ;;  %v1664_v35 = vrot.slane %v6083_v58, 5  ;;  %v1629_v37 = vld [vmem:[#allocation2 + $0x18] sm:$0xee] }
 0x20f   : > { %1871 = vmatpush.bf16.msrb.mxu1 %v5357_v63  ;;  %v6171_v9 = vsel %vm5997_vm11, %v992_v51, %v996_v46  ;;  %v5328_v46 = vld [vmem:[#allocation2 + $0x34] sm:$0xf0] }
 0x210   : > { %v7110_v17 = vunpack.c.l.b16 %v6171_v9  ;;  %v4638_v34 = vor.u32 %v5328_v46, %v4637_v21  ;;  %v4645_v21 = vld [vmem:[#allocation2 + $0x48] sm:$0xf]  ;;  %v5330_v46 = vld [vmem:[#allocation2 + $0x4c] sm:$0xf0] }
 0x212   : > { %v1183_v31 = vpack.c.b16 %v1157_v18, %v7110_v17  ;;  %v1159_v18 = vunpack.c.l.b16 %v6018_v61 }
 0x213   : > { %2646 = vmatpush.bf16.msra.mxu1 %v5398_v25  ;;  %v1165_v25 = vunpack.c.l.b16 %v6077_v55  ;;  %v5396_v55 = vld [vmem:[%s7107_s3 + $0x148] sm:$0xff] }
 0x214   : > { %1295 = vmatmul.bf16.gmra.mxu0 %v1181_v29  ;;  %v1120_v29 = vrot.slane %v1118_v16, 4  ;;  %v7137_v16 = vmov 0 }
 0x215   : > { %1543 = vmatmul.bf16.gmra.mxu2 %v4630_v24  ;;  %v1110_v24 = vrot.slane %v1108_v14, 5  ;;  %v7138_v16 = vsel %vm6207_vm14, 4294967295, %v7137_v16 }
 0x216   : > { %4616 = vmatmul.msk.bf16.gmra.mxu1 %vm1257_vm2, %v1190_v26  ;;  %v1116_v26 = vrot.slane %v1114_v15, 5  ;;  %v1659_v15 = vrot.slane %v1657_v57, 4  ;;  %7139 = vst [vmem:[#allocation3_spill] sm:$0xff] %v7138_v16 }
 0x217   : > { %v1111_v38 = vor.u32 %v1110_v24, %v1107_v22  ;;  %v1658_v22 = vsel %vm6207_vm14, %v4727_v2, %v1657_v57  ;;  %2647 = vmatpush.bf16.msra.mxu1 %v5397_v4 }
 0x218   : > { %v1121_v40 = vor.u32 %v1120_v29, %v1116_v26  ;;  %v1661_v24 = vsel %vm6207_vm14, %v1659_v15, %v1660_v11  ;;  %v1730_v57 = vunpack.c.l.b16 %v1658_v22 }
 0x219   : > { %4725 = vmatmul.msk.bf16.gmra.mxu3 %vm1257_vm2, %v4674_v41  ;;  %v1124_v41 = vshll.u32 %v6187_v30, 16  ;;  %v1112_v51 = vrot.slane %v1111_v38, 4  ;;  %v4728_v38 = vrot.slane %v1629_v37, 9 }
 0x21a   : > { %v1122_v5 = vrot.slane %v1121_v40, 4  ;;  %v1666_v40 = vrot.slane %v1664_v35, 4 }
 0x21b   : > { %v1126_v63 = vrot.slane %v1124_v41, 5  ;;  %v6201_v12 = vsel %vm5997_vm11, %v1112_v51, %v1116_v26  ;;  %v1185_v26 = vpack.c.b16 %v1161_v3, %v1159_v18  ;;  %v1667_v41 = vrot.slane %v6094_v13, 5  ;;  %2648 = vmatpush.bf16.msra.mxu1 %v5396_v55  ;;  %v5394_v55 = vld [vmem:[%s7107_s3 + $0x138] sm:$0xff] }
 0x21c   : > { %v1176_v0 = vunpack.c.h.b16 %v6201_v12  ;;  %v1732_v51 = vunpack.c.l.b16 %v1661_v24  ;;  %v1665_v1 = vsel %vm6207_vm14, %v4728_v38, %v1664_v35  ;;  %v1671_v13 = vrot.slane %v6113_v45, 5 }
 0x21d   : > { %v6205_v14 = vsel %vm5997_vm11, %v1122_v5, %v1126_v63  ;;  %v4653_v5 = vld [vmem:[#allocation2 + $0x60] sm:$0xf]  ;;  %v5332_v63 = vld [vmem:[#allocation2 + $0x64] sm:$0xf0]  ;;  %v1668_v58 = vsel %vm6207_vm14, %v1666_v40, %v1667_v41  ;;  %v1735_v18 = vunpack.c.h.b16 %v1665_v1 }
 0x21e   : > { %v1178_v20 = vunpack.c.h.b16 %v6205_v14  ;;  %v1762_v2 = vpack.c.b16 %v1732_v51, %v1730_v57  ;;  %v4654_v15 = vor.u32 %v5332_v63, %v4653_v5  ;;  %v1737_v3 = vunpack.c.h.b16 %v1668_v58  ;;  %v1631_v40 = vld [vmem:[#allocation2 + $0x48] sm:$0xee] }
 0x21f   : > { %v4730_v41 = vrot.slane %v1631_v40, 9  ;;  %v1171_v57 = vunpack.c.l.b16 %v6163_v7  ;;  %v1173_v51 = vunpack.c.l.b16 %v6167_v8 }
 0x220   : > { %v1194_v29 = vpack.c.b16 %v1178_v20, %v1176_v0  ;;  %v1630_v0 = vld [vmem:[#allocation2 + $0x30] sm:$0xee] }
 0x221   : > { %v4729_v20 = vrot.slane %v1630_v0, 9  ;;  %v1685_v0 = vrot.slane %v6007_v50, 5 }
 0x224   : > { %1300 = vmatmul.bf16.gmra.mxu0 %v1183_v31  ;;  %v4646_v31 = vor.u32 %v5330_v46, %v4645_v21  ;;  %v1673_v21 = vrot.slane %v1671_v13, 4  ;;  %v1674_v46 = vrot.slane %v6146_v23, 5  ;;  %v1678_v23 = vrot.slane %v5977_v27, 5 }
 0x225   : > { %1548 = vmatmul.bf16.gmra.mxu2 %v4638_v34  ;;  %v1733_v34 = vunpack.c.h.b16 %v1661_v24  ;;  %v1169_v24 = vunpack.c.l.b16 %v6121_v49  ;;  %v5395_v49 = vld [vmem:[%s7107_s3 + $0x140] sm:$0xff] }
 0x226   : > { %4617 = vmatmul.msk.bf16.gmra.mxu1 %vm1257_vm2, %v1192_v33  ;;  %v1731_v33 = vunpack.c.h.b16 %v1658_v22  ;;  %v1167_v22 = vunpack.c.l.b16 %v6117_v47  ;;  %v1675_v45 = vsel %vm6207_vm14, %v1673_v21, %v1674_v46  ;;  %v1688_v21 = vrot.slane %v6009_v52, 5  ;;  %v5390_v46 = vld [vmem:[%s7107_s3 + $0x118] sm:$0xff] }
 0x227   : > { %v1741_v38 = vunpack.c.h.b16 %v1675_v45  ;;  %2649 = vmatpush.bf16.msra.mxu1 %v5395_v49  ;;  %v1740_v63 = vunpack.c.l.b16 %v1675_v45  ;;  %2219 = vmatpush.bf16.msra.mxu2 %v5390_v46  ;;  %v1152_v45 = vunpack.c.h.b16 %v6125_v60  ;;  %v1699_v46 = vrot.slane %v6108_v44, 5  ;;  %v5405_v60 = vld [vmem:[%s7107_s3 + $0x190] sm:$0xff] }
 0x228   : > { %v1763_v61 = vpack.c.b16 %v1733_v34, %v1731_v33  ;;  %v5334_v33 = vld [vmem:[#allocation2 + $0x7c] sm:$0xf0]  ;;  %v1672_v34 = vsel %vm6207_vm14, %v4729_v20, %v1671_v13  ;;  %v1687_v20 = vrot.slane %v1685_v0, 4 }
 0x229   : > { %4726 = vmatmul.msk.bf16.gmra.mxu3 %vm1257_vm2, %v4682_v43  ;;  %v1163_v43 = vunpack.c.l.b16 %v6073_v54  ;;  %v1765_v54 = vpack.c.b16 %v1737_v3, %v1735_v18  ;;  %v1739_v37 = vunpack.c.h.b16 %v1672_v34  ;;  %v1738_v5 = vunpack.c.l.b16 %v1672_v34 }
 0x22a   : > { %v1191_v18 = vpack.c.b16 %v1173_v51, %v1171_v57  ;;  %v1689_v52 = vsel %vm6207_vm14, %v1687_v20, %v1688_v21  ;;  %v5392_v20 = vld [vmem:[%s7107_s3 + $0x128] sm:$0xff] }
 0x22b   : > { %v1187_v11 = vpack.c.b16 %v1165_v25, %v1163_v43  ;;  %v1767_v47 = vpack.c.b16 %v1741_v38, %v1739_v37  ;;  %v1680_v43 = vrot.slane %v1678_v23, 4  ;;  %v1681_v25 = vrot.slane %v5979_v28, 5  ;;  %2650 = vmatpush.bf16.msra.mxu1 %v5394_v55 }
 0x22c   : > { %v1766_v28 = vpack.c.b16 %v1740_v63, %v1738_v5  ;;  %v1695_v63 = vrot.slane %v6085_v59, 5  ;;  %v7111_v59 = vunpack.c.h.b16 %v6171_v9 }
 0x22d   : > { %v1682_v27 = vsel %vm6207_vm14, %v1680_v43, %v1681_v25  ;;  %v5388_v43 = vld [vmem:[%s7107_s3 + $0x108] sm:$0xff]  ;;  %v1633_v25 = vld [vmem:[#allocation2 + $0x78] sm:$0xee] }
 0x22e   : > { %v4732_v51 = vrot.slane %v1633_v25, 9 }
 0x234   : > { %1305 = vmatmul.bf16.gmra.mxu0 %v1185_v26  ;;  %v1734_v26 = vunpack.c.l.b16 %v1665_v1  ;;  %v4669_v1 = vld [vmem:[#allocation2 + $0x90] sm:$0xf] }
 0x235   : > { %1553 = vmatmul.bf16.gmra.mxu2 %v4646_v31  ;;  %v4661_v31 = vld [vmem:[#allocation2 + $0x78] sm:$0xf] }
 0x236   : > { %4618 = vmatmul.msk.bf16.gmra.mxu1 %vm1257_vm2, %v1194_v29  ;;  %v1736_v29 = vunpack.c.l.b16 %v1668_v58  ;;  %v4662_v35 = vor.u32 %v5334_v33, %v4661_v31  ;;  %v5336_v58 = vld [vmem:[#allocation2 + $0x94] sm:$0xf0]  ;;  %v4677_v31 = vld [vmem:[#allocation2 + $0xa8] sm:$0xf]  ;;  %v5338_v33 = vld [vmem:[#allocation2 + $0xac] sm:$0xf0] }
 0x237   : > { %v4670_v3 = vor.u32 %v5336_v58, %v4669_v1 }
 0x238   : > { %v1764_v4 = vpack.c.b16 %v1736_v29, %v1734_v26  ;;  %v1177_v26 = vunpack.c.l.b16 %v6205_v14  ;;  %v1744_v29 = vunpack.c.l.b16 %v1682_v27  ;;  %v1749_v14 = vunpack.c.h.b16 %v1689_v52 }
 0x239   : > { %4789 = vmatmul.msk.bf16.vlgmr.msrb.gmra.mxu3 %vm1257_vm2, %v1763_v61  ;;  %v1189_v61 = vpack.c.b16 %v1169_v24, %v1167_v22  ;;  %v1175_v24 = vunpack.c.l.b16 %v6201_v12  ;;  %v4678_v12 = vor.u32 %v5338_v33, %v4677_v31  ;;  %v1701_v31 = vrot.slane %v1699_v46, 4 }
 0x23a   : > { %v1702_v33 = vrot.slane %v6144_v19, 5 }
 0x23c   : > { %v1703_v19 = vsel %vm6207_vm14, %v1701_v31, %v1702_v33 }
 0x244   : > { %1310 = vmatmul.bf16.gmra.mxu0 %v1187_v11  ;;  %v1679_v11 = vsel %vm6207_vm14, %v4730_v41, %v1678_v23  ;;  %v1692_v41 = vrot.slane %v6050_v32, 5  ;;  %v5387_v32 = vld [vmem:[%s7107_s3 + $0x100] sm:$0xff] }
 0x245   : > { %1558 = vmatmul.bf16.gmra.mxu2 %v4654_v15  ;;  %v1150_v15 = vunpack.c.h.b16 %v6081_v56  ;;  %v1743_v7 = vunpack.c.h.b16 %v1679_v11  ;;  %v1742_v50 = vunpack.c.l.b16 %v1679_v11  ;;  %v1748_v11 = vunpack.c.l.b16 %v1689_v52  ;;  %v5384_v52 = vld [vmem:[%s7107_s3 + $0xe8] sm:$0xff] }
 0x246   : > { %1872 = vmatmul.bf16.vlgmr.msrb.gmra.mxu1 %v1762_v2  ;;  %v1148_v2 = vunpack.c.h.b16 %v6063_v48  ;;  %v1632_v48 = vld [vmem:[#allocation2 + $0x60] sm:$0xee]  ;;  %v1694_v5 = vrot.slane %v1692_v41, 4 }
 0x247   : > { %v4731_v56 = vrot.slane %v1632_v48, 9 }
 0x248   : > { %v6261_v13 = vpack.c.b16 %v1150_v15, %v1148_v2  ;;  %v4623_v2 = vld [vmem:[#allocation2 + $0x8] sm:$0xf0]  ;;  %v1693_v15 = vsel %vm6207_vm14, %v4732_v51, %v1692_v41  ;;  %v5383_v51 = vld [vmem:[%s7107_s3 + $0xe0] sm:$0xff] }
 0x249   : > { %4790 = vmatmul.msk.bf16.gmra.mxu3 %vm1257_vm2, %v1765_v54  ;;  %v1745_v54 = vunpack.c.h.b16 %v1682_v27  ;;  %v1686_v34 = vsel %vm6207_vm14, %v4731_v56, %v1685_v0  ;;  %v5323_v27 = vld [vmem:[#allocation2 + $0x4] sm:$0xf] }
 0x24a   : > { %v1747_v37 = vunpack.c.h.b16 %v1686_v34  ;;  %v1746_v58 = vunpack.c.l.b16 %v1686_v34  ;;  %v5385_v34 = vld [vmem:[%s7107_s3 + $0xf0] sm:$0xff] }
 0x24b   : > { %v1769_v8 = vpack.c.b16 %v1745_v54, %v1743_v7  ;;  %v4626_v54 = vor.u32 %v5323_v27, %v4623_v2  ;;  %v1635_v27 = vld [vmem:[#allocation2 + $0xa8] sm:$0xee] }
 0x24c   : > { %v1771_v23 = vpack.c.b16 %v1749_v14, %v1747_v37 }
 0x254   : > { %1315 = vmatmul.bf16.gmra.mxu0 %v1189_v61  ;;  %v1154_v61 = vunpack.c.h.b16 %v6130_v62  ;;  %v5393_v62 = vld [vmem:[%s7107_s3 + $0x130] sm:$0xff] }
 0x255   : > { %1563 = vmatmul.bf16.gmra.mxu2 %v4662_v35  ;;  %v1768_v35 = vpack.c.b16 %v1744_v29, %v1742_v50  ;;  %2651 = vmatpush.bf16.msra.mxu1 %v5393_v62 }
 0x256   : > { %1877 = vmatmul.bf16.gmra.mxu1 %v1764_v4  ;;  %v1193_v4 = vpack.c.b16 %v1177_v26, %v1175_v24  ;;  %v6291_v40 = vpack.c.b16 %v1154_v61, %v1152_v45  ;;  %v1634_v24 = vld [vmem:[#allocation2 + $0x90] sm:$0xee]  ;;  %v1750_v61 = vunpack.c.l.b16 %v1693_v15 }
 0x257   : > { %v4733_v29 = vrot.slane %v1634_v24, 9 }
 0x259   : > { %4791 = vmatmul.msk.bf16.gmra.mxu3 %vm1257_vm2, %v1767_v47  ;;  %v5389_v47 = vld [vmem:[%s7107_s3 + $0x110] sm:$0xff]  ;;  %2652 = vmatpush.bf16.msra.mxu1 %v5392_v20  ;;  %v1700_v37 = vsel %vm6207_vm14, %v4733_v29, %v1699_v46 }
 0x25a   : > { %2163 = vmatpush.bf16.msra.mxu0 %v5389_v47  ;;  %v1755_v41 = vunpack.c.h.b16 %v1700_v37 }
 0x25e   : > { %2164 = vmatpush.bf16.msra.mxu0 %v5388_v43  ;;  %v1757_v43 = vunpack.c.h.b16 %v1703_v19 }
 0x262   : > { %2165 = vmatpush.bf16.msra.mxu0 %v5387_v32  ;;  %v5391_v32 = vld [vmem:[%s7107_s3 + $0x120] sm:$0xff] }
 0x263   : > { %2653 = vmatpush.bf16.msra.mxu1 %v5391_v32 }
 0x264   : > { %1320 = vmatmul.bf16.gmra.mxu0 %v1191_v18  ;;  %v1696_v18 = vsel %vm6207_vm14, %v1694_v5, %v1695_v63  ;;  %v1775_v63 = vpack.c.b16 %v1757_v43, %v1755_v41 }
 0x265   : > { %1568 = vmatmul.bf16.gmra.mxu2 %v4670_v3  ;;  %v1770_v3 = vpack.c.b16 %v1748_v11, %v1746_v58  ;;  %v1753_v55 = vunpack.c.h.b16 %v1696_v18  ;;  %v1706_v58 = vrot.slane %v6158_v6, 5  ;;  %v5382_v11 = vld [vmem:[%s7107_s3 + $0xd8] sm:$0xff]  ;;  %v5408_v6 = vld [vmem:[%s7107_s3 + $0x1a8] sm:$0xff] }
 0x266   : > { %1882 = vmatmul.bf16.gmra.mxu1 %v1766_v28  ;;  %v1158_v28 = vunpack.c.h.b16 %v6176_v10  ;;  %v5386_v10 = vld [vmem:[%s7107_s3 + $0xf8] sm:$0xff] }
 0x267   : > { %2166 = vmatpush.bf16.msra.mxu0 %v5386_v10  ;;  %v4639_v10 = vld [vmem:[#allocation2 + $0x38] sm:$0xf0] }
 0x268   : > { %v6329_v21 = vpack.c.b16 %v1158_v28, %v7111_v59  ;;  %v4734_v28 = vrot.slane %v1635_v27, 9  ;;  %v5366_v27 = vld [vmem:[#allocation2 + $0x1c] sm:$0xf] }
 0x269   : > { %4792 = vmatmul.msk.bf16.gmra.mxu3 %vm1257_vm2, %v1769_v8  ;;  %v1751_v8 = vunpack.c.h.b16 %v1693_v15  ;;  %v1709_v15 = vrot.slane %v6187_v30, 5  ;;  %v5327_v30 = vld [vmem:[#allocation2 + $0x34] sm:$0xf] }
 0x26a   : > { %v1707_v20 = vsel %vm6207_vm14, %v4734_v28, %v1706_v58  ;;  %v4642_v33 = vor.u32 %v5327_v30, %v4639_v10 }
 0x26b   : > { %v1773_v56 = vpack.c.b16 %v1753_v55, %v1751_v8  ;;  %2167 = vmatpush.bf16.msra.mxu0 %v5385_v34  ;;  %v1754_v55 = vunpack.c.l.b16 %v1700_v37  ;;  %v1759_v34 = vunpack.c.h.b16 %v1707_v20 }
 0x26c   : > { %v6269_v22 = vpop.f32.mrf.mxu3 }
 0x26f   : > { %2168 = vmatpush.bf16.msra.mxu0 %v5384_v52 }
 0x273   : > { %v6279_v38 = vpop.f32.mrf.mxu1  ;;  %2169 = vmatpush.bf16.msra.mxu0 %v5383_v51 }
 0x274   : > { %v6284_v49 = vpop.f32.mrf.mxu3  ;;  %1325 = vmatmul.bf16.gmra.mxu0 %v1193_v4  ;;  %v1752_v4 = vunpack.c.l.b16 %v1696_v18 }
 0x275   : > { %1573 = vmatmul.bf16.gmra.mxu2 %v4678_v12  ;;  %v4631_v12 = vld [vmem:[#allocation2 + $0x20] sm:$0xf0] }
 0x276   : > { %1887 = vmatmul.bf16.gmra.mxu1 %v1768_v35  ;;  %v5325_v35 = vld [vmem:[#allocation2 + $0x1c] sm:$0xf]  ;;  %v1772_v47 = vpack.c.b16 %v1752_v4, %v1750_v61  ;;  %v6399_v4 = vld [vmem:[#allocation2 + $0x28] sm:$0x11] }
 0x277   : > { %v4634_v62 = vor.u32 %v5325_v35, %v4631_v12  ;;  %2170 = vmatpush.bf16.msra.mxu0 %v5382_v11  ;;  %v5407_v35 = vld [vmem:[%s7107_s3 + $0x1a0] sm:$0xff] }
 0x278   : > { %v5367_v11 = vld [vmem:[#allocation2 + $0x1c] sm:$0xf0] }
 0x279   : > { %4793 = vmatmul.msk.bf16.gmra.mxu3 %vm1257_vm2, %v1771_v23 }
 0x27b   : > { %v6298_v57 = vpop.f32.mrf.mxu1 }
 0x27c   : > { %v6304_v1 = vpop.f32.mrf.mxu3 }
 0x281   : > { %v6312_v7 = vpop.f32.mrf.mxu0 }
 0x283   : > { %v6314_v0 = vpop.f32.mrf.mxu1 }
 0x284   : > { %v6316_v48 = vpop.f32.mrf.mxu3  ;;  %4611 = vmatmul.msk.bf16.vlgmr.msrb.gmra.mxu0 %vm1257_vm2, %v6261_v13 }
 0x285   : > { %4719 = vmatmul.msk.bf16.vlgmr.msrb.gmra.mxu2 %vm1257_vm2, %v4626_v54  ;;  %v5433_v54 = vld [vmem:[%s7107_s3 + $0x1f0] sm:$0xff]  ;;  %3001 = vmatpush.bf16.msrb.mxu0 %v5407_v35 }
 0x286   : > { %1892 = vmatmul.bf16.gmra.mxu1 %v1770_v3  ;;  %v1708_v3 = vrot.slane %v1706_v58, 4  ;;  %3057 = vmatpush.bf16.msrb.mxu2 %v5408_v6  ;;  %v4817_v58 = vld [vmem:[#allocation2 + $0x18] sm:$0xf] }
 0x287   : > { %3357 = vmatpush.bf16.msrb.mxu3 %v5433_v54  ;;  %v4818_v6 = vor.u32 %v5367_v11, %v4817_v58  ;;  %v5368_v11 = vld [vmem:[#allocation2 + $0x34] sm:$0xf] }
 0x288   : > { %v6332_v13 = vpop.f32.mrf.mxu2  ;;  %v1710_v46 = vsel %vm6207_vm14, %v1708_v3, %v1709_v15  ;;  %v4819_v15 = vld [vmem:[#allocation2 + $0x20] sm:$0xf0] }
 0x289   : > { %4794 = vmatmul.msk.bf16.gmra.mxu3 %vm1257_vm2, %v1773_v56  ;;  %v6335_v26 = vpop.f32.mrf.mxu0  ;;  %v1756_v56 = vunpack.c.l.b16 %v1703_v19  ;;  %v1761_v52 = vunpack.c.h.b16 %v1710_v46  ;;  %v5432_v19 = vld [vmem:[%s7107_s3 + $0x1e8] sm:$0xff]  ;;  %v1760_v32 = vunpack.c.l.b16 %v1710_v46  ;;  %v6430_v46 = vld [vmem:[#allocation2 + $0x40] sm:$0x11] }
 0x28a   : > { %3301 = vmatpush.bf16.msrb.mxu1 %v5432_v19  ;;  %7144 = vst [vmem:[#allocation8_spill] sm:$0xff] %v6430_v46 }
 0x28b   : > { %v6337_v50 = vpop.f32.mrf.mxu1  ;;  %v1774_v29 = vpack.c.b16 %v1756_v56, %v1754_v55  ;;  %v1777_v37 = vpack.c.b16 %v1761_v52, %v1759_v34  ;;  %v4822_v56 = vor.u32 %v5366_v27, %v4819_v15  ;;  %v5431_v34 = vld [vmem:[%s7107_s3 + $0x1e0] sm:$0xff]  ;;  %v4827_v27 = vld [vmem:[#allocation2 + $0x38] sm:$0xf0]  ;;  %v4825_v15 = vld [vmem:[#allocation2 + $0x30] sm:$0xf] }
 0x28c   : > { %v6343_v44 = vpop.f32.mrf.mxu3 }
 0x28e   : > { %3302 = vmatpush.bf16.msrb.mxu1 %v5431_v34 }
 0x290   : > { %v6352_v14 = vpop.f32.mrf.mxu2 }
 0x291   : > { %v6354_v23 = vpop.f32.mrf.mxu0 }
 0x293   : > { %v6356_v25 = vpop.f32.mrf.mxu1 }
 0x294   : > { %v6361_v5 = vpop.f32.mrf.mxu3  ;;  %4612 = vmatmul.msk.bf16.gmra.mxu0 %vm1257_vm2, %v6291_v40 }
 0x295   : > { %4720 = vmatmul.msk.bf16.gmra.mxu2 %vm1257_vm2, %v4634_v62 }
 0x296   : > { %1897 = vmatmul.bf16.gmra.mxu1 %v1772_v47  ;;  %v2321_v47 = vshll.u32 %v6399_v4, 16 }
 0x298   : > { %v6373_v2 = vpop.f32.mrf.mxu2 }
 0x299   : > { %4795 = vmatmul.msk.bf16.gmra.mxu3 %vm1257_vm2, %v1775_v63  ;;  %v6376_v40 = vpop.f32.mrf.mxu0  ;;  %v1758_v63 = vunpack.c.l.b16 %v1707_v20 }
 0x29b   : > { %v6379_v18 = vpop.f32.mrf.mxu1  ;;  %v1776_v54 = vpack.c.b16 %v1760_v32, %v1758_v63  ;;  %v6450_v63 = vld [vmem:[#allocation2 + $0x50] sm:$0xff] }
 0x29c   : > { %v6387_v8 = vpop.f32.mrf.mxu3  ;;  %7146 = vst [vmem:[#allocation10_spill] sm:$0xff] %v6450_v63 }
 0x2a0   : > { %v6393_v24 = vpop.f32.mrf.mxu2 }
 0x2a1   : > { %v6395_v31 = vpop.f32.mrf.mxu0 }
 0x2a3   : > { %v6397_v61 = vpop.f32.mrf.mxu1 }
 0x2a4   : > { %v6404_v12 = vpop.f32.mrf.mxu3  ;;  %4613 = vmatmul.msk.bf16.gmra.mxu0 %vm1257_vm2, %v6329_v21  ;;  %v2323_v21 = vrot.slane %v2321_v47, 5 }
 0x2a5   : > { %7140 = vst [vmem:[#allocation4_spill] sm:$0xff] %v6404_v12  ;;  %4721 = vmatmul.msk.bf16.gmra.mxu2 %vm1257_vm2, %v4642_v33  ;;  %v6526_v12 = vld [vmem:[#allocation2 + $0x88] sm:$0x11] }
 0x2a6   : > { %1902 = vmatmul.bf16.gmra.mxu1 %v1774_v29  ;;  %v2324_v28 = vsel %vm5997_vm11, %v6105_v39, %v2323_v21  ;;  %v5406_v29 = vld [vmem:[%s7107_s3 + $0x198] sm:$0xff]  ;;  %7154 = vst [vmem:[#allocation16_spill] sm:$0xff] %v6526_v12 }
 0x2a7   : > { %v2515_v30 = vunpack.c.h.b16 %v2324_v28  ;;  %3002 = vmatpush.bf16.msrb.mxu0 %v5406_v29  ;;  %v2514_v58 = vunpack.c.l.b16 %v2324_v28 }
 0x2a8   : > { %v6413_v62 = vpop.f32.mrf.mxu2 }
 0x2a9   : > { %4796 = vmatmul.msk.bf16.gmra.mxu3 %vm1257_vm2, %v1777_v37  ;;  %v6416_v41 = vpop.f32.mrf.mxu0  ;;  %v2545_v39 = vpack.c.b16 %v2515_v30, %v1152_v45  ;;  %v2283_v45 = vld [vmem:[#allocation2 + $0x48] sm:$0xff]  ;;  %v2359_v30 = vshll.u32 %v6450_v63, 16  ;;  %v2544_v29 = vpack.c.b16 %v2514_v58, %v1151_v36 }
 0x2aa   : > { %7141 = vst [vmem:[#allocation5_spill] sm:$0xff] %v6416_v41 }
 0x2ab   : > { %v6418_v43 = vpop.f32.mrf.mxu1  ;;  %3003 = vmatpush.bf16.msrb.mxu0 %v5405_v60 }
 0x2ac   : > { %v6420_v51 = vpop.f32.mrf.mxu3 }
 0x2ad   : > { %7142 = vst [vmem:[#allocation6_spill] sm:$0xff] %v6420_v51 }
 0x2b0   : > { %v6425_v3 = vpop.f32.mrf.mxu2 }
 0x2b1   : > { %7143 = vst [vmem:[#allocation7_spill] sm:$0xff] %v6425_v3  ;;  %v1306_v55 = vpop.f32.mrf.mxu0 }
 0x2b2   : > { %v1356_v20 = vadd.f32 %v6279_v38, %v1306_v55  ;;  %v2345_v38 = vshll.u32 %v6430_v46, 16  ;;  %v2353_v55 = vshll.u32 %v2283_v45, 16 }
 0x2b3   : > { %v6427_v10 = vpop.f32.mrf.mxu1 }
 0x2b4   : > { %v6435_v33 = vpop.f32.mrf.mxu3  ;;  %2171 = vmatmul.bf16.vlgmr.msra.gmra.mxu0 %v4818_v6  ;;  %v2347_v21 = vrot.slane %v2345_v38, 5  ;;  %v5369_v6 = vld [vmem:[#allocation2 + $0x34] sm:$0xf0] }
 0x2b5   : > { %7145 = vst [vmem:[#allocation9_spill] sm:$0xff] %v6435_v33  ;;  %4915 = vmatmul.msk.bf16.vlgmr.msra.gmra.mxu2 %vm1257_vm2, %v4822_v56  ;;  %v4826_v28 = vor.u32 %v5369_v6, %v4825_v15 }
 0x2b6   : > { %1907 = vmatmul.bf16.gmra.mxu1 %v1776_v54  ;;  %v2350_v54 = vshrl.u32 %v2283_v45, 16  ;;  %v2348_v56 = vsel %vm5997_vm11, %v6153_v53, %v2347_v21  ;;  %v2355_v45 = vrot.slane %v2353_v55, 5  ;;  %v2361_v53 = vrot.slane %v2359_v30, 5 }
 0x2b8   : > { %v1554_v52 = vpop.f32.mrf.mxu2 }
 0x2b9   : > { %v6444_v35 = vadd.f32 %v1554_v52, %v1356_v20  ;;  %4977 = vmatmul.msk.bf16.vlgmr.msra.gmra.mxu3 %vm1257_vm2, %v2545_v39  ;;  %v1308_v37 = vpop.f32.mrf.mxu0  ;;  %v4830_v39 = vor.u32 %v5368_v11, %v4827_v27  ;;  %v2519_v52 = vunpack.c.h.b16 %v2348_v56 }
 0x2ba   : > { %v1358_v47 = vadd.f32 %v6298_v57, %v1308_v37  ;;  %v2363_v57 = vshrl.u32 %v6450_v63, 16  ;;  %v2352_v37 = vrot.slane %v2350_v54, 4  ;;  %v6464_v63 = vld [vmem:[#allocation2 + $0x58] sm:$0x11] }
 0x2bb   : > { %v6447_v19 = vpop.f32.mrf.mxu1  ;;  %7147 = vst [vmem:[#allocation11_spill] sm:$0xff] %v6464_v63 }
 0x2bc   : > { %v1922_v32 = vpop.f32.mrf.mxu3  ;;  %v2365_v21 = vrot.slane %v2363_v57, 4  ;;  %v2356_v11 = vor.u32 %v2355_v45, %v2352_v37  ;;  %v5370_v37 = vld [vmem:[#allocation2 + $0x4c] sm:$0xf]  ;;  %v4835_v45 = vld [vmem:[#allocation2 + $0x50] sm:$0xf0] }
 0x2be   : > { %v2357_v54 = vrot.slane %v2356_v11, 4 }
 0x2c0   : > { %v1556_v20 = vpop.f32.mrf.mxu2  ;;  %v2362_v60 = vsel %vm5997_vm11, %v2357_v54, %v2361_v53 }
 0x2c1   : > { %v6459_v34 = vadd.f32 %v1556_v20, %v1358_v47  ;;  %v1311_v38 = vpop.f32.mrf.mxu0  ;;  %v7148_v47 = vunpack.c.h.b16 %v6171_v9 }
 0x2c2   : > { %v1361_v59 = vadd.f32 %v6314_v0, %v1311_v38  ;;  %v2366_v0 = vor.u32 %v2365_v21, %v2361_v53  ;;  %v5371_v21 = vld [vmem:[#allocation2 + $0x4c] sm:$0xf0] }
 0x2c3   : > { %v1873_v17 = vpop.f32.mrf.mxu1  ;;  %v2547_v58 = vpack.c.b16 %v2519_v52, %v7148_v47  ;;  %v2518_v52 = vunpack.c.l.b16 %v2348_v56 }
 0x2c4   : > { %v6462_v33 = vadd.f32 %v1922_v32, %v1873_v17  ;;  %v1924_v36 = vpop.f32.mrf.mxu3  ;;  %2176 = vmatmul.bf16.gmra.mxu0 %v4826_v28  ;;  %v5430_v17 = vld [vmem:[%s7107_s3 + $0x1d8] sm:$0xff]  ;;  %v2369_v32 = vshll.u32 %v6464_v63, 16  ;;  %v2367_v57 = vrot.slane %v2366_v0, 4  ;;  %v6482_v28 = vld [vmem:[#allocation2 + $0x68] sm:$0xff]  ;;  %v7150_v0 = vunpack.c.l.b16 %v6171_v9 }
 0x2c5   : > { %4916 = vmatmul.msk.bf16.gmra.mxu2 %vm1257_vm2, %v4830_v39  ;;  %3303 = vmatpush.bf16.msrb.mxu1 %v5430_v17  ;;  %7149 = vst [vmem:[#allocation12_spill] sm:$0xff] %v6482_v28  ;;  %v2383_v11 = vshll.u32 %v6482_v28, 16 }
 0x2c6   : > { %2654 = vmatmul.bf16.vlgmr.msra.gmra.mxu1 %v2544_v29  ;;  %v2371_v20 = vrot.slane %v2369_v32, 5  ;;  %v2286_v29 = vld [vmem:[#allocation2 + $0x60] sm:$0xff]  ;;  %v2546_v56 = vpack.c.b16 %v2518_v52, %v7150_v0  ;;  %v4838_v32 = vor.u32 %v5370_v37, %v4835_v45  ;;  %v5404_v37 = vld [vmem:[%s7107_s3 + $0x188] sm:$0xff] }
 0x2c7   : > { %v2374_v47 = vshrl.u32 %v2286_v29, 16  ;;  %3004 = vmatpush.bf16.msrb.mxu0 %v5404_v37 }
 0x2c8   : > { %v1559_v27 = vpop.f32.mrf.mxu2 }
 0x2c9   : > { %v6476_v15 = vadd.f32 %v1559_v27, %v1361_v59  ;;  %4978 = vmatmul.msk.bf16.gmra.mxu3 %vm1257_vm2, %v2547_v58  ;;  %v1313_v6 = vpop.f32.mrf.mxu0  ;;  %v4833_v59 = vld [vmem:[#allocation2 + $0x48] sm:$0xf]  ;;  %v2377_v58 = vshll.u32 %v2286_v29, 16  ;;  %v2376_v54 = vrot.slane %v2374_v47, 4 }
 0x2ca   : > { %v1363_v30 = vadd.f32 %v6337_v50, %v1313_v6  ;;  %v2372_v50 = vsel %vm5997_vm11, %v2367_v57, %v2371_v20  ;;  %v4834_v27 = vor.u32 %v5371_v21, %v4833_v59  ;;  %v2521_v6 = vunpack.c.h.b16 %v2362_v60 }
 0x2cb   : > { %v1875_v55 = vpop.f32.mrf.mxu1  ;;  %v2523_v53 = vunpack.c.h.b16 %v2372_v50  ;;  %v2379_v29 = vrot.slane %v2377_v58, 5  ;;  %v2385_v20 = vrot.slane %v2383_v11, 5 }
 0x2cc   : > { %v6480_v39 = vadd.f32 %v1924_v36, %v1875_v55  ;;  %v1927_v38 = vpop.f32.mrf.mxu3  ;;  %v2387_v36 = vshrl.u32 %v6482_v28, 16  ;;  %v6497_v28 = vld [vmem:[#allocation2 + $0x70] sm:$0x11] }
 0x2cd   : > { %7151 = vst [vmem:[#allocation13_spill] sm:$0xff] %v6497_v28  ;;  %v2380_v52 = vor.u32 %v2379_v29, %v2376_v54  ;;  %v4841_v54 = vld [vmem:[#allocation2 + $0x60] sm:$0xf]  ;;  %v5373_v29 = vld [vmem:[#allocation2 + $0x64] sm:$0xf0] }
 0x2ce   : > { %v2389_v51 = vrot.slane %v2387_v36, 4 }
 0x2cf   : > { %v2381_v21 = vrot.slane %v2380_v52, 4 }
 0x2d0   : > { %v1561_v17 = vpop.f32.mrf.mxu2 }
 0x2d1   : > { %v6492_v55 = vadd.f32 %v1561_v17, %v1363_v30  ;;  %v1316_v63 = vpop.f32.mrf.mxu0  ;;  %v2549_v30 = vpack.c.b16 %v2523_v53, %v2521_v6  ;;  %v2289_v17 = vld [vmem:[#allocation2 + $0x78] sm:$0xff]  ;;  %v5372_v6 = vld [vmem:[#allocation2 + $0x64] sm:$0xf]  ;;  %v4843_v53 = vld [vmem:[#allocation2 + $0x68] sm:$0xf0] }
 0x2d2   : > { %v1366_v57 = vadd.f32 %v6356_v25, %v1316_v63  ;;  %v5429_v25 = vld [vmem:[%s7107_s3 + $0x1d0] sm:$0xff]  ;;  %v2390_v63 = vor.u32 %v2389_v51, %v2385_v20  ;;  %v6513_v51 = vld [vmem:[#allocation2 + $0x80] sm:$0xff]  ;;  %v2401_v52 = vshll.u32 %v2289_v17, 16 }
 0x2d3   : > { %v1878_v46 = vpop.f32.mrf.mxu1  ;;  %3304 = vmatpush.bf16.msrb.mxu1 %v5429_v25  ;;  %7152 = vst [vmem:[#allocation14_spill] sm:$0xff] %v6513_v51  ;;  %v2411_v37 = vshrl.u32 %v6513_v51, 16 }
 0x2d4   : > { %v6495_v3 = vadd.f32 %v1927_v38, %v1878_v46  ;;  %v1929_v9 = vpop.f32.mrf.mxu3  ;;  %2181 = vmatmul.bf16.gmra.mxu0 %v4834_v27  ;;  %v2393_v46 = vshll.u32 %v6497_v28, 16  ;;  %v2391_v11 = vrot.slane %v2390_v63, 4  ;;  %v2522_v27 = vunpack.c.l.b16 %v2372_v50 }
 0x2d5   : > { %4917 = vmatmul.msk.bf16.gmra.mxu2 %vm1257_vm2, %v4838_v32  ;;  %v2520_v32 = vunpack.c.l.b16 %v2362_v60  ;;  %v4846_v60 = vor.u32 %v5372_v6, %v4843_v53  ;;  %v4842_v50 = vor.u32 %v5373_v29, %v4841_v54  ;;  %v2403_v41 = vrot.slane %v2401_v52, 5  ;;  %v6539_v52 = vld [vmem:[#allocation2 + $0x98] sm:$0xff] }
 0x2d6   : > { %2659 = vmatmul.bf16.gmra.mxu1 %v2546_v56  ;;  %v2395_v36 = vrot.slane %v2393_v46, 5  ;;  %7155 = vst [vmem:[#allocation17_spill] sm:$0xff] %v6539_v52 }
 0x2d7   : > { %v2548_v63 = vpack.c.b16 %v2522_v27, %v2520_v32  ;;  %v5403_v32 = vld [vmem:[%s7107_s3 + $0x180] sm:$0xff] }
 0x2d8   : > { %v1564_v38 = vpop.f32.mrf.mxu2  ;;  %3005 = vmatpush.bf16.msrb.mxu0 %v5403_v32  ;;  %v5374_v32 = vld [vmem:[#allocation2 + $0x7c] sm:$0xf] }
 0x2d9   : > { %v6507_v45 = vadd.f32 %v1564_v38, %v1366_v57  ;;  %4979 = vmatmul.msk.bf16.gmra.mxu3 %vm1257_vm2, %v2549_v30  ;;  %v1318_v59 = vpop.f32.mrf.mxu0  ;;  %v2386_v57 = vsel %vm5997_vm11, %v2381_v21, %v2385_v20  ;;  %v2398_v30 = vshrl.u32 %v2289_v17, 16 }
 0x2da   : > { %v1368_v58 = vadd.f32 %v6379_v18, %v1318_v59  ;;  %v2396_v18 = vsel %vm5997_vm11, %v2391_v11, %v2395_v36  ;;  %v2525_v59 = vunpack.c.h.b16 %v2386_v57  ;;  %v2413_v36 = vrot.slane %v2411_v37, 4 }
 0x2db   : > { %v1880_v47 = vpop.f32.mrf.mxu1  ;;  %v2400_v28 = vrot.slane %v2398_v30, 4  ;;  %v2292_v30 = vld [vmem:[#allocation2 + $0x90] sm:$0xff] }
 0x2dc   : > { %v6511_v0 = vadd.f32 %v1929_v9, %v1880_v47  ;;  %v1932_v56 = vpop.f32.mrf.mxu3  ;;  %v2407_v9 = vshll.u32 %v6513_v51, 16  ;;  %v2527_v47 = vunpack.c.h.b16 %v2396_v18 }
 0x2dd   : > { %v2404_v27 = vor.u32 %v2403_v41, %v2400_v28 }
 0x2de   : > { %v2409_v11 = vrot.slane %v2407_v9, 5 }
 0x2e0   : > { %v1566_v25 = vpop.f32.mrf.mxu2  ;;  %v2414_v6 = vor.u32 %v2413_v36, %v2409_v11  ;;  %v2431_v36 = vshll.u32 %v6539_v52, 16 }
 0x2e1   : > { %v6521_v46 = vadd.f32 %v1566_v25, %v1368_v58  ;;  %v1321_v38 = vpop.f32.mrf.mxu0  ;;  %v2551_v58 = vpack.c.b16 %v2527_v47, %v2525_v59  ;;  %v2405_v25 = vrot.slane %v2404_v27, 4  ;;  %v5375_v47 = vld [vmem:[#allocation2 + $0x7c] sm:$0xf0] }
 0x2e2   : > { %v1371_v21 = vadd.f32 %v6397_v61, %v1321_v38  ;;  %v5428_v61 = vld [vmem:[%s7107_s3 + $0x1c8] sm:$0xff]  ;;  %v4849_v38 = vld [vmem:[#allocation2 + $0x78] sm:$0xf] }
 0x2e3   : > { %v1883_v20 = vpop.f32.mrf.mxu1  ;;  %3305 = vmatpush.bf16.msrb.mxu1 %v5428_v61  ;;  %v4851_v61 = vld [vmem:[#allocation2 + $0x80] sm:$0xf0] }
 0x2e4   : > { %v6524_v17 = vadd.f32 %v1932_v56, %v1883_v20  ;;  %v1934_v51 = vpop.f32.mrf.mxu3  ;;  %2186 = vmatmul.bf16.gmra.mxu0 %v4842_v50  ;;  %v2417_v56 = vshll.u32 %v6526_v12, 16  ;;  %v2526_v50 = vunpack.c.l.b16 %v2396_v18  ;;  %v2422_v20 = vshrl.u32 %v2292_v30, 16 }
 0x2e5   : > { %4918 = vmatmul.msk.bf16.gmra.mxu2 %vm1257_vm2, %v4846_v60  ;;  %v2524_v60 = vunpack.c.l.b16 %v2386_v57  ;;  %v4850_v57 = vor.u32 %v5375_v47, %v4849_v38  ;;  %v4854_v12 = vor.u32 %v5374_v32, %v4851_v61  ;;  %v1606_v32 = vadd.f32 %v6284_v49, %v6459_v34 }
 0x2e6   : > { %7153 = vst [vmem:[#allocation15_spill] sm:$0xff] %v6524_v17  ;;  %2664 = vmatmul.bf16.gmra.mxu1 %v2548_v63  ;;  %v2415_v63 = vrot.slane %v2414_v6, 4  ;;  %v2419_v41 = vrot.slane %v2417_v56, 5  ;;  %v2424_v6 = vrot.slane %v2422_v20, 4  ;;  %v6552_v17 = vld [vmem:[#allocation2 + $0xa0] sm:$0x11] }
 0x2e7   : > { %v2550_v27 = vpack.c.b16 %v2526_v50, %v2524_v60 }
 0x2e8   : > { %v1569_v53 = vpop.f32.mrf.mxu2 }
 0x2e9   : > { %v6536_v54 = vadd.f32 %v1569_v53, %v1371_v21  ;;  %4980 = vmatmul.msk.bf16.gmra.mxu3 %vm1257_vm2, %v2551_v58  ;;  %v1323_v29 = vpop.f32.mrf.mxu0  ;;  %v2425_v21 = vshll.u32 %v2292_v30, 16  ;;  %v2435_v58 = vshrl.u32 %v6539_v52, 16  ;;  %v2433_v53 = vrot.slane %v2431_v36, 5 }
 0x2ea   : > { %v1373_v37 = vadd.f32 %v6418_v43, %v1323_v29  ;;  %v2410_v43 = vsel %vm5997_vm11, %v2405_v25, %v2409_v11  ;;  %v1604_v25 = vadd.f32 %v6269_v22, %v6444_v35 }
 0x2eb   : > { %v1885_v9 = vpop.f32.mrf.mxu1  ;;  %v2427_v56 = vrot.slane %v2425_v21, 5  ;;  %v2437_v29 = vrot.slane %v2435_v58, 4  ;;  %v2529_v52 = vunpack.c.h.b16 %v2410_v43  ;;  %v6571_v58 = vld [vmem:[#allocation2 + $0xb0] sm:$0xff] }
 0x2ec   : > { %v6542_v28 = vadd.f32 %v1934_v51, %v1885_v9  ;;  %v1937_v59 = vpop.f32.mrf.mxu3  ;;  %v2420_v51 = vsel %vm5997_vm11, %v2415_v63, %v2419_v41  ;;  %v2455_v34 = vshll.u32 %v6571_v58, 16 }
 0x2ed   : > { %v2428_v60 = vor.u32 %v2427_v56, %v2424_v6  ;;  %v2438_v50 = vor.u32 %v2437_v29, %v2433_v53  ;;  %v4859_v56 = vld [vmem:[#allocation2 + $0x98] sm:$0xf0]  ;;  %v4857_v29 = vld [vmem:[#allocation2 + $0x90] sm:$0xf] }
 0x2ee   : > { %7156 = vst [vmem:[#allocation18_spill] sm:$0xff] %v6542_v28  ;;  %v2531_v28 = vunpack.c.h.b16 %v2420_v51 }
 0x2ef   : > { %v2429_v35 = vrot.slane %v2428_v60, 4 }
 0x2f0   : > { %v1571_v18 = vpop.f32.mrf.mxu2  ;;  %v2553_v47 = vpack.c.b16 %v2531_v28, %v2529_v52  ;;  %v2295_v52 = vld [vmem:[#allocation2 + $0xa8] sm:$0xff] }
 0x2f1   : > { %v6550_v30 = vadd.f32 %v1571_v18, %v1373_v37  ;;  %v1326_v9 = vpop.f32.mrf.mxu0  ;;  %v2441_v37 = vshll.u32 %v6552_v17, 16  ;;  %v5376_v18 = vld [vmem:[#allocation2 + $0x94] sm:$0xf]  ;;  %v2449_v49 = vshll.u32 %v2295_v52, 16 }
 0x2f2   : > { %v1376_v11 = vadd.f32 %v6427_v10, %v1326_v9  ;;  %v5402_v10 = vld [vmem:[%s7107_s3 + $0x178] sm:$0xff]  ;;  %v6577_v9 = vsel %vm5997_vm11, %v2429_v35, %v2433_v53  ;;  %v2457_v35 = vrot.slane %v2455_v34, 5 }
 0x2f3   : > { %v1888_v16 = vpop.f32.mrf.mxu1  ;;  %3006 = vmatpush.bf16.msrb.mxu0 %v5402_v10  ;;  %v2443_v20 = vrot.slane %v2441_v37, 5  ;;  %v2533_v53 = vunpack.c.h.b16 %v6577_v9 }
 0x2f4   : > { %v1938_v63 = vadd.f32 %v1937_v59, %v1888_v16  ;;  %v1939_v41 = vpop.f32.mrf.mxu3  ;;  %2191 = vmatmul.bf16.gmra.mxu0 %v4850_v57  ;;  %v5427_v16 = vld [vmem:[%s7107_s3 + $0x1c0] sm:$0xff]  ;;  %v2439_v59 = vrot.slane %v2438_v50, 4  ;;  %v2530_v57 = vunpack.c.l.b16 %v2420_v51 }
 0x2f5   : > { %4919 = vmatmul.msk.bf16.gmra.mxu2 %vm1257_vm2, %v4854_v12  ;;  %3306 = vmatpush.bf16.msrb.mxu1 %v5427_v16 }
 0x2f6   : > { %v6558_v38 = vadd.f32 %v1938_v63, %v1604_v25  ;;  %2669 = vmatmul.bf16.gmra.mxu1 %v2550_v27  ;;  %v2528_v27 = vunpack.c.l.b16 %v2410_v43  ;;  %v5377_v63 = vld [vmem:[#allocation2 + $0x94] sm:$0xf0]  ;;  %v2459_v43 = vshrl.u32 %v6571_v58, 16 }
 0x2f7   : > { %v4858_v50 = vor.u32 %v5377_v63, %v4857_v29  ;;  %v5401_v29 = vld [vmem:[%s7107_s3 + $0x170] sm:$0xff] }
 0x2f8   : > { %v1574_v22 = vpop.f32.mrf.mxu2  ;;  %v2552_v51 = vpack.c.b16 %v2530_v57, %v2528_v27  ;;  %3007 = vmatpush.bf16.msrb.mxu0 %v5401_v29 }
 0x2f9   : > { %v6567_v21 = vadd.f32 %v1574_v22, %v1376_v11  ;;  %4981 = vmatmul.msk.bf16.gmra.mxu3 %vm1257_vm2, %v2553_v47  ;;  %v1328_v12 = vpop.f32.mrf.mxu0  ;;  %v6581_v11 = vsel %vm5997_vm11, %v2439_v59, %v2443_v20  ;;  %v2451_v22 = vrot.slane %v2449_v49, 5  ;;  %v2461_v59 = vrot.slane %v2459_v43, 4 }
 0x2fa   : > { %v1378_v36 = vadd.f32 %v6447_v19, %v1328_v12  ;;  %v2446_v19 = vshrl.u32 %v2295_v52, 16  ;;  %v2535_v37 = vunpack.c.h.b16 %v6581_v11  ;;  %v6591_v12 = vld [vmem:[#allocation2 + $0xb8] sm:$0x11]  ;;  %v1609_v52 = vadd.f32 %v6304_v1, %v6476_v15 }
 0x2fb   : > { %v1890_v28 = vpop.f32.mrf.mxu1  ;;  %v5426_v1 = vld [vmem:[%s7107_s3 + $0x1b8] sm:$0xff] }
 0x2fc   : > { %v1940_v61 = vadd.f32 %v1939_v41, %v1890_v28  ;;  %v1942_v6 = vpop.f32.mrf.mxu3  ;;  %v4862_v41 = vor.u32 %v5376_v18, %v4859_v56  ;;  %v2448_v47 = vrot.slane %v2446_v19, 4  ;;  %v2555_v27 = vpack.c.b16 %v2535_v37, %v2533_v53  ;;  %3307 = vmatpush.bf16.msrb.mxu1 %v5426_v1  ;;  %v6614_v53 = vld [vmem:[#allocation2 + $0xc8] sm:$0xff] }
 0x2fd   : > { %v2462_v18 = vor.u32 %v2461_v59, %v2457_v35  ;;  %v2465_v56 = vshll.u32 %v6591_v12, 16  ;;  %v5378_v59 = vld [vmem:[#allocation2 + $0xac] sm:$0xf] }
 0x2fe   : > { %v6583_v25 = vadd.f32 %v1940_v61, %v1606_v32 }
 0x2ff   : > { %v2463_v49 = vrot.slane %v2462_v18, 4  ;;  %v2467_v34 = vrot.slane %v2465_v56, 5 }
 0x300   : > { %v1576_v60 = vpop.f32.mrf.mxu2 }
 0x301   : > { %v6589_v10 = vadd.f32 %v1576_v60, %v1378_v36  ;;  %v1340_v16 = vpop.f32.mrf.mxu0  ;;  %v2452_v36 = vor.u32 %v2451_v22, %v2448_v47  ;;  %v2532_v47 = vunpack.c.l.b16 %v6577_v9  ;;  %v2479_v9 = vshll.u32 %v6614_v53, 16 }
 0x302   : > { %v1341_v32 = vadd.f32 %v1340_v16, %v6312_v7  ;;  %v2534_v16 = vunpack.c.l.b16 %v6581_v11  ;;  %v2483_v11 = vshrl.u32 %v6614_v53, 16 }
 0x303   : > { %v1893_v20 = vpop.f32.mrf.mxu1  ;;  %v2453_v63 = vrot.slane %v2452_v36, 4 }
 0x304   : > { %v1943_v28 = vadd.f32 %v1942_v6, %v1893_v20  ;;  %v1944_v61 = vpop.f32.mrf.mxu3  ;;  %2196 = vmatmul.bf16.gmra.mxu0 %v4858_v50  ;;  %v1540_v7 = vadd.f32 %v6332_v13, %v1341_v32  ;;  %v2298_v50 = vld [vmem:[#allocation2 + $0xc0] sm:$0xff]  ;;  %v4865_v20 = vld [vmem:[#allocation2 + $0xa8] sm:$0xf] }
 0x305   : > { %4920 = vmatmul.msk.bf16.gmra.mxu2 %vm1257_vm2, %v4862_v41 }
 0x306   : > { %v6596_v57 = vadd.f32 %v1943_v28, %v1609_v52  ;;  %2674 = vmatmul.bf16.gmra.mxu1 %v2552_v51  ;;  %v1611_v51 = vadd.f32 %v6316_v48, %v6492_v55  ;;  %v5379_v52 = vld [vmem:[#allocation2 + $0xac] sm:$0xf0]  ;;  %v6622_v48 = vsel %vm5997_vm11, %v2453_v63, %v2457_v35  ;;  %v2470_v55 = vshrl.u32 %v2298_v50, 16 }
 0x307   : > { %v2473_v28 = vshll.u32 %v2298_v50, 16  ;;  %v4866_v36 = vor.u32 %v5379_v52, %v4865_v20  ;;  %v2537_v29 = vunpack.c.h.b16 %v6622_v48  ;;  %v2485_v63 = vrot.slane %v2483_v11, 4 }
 0x308   : > { %v1588_v15 = vpop.f32.mrf.mxu2 }
 0x309   : > { %v1589_v6 = vadd.f32 %v1588_v15, %v1540_v7  ;;  %4982 = vmatmul.msk.bf16.gmra.mxu3 %vm1257_vm2, %v2555_v27  ;;  %v1342_v19 = vpop.f32.mrf.mxu0  ;;  %v2554_v27 = vpack.c.b16 %v2534_v16, %v2532_v47  ;;  %v2472_v15 = vrot.slane %v2470_v55, 4 }
 0x30a   : > { %v1343_v13 = vadd.f32 %v1342_v19, %v6335_v26  ;;  %v6626_v26 = vsel %vm5997_vm11, %v2463_v49, %v2467_v34  ;;  %v2481_v19 = vrot.slane %v2479_v9, 5  ;;  %v1614_v49 = vadd.f32 %v6343_v44, %v6507_v45  ;;  %v5400_v44 = vld [vmem:[%s7107_s3 + $0x168] sm:$0xff] }
 0x30b   : > { %v1895_v43 = vpop.f32.mrf.mxu1  ;;  %v6611_v60 = vadd.f32 %v6462_v33, %v1589_v6  ;;  %v4867_v33 = vld [vmem:[#allocation2 + $0xb0] sm:$0xf0]  ;;  %v2539_v1 = vunpack.c.h.b16 %v6626_v26  ;;  %v2475_v6 = vrot.slane %v2473_v28, 5  ;;  %3008 = vmatpush.bf16.msrb.mxu0 %v5400_v44  ;;  %v1616_v9 = vadd.f32 %v6361_v5, %v6521_v46  ;;  %v5451_v5 = vld [vmem:[%s7107_s3 + $0x280] sm:$0xff]  ;;  %v4875_v46 = vld [vmem:[#allocation2 + $0xc8] sm:$0xf0] }
 0x30c   : > { %v1945_v41 = vadd.f32 %v1944_v61, %v1895_v43  ;;  %v1947_v37 = vpop.f32.mrf.mxu3  ;;  %v1542_v32 = vadd.f32 %v6352_v14, %v1343_v13  ;;  %v4870_v35 = vor.u32 %v5378_v59, %v4867_v33  ;;  %4195 = vmatpush.bf16.msra.mxu3 %v5451_v5 }
 0x30d   : > { %v2557_v50 = vpack.c.b16 %v2539_v1, %v2537_v29  ;;  %v2476_v45 = vor.u32 %v2475_v6, %v2472_v15  ;;  %v5442_v29 = vld [vmem:[%s7107_s3 + $0x238] sm:$0xff] }
 0x30e   : > { %v6618_v22 = vadd.f32 %v1945_v41, %v1611_v51  ;;  %v6639_v51 = vld [vmem:[#allocation2 + $0xd0] sm:$0x11]  ;;  %3840 = vmatpush.bf16.msra.mxu2 %v5442_v29 }
 0x30f   : > { %v2477_v33 = vrot.slane %v2476_v45, 4 }
 0x310   : > { %v1590_v61 = vpop.f32.mrf.mxu2 }
 0x311   : > { %v1591_v18 = vadd.f32 %v1590_v61, %v1542_v32  ;;  %v1345_v56 = vpop.f32.mrf.mxu0 }
 0x312   : > { %v1346_v43 = vadd.f32 %v1345_v56, %v6354_v23  ;;  %v2486_v23 = vor.u32 %v2485_v63, %v2481_v19 }
 0x313   : > { %v1898_v7 = vpop.f32.mrf.mxu1  ;;  %v6636_v14 = vadd.f32 %v6480_v39, %v1591_v18  ;;  %v5425_v39 = vld [vmem:[%s7107_s3 + $0x1b0] sm:$0xff]  ;;  %v4873_v18 = vld [vmem:[#allocation2 + $0xc0] sm:$0xf] }
 0x314   : > { %v1948_v34 = vadd.f32 %v1947_v37, %v1898_v7  ;;  %v1949_v41 = vpop.f32.mrf.mxu3  ;;  %2201 = vmatmul.bf16.gmra.mxu0 %v4866_v36  ;;  %v2489_v37 = vshll.u32 %v6639_v51, 16  ;;  %v1545_v47 = vadd.f32 %v6373_v2, %v1346_v43  ;;  %3308 = vmatpush.bf16.msrb.mxu1 %v5425_v39  ;;  %v2487_v55 = vrot.slane %v2486_v23, 4  ;;  %v2760_v23 = vld [vmem:[#allocation2 + $0x18] sm:$0xee] }
 0x315   : > { %4921 = vmatmul.msk.bf16.gmra.mxu2 %vm1257_vm2, %v4870_v35  ;;  %v2538_v36 = vunpack.c.l.b16 %v6626_v26  ;;  %v5381_v35 = vld [vmem:[#allocation2 + $0xc4] sm:$0xf0] }
 0x316   : > { %v6641_v13 = vadd.f32 %v1948_v34, %v1614_v49  ;;  %2679 = vmatmul.bf16.gmra.mxu1 %v2554_v27  ;;  %v2491_v28 = vrot.slane %v2489_v37, 5  ;;  %v2536_v27 = vunpack.c.l.b16 %v6622_v48  ;;  %v4874_v15 = vor.u32 %v5381_v35, %v4873_v18  ;;  %v7160_v18 = vld [vmem:[#allocation5_spill] sm:$0xff] }
 0x318   : > { %v1593_v16 = vpop.f32.mrf.mxu2  ;;  %v2492_v48 = vsel %vm5997_vm11, %v2487_v55, %v2491_v28  ;;  %v2556_v7 = vpack.c.b16 %v2538_v36, %v2536_v27  ;;  %v7159_v36 = vld [vmem:[#allocation15_spill] sm:$0xff] }
 0x319   : > { %v1594_v59 = vadd.f32 %v1593_v16, %v1545_v47  ;;  %4983 = vmatmul.msk.bf16.gmra.mxu3 %vm1257_vm2, %v2557_v50  ;;  %v1347_v20 = vpop.f32.mrf.mxu0  ;;  %v2543_v43 = vunpack.c.h.b16 %v2492_v48  ;;  %v5498_v50 = vld [vmem:[#allocation2 + $0x20] sm:$0xff] }
 0x31a   : > { %v1348_v2 = vadd.f32 %v1347_v20, %v6376_v40  ;;  %v2482_v40 = vsel %vm5997_vm11, %v2477_v33, %v2481_v19  ;;  %v2794_v44 = vrot.slane %v5498_v50, 5  ;;  %v1619_v19 = vadd.f32 %v6387_v8, %v6536_v54  ;;  %v5450_v8 = vld [vmem:[%s7107_s3 + $0x278] sm:$0xff] }
 0x31b   : > { %v1900_v52 = vpop.f32.mrf.mxu1  ;;  %v6656_v32 = vadd.f32 %v6495_v3, %v1594_v59  ;;  %v5380_v3 = vld [vmem:[#allocation2 + $0xc4] sm:$0xf]  ;;  %v2541_v34 = vunpack.c.h.b16 %v2482_v40  ;;  %v5441_v59 = vld [vmem:[%s7107_s3 + $0x230] sm:$0xff]  ;;  %4139 = vmatpush.bf16.msra.mxu1 %v5450_v8  ;;  %v2540_v5 = vunpack.c.l.b16 %v2482_v40 }
 0x31c   : > { %v1950_v11 = vadd.f32 %v1949_v41, %v1900_v52  ;;  %v1952_v61 = vpop.f32.mrf.mxu3  ;;  %v1547_v26 = vadd.f32 %v6393_v24, %v1348_v2  ;;  %v4878_v49 = vor.u32 %v5380_v3, %v4875_v46  ;;  %v2796_v54 = vrot.slane %v2794_v44, 4  ;;  %3784 = vmatpush.bf16.msra.mxu0 %v5441_v59  ;;  %v2761_v8 = vld [vmem:[#allocation2 + $0x30] sm:$0xee] }
 0x31d   : > { %v2559_v16 = vpack.c.b16 %v2543_v43, %v2541_v34 }
 0x31e   : > { %v6661_v56 = vadd.f32 %v1950_v11, %v1616_v9 }
 0x320   : > { %v1595_v1 = vpop.f32.mrf.mxu2 }
 0x321   : > { %v1596_v6 = vadd.f32 %v1595_v1, %v1547_v26  ;;  %v1350_v63 = vpop.f32.mrf.mxu0  ;;  %v2542_v1 = vunpack.c.l.b16 %v2492_v48  ;;  %v7163_v48 = vld [vmem:[#allocation18_spill] sm:$0xff] }
 0x322   : > { %v1351_v24 = vadd.f32 %v1350_v63, %v6395_v31  ;;  %v2797_v31 = vrot.slane %v6399_v4, 5 }
 0x323   : > { %v1903_v41 = vpop.f32.mrf.mxu1  ;;  %v6677_v45 = vadd.f32 %v6511_v0, %v1596_v6  ;;  %v4985_v0 = vrot.slane %v2760_v23, 9  ;;  %v7161_v6 = vld [vmem:[#allocation7_spill] sm:$0xff]  ;;  %v2558_v43 = vpack.c.b16 %v2542_v1, %v2540_v5  ;;  %v7162_v23 = vld [vmem:[#allocation6_spill] sm:$0xff] }
 0x324   : > { %v1953_v39 = vadd.f32 %v1952_v61, %v1903_v41  ;;  %v1954_v37 = vpop.f32.mrf.mxu3  ;;  %2206 = vmatmul.bf16.gmra.mxu0 %v4874_v15  ;;  %v1550_v20 = vadd.f32 %v6413_v62, %v1351_v24  ;;  %v2798_v2 = vsel %vm6207_vm14, %v2796_v54, %v2797_v31  ;;  %v7158_v61 = vld [vmem:[#allocation4_spill] sm:$0xff] }
 0x325   : > { %4922 = vmatmul.msk.bf16.gmra.mxu2 %vm1257_vm2, %v4878_v49  ;;  %v2795_v11 = vsel %vm6207_vm14, %v4985_v0, %v2794_v44  ;;  %v1621_v27 = vadd.f32 %v7158_v61, %v6550_v30  ;;  %v2869_v46 = vunpack.c.l.b16 %v2798_v2  ;;  %v2870_v15 = vunpack.c.h.b16 %v2798_v2  ;;  %v5499_v24 = vld [vmem:[#allocation2 + $0x38] sm:$0xff] }
 0x326   : > { %v6680_v47 = vadd.f32 %v1953_v39, %v1619_v19  ;;  %2684 = vmatmul.bf16.gmra.mxu1 %v2556_v7  ;;  %v2867_v3 = vunpack.c.l.b16 %v2795_v11  ;;  %v2868_v7 = vunpack.c.h.b16 %v2795_v11  ;;  %v5409_v19 = vld [vmem:[#allocation2 + $0x34] sm:$0xf]  ;;  %v5077_v39 = vld [vmem:[#allocation2 + $0x38] sm:$0xf0]  ;;  %v2801_v40 = vrot.slane %v5499_v24, 5  ;;  %v7166_v24 = vld [vmem:[#allocation10_spill] sm:$0xff] }
 0x327   : > { %v5080_v31 = vor.u32 %v5409_v19, %v5077_v39  ;;  %v5085_v39 = vld [vmem:[#allocation2 + $0x50] sm:$0xf0] }
 0x328   : > { %v1598_v52 = vpop.f32.mrf.mxu2  ;;  %v2899_v34 = vpack.c.b16 %v2869_v46, %v2867_v3  ;;  %v2900_v50 = vpack.c.b16 %v2870_v15, %v2868_v7 }
 0x329   : > { %v1599_v33 = vadd.f32 %v1598_v52, %v1550_v20  ;;  %4984 = vmatmul.msk.bf16.gmra.mxu3 %vm1257_vm2, %v2559_v16  ;;  %v1352_v55 = vpop.f32.mrf.mxu0  ;;  %v5440_v20 = vld [vmem:[%s7107_s3 + $0x228] sm:$0xff]  ;;  %v4986_v52 = vrot.slane %v2761_v8, 9 }
 0x32a   : > { %v1353_v35 = vadd.f32 %v1352_v55, %v7160_v18  ;;  %v7164_v55 = vld [vmem:[#allocation8_spill] sm:$0xff]  ;;  %3785 = vmatpush.bf16.msra.mxu0 %v5440_v20  ;;  %v7165_v18 = vld [vmem:[#allocation9_spill] sm:$0xff] }
 0x32b   : > { %v1905_v28 = vpop.f32.mrf.mxu1  ;;  %v6699_v62 = vadd.f32 %v7159_v36, %v1599_v33  ;;  %v2803_v33 = vrot.slane %v2801_v40, 4 }
 0x32c   : > { %v1955_v4 = vadd.f32 %v1954_v37, %v1905_v28  ;;  %v1957_v29 = vpop.f32.mrf.mxu3  ;;  %v1552_v63 = vadd.f32 %v7161_v6, %v1353_v35  ;;  %v1624_v37 = vadd.f32 %v7162_v23, %v6567_v21  ;;  %v5449_v21 = vld [vmem:[%s7107_s3 + $0x270] sm:$0xff]  ;;  %v2804_v28 = vrot.slane %v7164_v55, 5 }
 0x32d   : > { %4140 = vmatpush.bf16.msra.mxu1 %v5449_v21  ;;  %v1626_v35 = vadd.f32 %v7165_v18, %v6589_v10  ;;  %v5411_v10 = vld [vmem:[#allocation2 + $0x4c] sm:$0xf] }
 0x32e   : > { %v6702_v26 = vadd.f32 %v1955_v4, %v1621_v27  ;;  %v2802_v4 = vsel %vm6207_vm14, %v4986_v52, %v2801_v40  ;;  %v2805_v36 = vsel %vm6207_vm14, %v2803_v33, %v2804_v28  ;;  %v5088_v8 = vor.u32 %v5411_v10, %v5085_v39  ;;  %v2763_v39 = vld [vmem:[#allocation2 + $0x60] sm:$0xee] }
 0x32f   : > { %v2871_v46 = vunpack.c.l.b16 %v2802_v4  ;;  %v2873_v1 = vunpack.c.l.b16 %v2805_v36  ;;  %v2872_v15 = vunpack.c.h.b16 %v2802_v4  ;;  %v2874_v6 = vunpack.c.h.b16 %v2805_v36 }
 0x330   : > { %v1600_v49 = vpop.f32.mrf.mxu2 }
 0x331   : > { %v1601_v30 = vadd.f32 %v1600_v49, %v1552_v63  ;;  %v2172_v41 = vpop.f32.mrf.mxu0  ;;  %v5075_v63 = vld [vmem:[#allocation2 + $0x30] sm:$0xf]  ;;  %v5410_v49 = vld [vmem:[#allocation2 + $0x34] sm:$0xf0] }
 0x333   : > { %v1908_v44 = vpop.f32.mrf.mxu1  ;;  %v6708_v59 = vadd.f32 %v7163_v48, %v1601_v30  ;;  %v2901_v30 = vpack.c.b16 %v2873_v1, %v2871_v46  ;;  %v5083_v46 = vld [vmem:[#allocation2 + $0x48] sm:$0xf]  ;;  %v5412_v1 = vld [vmem:[#allocation2 + $0x4c] sm:$0xf0] }
 0x334   : > { %v1958_v16 = vadd.f32 %v1957_v29, %v1908_v44  ;;  %v1959_v0 = vpop.f32.mrf.mxu3  ;;  %3009 = vmatmul.bf16.vlgmr.msrb.gmra.mxu0 %v2899_v34  ;;  %v2902_v44 = vpack.c.b16 %v2874_v6, %v2872_v15 }
 0x335   : > { %5047 = vmatmul.msk.bf16.vlgmr.msrb.gmra.mxu2 %vm1257_vm2, %v2900_v50 }
 0x336   : > { %v6710_v54 = vadd.f32 %v1958_v16, %v1624_v37  ;;  %2689 = vmatmul.bf16.gmra.mxu1 %v2558_v43  ;;  %v2762_v37 = vld [vmem:[#allocation2 + $0x48] sm:$0xee] }
 0x337   : > { %v4987_v20 = vrot.slane %v2762_v37, 9  ;;  %v5447_v37 = vld [vmem:[%s7107_s3 + $0x260] sm:$0xff] }
 0x338   : > { %v2221_v11 = vpop.f32.mrf.mxu2 }
 0x339   : > { %v2222_v2 = vadd.f32 %v2221_v11, %v2172_v41  ;;  %5173 = vmatmul.msk.bf16.vlgmr.msrb.gmra.mxu3 %vm1257_vm2, %v5080_v31  ;;  %v2174_v61 = vpop.f32.mrf.mxu0  ;;  %v5076_v41 = vor.u32 %v5410_v49, %v5075_v63  ;;  %v5448_v31 = vld [vmem:[%s7107_s3 + $0x268] sm:$0xff]  ;;  %v5084_v49 = vor.u32 %v5412_v1, %v5083_v46 }
 0x33a   : > { %4141 = vmatpush.bf16.msra.mxu1 %v5448_v31 }
 0x33b   : > { %v1910_v27 = vpop.f32.mrf.mxu1  ;;  %v2261_v5 = vadd.f32 %v2222_v2, %v6611_v60  ;;  %v2808_v60 = vrot.slane %v7166_v24, 5 }
 0x33c   : > { %v1960_v29 = vadd.f32 %v1959_v0, %v1910_v27  ;;  %v2704_v3 = vpop.f32.mrf.mxu3  ;;  %v5439_v0 = vld [vmem:[%s7107_s3 + $0x220] sm:$0xff] }
 0x33d   : > { %v2810_v21 = vrot.slane %v2808_v60, 4  ;;  %3786 = vmatpush.bf16.msra.mxu0 %v5439_v0  ;;  %v2809_v2 = vsel %vm6207_vm14, %v4987_v20, %v2808_v60 }
 0x33e   : > { %v6728_v7 = vadd.f32 %v1960_v29, %v1626_v35  ;;  %v2875_v18 = vunpack.c.l.b16 %v2809_v2  ;;  %4142 = vmatpush.bf16.msra.mxu1 %v5447_v37 }
 0x340   : > { %v2223_v34 = vpop.f32.mrf.mxu2 }
 0x341   : > { %v2224_v43 = vadd.f32 %v2223_v34, %v2174_v61  ;;  %v2177_v50 = vpop.f32.mrf.mxu0 }
 0x343   : > { %v2655_v19 = vpop.f32.mrf.mxu1  ;;  %v2262_v23 = vadd.f32 %v2224_v43, %v6636_v14  ;;  %v7167_v14 = vld [vmem:[#allocation11_spill] sm:$0xff] }
 0x344   : > { %v2705_v40 = vadd.f32 %v2704_v3, %v2655_v19  ;;  %v2706_v16 = vpop.f32.mrf.mxu3  ;;  %3014 = vmatmul.bf16.gmra.mxu0 %v2901_v30  ;;  %v2811_v52 = vrot.slane %v7167_v14, 5 }
 0x345   : > { %5048 = vmatmul.msk.bf16.gmra.mxu2 %vm1257_vm2, %v2902_v44  ;;  %v7168_v44 = vld [vmem:[#allocation12_spill] sm:$0xff] }
 0x346   : > { %v6732_v48 = vadd.f32 %v2705_v40, %v2261_v5  ;;  %3309 = vmatmul.bf16.vlgmr.msrb.gmra.mxu1 %v5076_v41  ;;  %v2812_v61 = vsel %vm6207_vm14, %v2810_v21, %v2811_v52  ;;  %v2876_v5 = vunpack.c.h.b16 %v2809_v2  ;;  %v5413_v41 = vld [vmem:[#allocation2 + $0x64] sm:$0xf] }
 0x347   : > { %v2877_v35 = vunpack.c.l.b16 %v2812_v61  ;;  %v2878_v3 = vunpack.c.h.b16 %v2812_v61 }
 0x348   : > { %v2226_v33 = vpop.f32.mrf.mxu2 }
 0x349   : > { %v2227_v55 = vadd.f32 %v2226_v33, %v2177_v50  ;;  %5174 = vmatmul.msk.bf16.gmra.mxu3 %vm1257_vm2, %v5088_v8  ;;  %v2179_v28 = vpop.f32.mrf.mxu0  ;;  %v2903_v6 = vpack.c.b16 %v2877_v35, %v2875_v18  ;;  %v2904_v30 = vpack.c.b16 %v2878_v3, %v2876_v5  ;;  %v5093_v50 = vld [vmem:[#allocation2 + $0x68] sm:$0xf0]  ;;  %v5091_v18 = vld [vmem:[#allocation2 + $0x60] sm:$0xf]  ;;  %v5414_v35 = vld [vmem:[#allocation2 + $0x64] sm:$0xf0] }
 0x34a   : > { %v5096_v40 = vor.u32 %v5413_v41, %v5093_v50  ;;  %v5092_v1 = vor.u32 %v5414_v35, %v5091_v18  ;;  %v2764_v50 = vld [vmem:[#allocation2 + $0x78] sm:$0xee] }
 0x34b   : > { %v2657_v11 = vpop.f32.mrf.mxu1  ;;  %v2263_v4 = vadd.f32 %v2227_v55, %v6656_v32  ;;  %v2815_v32 = vrot.slane %v7168_v44, 5 }
 0x34c   : > { %v2707_v27 = vadd.f32 %v2706_v16, %v2657_v11  ;;  %v2709_v36 = vpop.f32.mrf.mxu3  ;;  %v4988_v16 = vrot.slane %v2763_v39, 9  ;;  %v5446_v39 = vld [vmem:[%s7107_s3 + $0x258] sm:$0xff] }
 0x34d   : > { %v2817_v8 = vrot.slane %v2815_v32, 4  ;;  %4143 = vmatpush.bf16.msra.mxu1 %v5446_v39 }
 0x34e   : > { %v6748_v29 = vadd.f32 %v2707_v27, %v2262_v23  ;;  %v5438_v23 = vld [vmem:[%s7107_s3 + $0x218] sm:$0xff]  ;;  %v2816_v52 = vsel %vm6207_vm14, %v4988_v16, %v2815_v32 }
 0x34f   : > { %3787 = vmatpush.bf16.msra.mxu0 %v5438_v23  ;;  %v2879_v2 = vunpack.c.l.b16 %v2816_v52 }
 0x350   : > { %v2228_v15 = vpop.f32.mrf.mxu2 }
 0x351   : > { %v2229_v63 = vadd.f32 %v2228_v15, %v2179_v28  ;;  %v2182_v34 = vpop.f32.mrf.mxu0 }
 0x353   : > { %v2660_v43 = vpop.f32.mrf.mxu1  ;;  %v2264_v10 = vadd.f32 %v2229_v63, %v6677_v45  ;;  %v7169_v45 = vld [vmem:[#allocation13_spill] sm:$0xff] }
 0x354   : > { %v2710_v19 = vadd.f32 %v2709_v36, %v2660_v43  ;;  %v2711_v24 = vpop.f32.mrf.mxu3  ;;  %3019 = vmatmul.bf16.gmra.mxu0 %v2903_v6  ;;  %v2818_v0 = vrot.slane %v7169_v45, 5 }
 0x355   : > { %5049 = vmatmul.msk.bf16.gmra.mxu2 %vm1257_vm2, %v2904_v30  ;;  %v7170_v30 = vld [vmem:[#allocation14_spill] sm:$0xff] }
 0x356   : > { %v6752_v60 = vadd.f32 %v2710_v19, %v2263_v4  ;;  %3314 = vmatmul.bf16.gmra.mxu1 %v5084_v49  ;;  %v2819_v33 = vsel %vm6207_vm14, %v2817_v8, %v2818_v0  ;;  %v2880_v4 = vunpack.c.h.b16 %v2816_v52  ;;  %v5415_v49 = vld [vmem:[#allocation2 + $0x7c] sm:$0xf] }
 0x357   : > { %v2881_v61 = vunpack.c.l.b16 %v2819_v33  ;;  %v2882_v36 = vunpack.c.h.b16 %v2819_v33 }
 0x358   : > { %v2231_v31 = vpop.f32.mrf.mxu2 }
 0x359   : > { %v2232_v20 = vadd.f32 %v2231_v31, %v2182_v34  ;;  %5175 = vmatmul.msk.bf16.gmra.mxu3 %vm1257_vm2, %v5096_v40  ;;  %v2184_v21 = vpop.f32.mrf.mxu0  ;;  %v2905_v3 = vpack.c.b16 %v2881_v61, %v2879_v2  ;;  %v2906_v6 = vpack.c.b16 %v2882_v36, %v2880_v4  ;;  %v5101_v34 = vld [vmem:[#allocation2 + $0x80] sm:$0xf0]  ;;  %v5099_v2 = vld [vmem:[#allocation2 + $0x78] sm:$0xf]  ;;  %v5416_v61 = vld [vmem:[#allocation2 + $0x7c] sm:$0xf0] }
 0x35a   : > { %v5104_v19 = vor.u32 %v5415_v49, %v5101_v34  ;;  %v5100_v35 = vor.u32 %v5416_v61, %v5099_v2  ;;  %v2765_v34 = vld [vmem:[#allocation2 + $0x90] sm:$0xee] }
 0x35b   : > { %v2662_v14 = vpop.f32.mrf.mxu1  ;;  %v2265_v28 = vadd.f32 %v2232_v20, %v6699_v62  ;;  %v2822_v62 = vrot.slane %v7170_v30, 5 }
 0x35c   : > { %v2712_v55 = vadd.f32 %v2711_v24, %v2662_v14  ;;  %v2714_v11 = vpop.f32.mrf.mxu3  ;;  %v4989_v24 = vrot.slane %v2764_v50, 9  ;;  %v5445_v50 = vld [vmem:[%s7107_s3 + $0x250] sm:$0xff] }
 0x35d   : > { %v2824_v40 = vrot.slane %v2822_v62, 4  ;;  %4144 = vmatpush.bf16.msra.mxu1 %v5445_v50 }
 0x35e   : > { %v6768_v27 = vadd.f32 %v2712_v55, %v2264_v10  ;;  %v5437_v10 = vld [vmem:[%s7107_s3 + $0x210] sm:$0xff]  ;;  %v2823_v0 = vsel %vm6207_vm14, %v4989_v24, %v2822_v62 }
 0x35f   : > { %3788 = vmatpush.bf16.msra.mxu0 %v5437_v10  ;;  %v2883_v52 = vunpack.c.l.b16 %v2823_v0 }
 0x360   : > { %v2233_v5 = vpop.f32.mrf.mxu2 }
 0x361   : > { %v2234_v46 = vadd.f32 %v2233_v5, %v2184_v21  ;;  %v2187_v15 = vpop.f32.mrf.mxu0 }
 0x363   : > { %v2665_v63 = vpop.f32.mrf.mxu1  ;;  %v2266_v41 = vadd.f32 %v2234_v46, %v6708_v59  ;;  %v7171_v59 = vld [vmem:[#allocation16_spill] sm:$0xff] }
 0x364   : > { %v2715_v43 = vadd.f32 %v2714_v11, %v2665_v63  ;;  %v2716_v44 = vpop.f32.mrf.mxu3  ;;  %3024 = vmatmul.bf16.gmra.mxu0 %v2905_v3  ;;  %v2825_v23 = vrot.slane %v7171_v59, 5 }
 0x365   : > { %5050 = vmatmul.msk.bf16.gmra.mxu2 %vm1257_vm2, %v2906_v6  ;;  %v7172_v6 = vld [vmem:[#allocation17_spill] sm:$0xff] }
 0x366   : > { %v6772_v32 = vadd.f32 %v2715_v43, %v2265_v28  ;;  %3319 = vmatmul.bf16.gmra.mxu1 %v5092_v1  ;;  %v2826_v31 = vsel %vm6207_vm14, %v2824_v40, %v2825_v23  ;;  %v2884_v28 = vunpack.c.h.b16 %v2823_v0  ;;  %v5417_v1 = vld [vmem:[#allocation2 + $0x94] sm:$0xf] }
 0x367   : > { %v2885_v33 = vunpack.c.l.b16 %v2826_v31  ;;  %v2886_v11 = vunpack.c.h.b16 %v2826_v31 }
 0x368   : > { %v2236_v37 = vpop.f32.mrf.mxu2 }
 0x369   : > { %v2237_v16 = vadd.f32 %v2236_v37, %v2187_v15  ;;  %5176 = vmatmul.msk.bf16.gmra.mxu3 %vm1257_vm2, %v5104_v19  ;;  %v2189_v8 = vpop.f32.mrf.mxu0  ;;  %v2907_v36 = vpack.c.b16 %v2885_v33, %v2883_v52  ;;  %v2908_v3 = vpack.c.b16 %v2886_v11, %v2884_v28  ;;  %v5109_v15 = vld [vmem:[#allocation2 + $0x98] sm:$0xf0] }
 0x36a   : > { %v5112_v43 = vor.u32 %v5417_v1, %v5109_v15 }
 0x36b   : > { %v2667_v45 = vpop.f32.mrf.mxu1  ;;  %v2267_v21 = vadd.f32 %v2237_v16, %v6558_v38  ;;  %v2829_v38 = vrot.slane %v7172_v6, 5  ;;  %v5435_v6 = vld [vmem:[%s7107_s3 + $0x200] sm:$0xff] }
 0x36c   : > { %v2717_v20 = vadd.f32 %v2716_v44, %v2667_v45  ;;  %v2719_v14 = vpop.f32.mrf.mxu3  ;;  %v4990_v44 = vrot.slane %v2765_v34, 9 }
 0x36d   : > { %v2831_v19 = vrot.slane %v2829_v38, 4 }
 0x36e   : > { %v6788_v55 = vadd.f32 %v2717_v20, %v2266_v41  ;;  %v5436_v41 = vld [vmem:[%s7107_s3 + $0x208] sm:$0xff]  ;;  %v2830_v59 = vsel %vm6207_vm14, %v4990_v44, %v2829_v38 }
 0x36f   : > { %3789 = vmatpush.bf16.msra.mxu0 %v5436_v41  ;;  %v2887_v45 = vunpack.c.l.b16 %v2830_v59  ;;  %v2888_v31 = vunpack.c.h.b16 %v2830_v59  ;;  %v5115_v59 = vld [vmem:[#allocation2 + $0xa8] sm:$0xf] }
 0x370   : > { %v2238_v4 = vpop.f32.mrf.mxu2 }
 0x371   : > { %v2239_v18 = vadd.f32 %v2238_v4, %v2189_v8  ;;  %v2192_v5 = vpop.f32.mrf.mxu0 }
 0x373   : > { %v2670_v46 = vpop.f32.mrf.mxu1  ;;  %v2268_v49 = vadd.f32 %v2239_v18, %v6583_v25  ;;  %v2832_v25 = vrot.slane %v6552_v17, 5  ;;  %v5117_v18 = vld [vmem:[#allocation2 + $0xb0] sm:$0xf0]  ;;  %3790 = vmatpush.bf16.msra.mxu0 %v5435_v6 }
 0x374   : > { %v2720_v63 = vadd.f32 %v2719_v14, %v2670_v46  ;;  %v2721_v30 = vpop.f32.mrf.mxu3  ;;  %3029 = vmatmul.bf16.gmra.mxu0 %v2907_v36  ;;  %v5418_v14 = vld [vmem:[#allocation2 + $0x94] sm:$0xf0]  ;;  %v5419_v36 = vld [vmem:[#allocation2 + $0xac] sm:$0xf] }
 0x375   : > { %5051 = vmatmul.msk.bf16.gmra.mxu2 %vm1257_vm2, %v2908_v3  ;;  %v2833_v23 = vsel %vm6207_vm14, %v2831_v19, %v2832_v25  ;;  %v2766_v3 = vld [vmem:[#allocation2 + $0xa8] sm:$0xee]  ;;  %v5120_v15 = vor.u32 %v5419_v36, %v5117_v18  ;;  %v5434_v36 = vld [vmem:[%s7107_s3 + $0x1f8] sm:$0xff] }
 0x376   : > { %v6792_v62 = vadd.f32 %v2720_v63, %v2267_v21  ;;  %3324 = vmatmul.bf16.gmra.mxu1 %v5100_v35  ;;  %v2889_v17 = vunpack.c.l.b16 %v2833_v23  ;;  %v2890_v20 = vunpack.c.h.b16 %v2833_v23  ;;  %v5107_v21 = vld [vmem:[#allocation2 + $0x90] sm:$0xf]  ;;  %v4991_v38 = vrot.slane %v2766_v3, 9  ;;  %v6841_v18 = vld [vmem:[#allocation2 + $0x38] sm:$0xff] }
 0x377   : > { %v5108_v11 = vor.u32 %v5418_v14, %v5107_v21  ;;  %v5420_v23 = vld [vmem:[#allocation2 + $0xac] sm:$0xf0]  ;;  %v5421_v21 = vld [vmem:[#allocation2 + $0xc4] sm:$0xf]  ;;  %v5125_v14 = vld [vmem:[#allocation2 + $0xc8] sm:$0xf0]  ;;  %3791 = vmatpush.bf16.msra.mxu0 %v5434_v36 }
 0x378   : > { %v2241_v10 = vpop.f32.mrf.mxu2  ;;  %v2909_v33 = vpack.c.b16 %v2889_v17, %v2887_v45  ;;  %v2910_v61 = vpack.c.b16 %v2890_v20, %v2888_v31  ;;  %v5116_v45 = vor.u32 %v5420_v23, %v5115_v59  ;;  %v3453_v6 = vshrl.u32 %v6841_v18, 16  ;;  %v5123_v59 = vld [vmem:[#allocation2 + $0xc0] sm:$0xf]  ;;  %v5422_v23 = vld [vmem:[#allocation2 + $0xc4] sm:$0xf0] }
 0x379   : > { %v2242_v39 = vadd.f32 %v2241_v10, %v2192_v5  ;;  %5177 = vmatmul.msk.bf16.gmra.mxu3 %vm1257_vm2, %v5112_v43  ;;  %v2194_v24 = vpop.f32.mrf.mxu0 }
 0x37b   : > { %v2672_v40 = vpop.f32.mrf.mxu1  ;;  %v2269_v16 = vadd.f32 %v2242_v39, %v6596_v57  ;;  %v2836_v57 = vrot.slane %v6571_v58, 5  ;;  %v5444_v58 = vld [vmem:[%s7107_s3 + $0x248] sm:$0xff] }
 0x37c   : > { %v2722_v37 = vadd.f32 %v2721_v30, %v2672_v40  ;;  %v2724_v8 = vpop.f32.mrf.mxu3  ;;  %4145 = vmatpush.bf16.msra.mxu1 %v5444_v58 }
 0x37d   : > { %v2838_v63 = vrot.slane %v2836_v57, 4  ;;  %v2837_v41 = vsel %vm6207_vm14, %v4991_v38, %v2836_v57 }
 0x37e   : > { %v6808_v0 = vadd.f32 %v2722_v37, %v2268_v49  ;;  %v2891_v10 = vunpack.c.l.b16 %v2837_v41 }
 0x380   : > { %v2243_v52 = vpop.f32.mrf.mxu2 }
 0x381   : > { %v2244_v28 = vadd.f32 %v2243_v52, %v2194_v24  ;;  %v2197_v2 = vpop.f32.mrf.mxu0  ;;  %v2892_v24 = vunpack.c.h.b16 %v2837_v41 }
 0x383   : > { %v2675_v4 = vpop.f32.mrf.mxu1  ;;  %v2270_v5 = vadd.f32 %v2244_v28, %v6618_v22  ;;  %v2839_v22 = vrot.slane %v6591_v12, 5  ;;  %v2767_v28 = vld [vmem:[#allocation2 + $0xc0] sm:$0xee] }
 0x384   : > { %v2725_v35 = vadd.f32 %v2724_v8, %v2675_v4  ;;  %v2726_v46 = vpop.f32.mrf.mxu3  ;;  %3034 = vmatmul.bf16.gmra.mxu0 %v2909_v33  ;;  %v5128_v4 = vor.u32 %v5421_v21, %v5125_v14 }
 0x385   : > { %5052 = vmatmul.msk.bf16.gmra.mxu2 %vm1257_vm2, %v2910_v61  ;;  %v2840_v50 = vsel %vm6207_vm14, %v2838_v63, %v2839_v22 }
 0x386   : > { %v6812_v1 = vadd.f32 %v2725_v35, %v2269_v16  ;;  %3329 = vmatmul.bf16.gmra.mxu1 %v5108_v11  ;;  %v2893_v12 = vunpack.c.l.b16 %v2840_v50  ;;  %v2894_v40 = vunpack.c.h.b16 %v2840_v50  ;;  %v2846_v35 = vrot.slane %v6639_v51, 5 }
 0x388   : > { %v2246_v49 = vpop.f32.mrf.mxu2  ;;  %v2911_v16 = vpack.c.b16 %v2893_v12, %v2891_v10  ;;  %v2912_v31 = vpack.c.b16 %v2894_v40, %v2892_v24  ;;  %v3417_v40 = vld [vmem:[#allocation2 + $0x40] sm:$0x11] }
 0x389   : > { %v2247_v34 = vadd.f32 %v2246_v49, %v2197_v2  ;;  %5178 = vmatmul.msk.bf16.gmra.mxu3 %vm1257_vm2, %v5120_v15  ;;  %v2199_v30 = vpop.f32.mrf.mxu0  ;;  %v3415_v2 = vld [vmem:[#allocation2 + $0x30] sm:$0xff]  ;;  %v3449_v15 = vshll.u32 %v6841_v18, 16 }
 0x38a   : > { %v3440_v3 = vshrl.u32 %v3415_v2, 16 }
 0x38b   : > { %v2677_v43 = vpop.f32.mrf.mxu1  ;;  %v2271_v19 = vadd.f32 %v2247_v34, %v6641_v13  ;;  %v2843_v13 = vrot.slane %v6614_v53, 5  ;;  %v5443_v53 = vld [vmem:[%s7107_s3 + $0x240] sm:$0xff] }
 0x38c   : > { %v2727_v44 = vadd.f32 %v2726_v46, %v2677_v43  ;;  %v2729_v25 = vpop.f32.mrf.mxu3  ;;  %4146 = vmatpush.bf16.msra.mxu1 %v5443_v53  ;;  %v3443_v46 = vshll.u32 %v3415_v2, 16  ;;  %v3442_v50 = vrot.slane %v3440_v3, 4  ;;  %v6859_v3 = vld [vmem:[#allocation2 + $0x50] sm:$0xff] }
 0x38d   : > { %v2845_v57 = vrot.slane %v2843_v13, 4 }
 0x38e   : > { %v6828_v39 = vadd.f32 %v2727_v44, %v2270_v5  ;;  %v3445_v44 = vrot.slane %v3443_v46, 5 }
 0x38f   : > { %v2847_v51 = vsel %vm6207_vm14, %v2845_v57, %v2846_v35  ;;  %v3898_v57 = vld [vmem:[#allocation2 + $0x30] sm:$0xee]  ;;  %v3932_v35 = vrot.slane %v6841_v18, 5  ;;  %v3935_v18 = vrot.slane %v3417_v40, 5 }
 0x390   : > { %v2248_v37 = vpop.f32.mrf.mxu2  ;;  %v2897_v43 = vunpack.c.l.b16 %v2847_v51  ;;  %v2898_v24 = vunpack.c.h.b16 %v2847_v51 }
 0x391   : > { %v2249_v8 = vadd.f32 %v2248_v37, %v2199_v30  ;;  %v2202_v17 = vpop.f32.mrf.mxu0 }
 0x393   : > { %v2680_v20 = vpop.f32.mrf.mxu1  ;;  %v2272_v33 = vadd.f32 %v2249_v8, %v6661_v56  ;;  %v4992_v56 = vrot.slane %v2767_v28, 9  ;;  %v3446_v8 = vor.u32 %v3445_v44, %v3442_v50 }
 0x394   : > { %v2730_v52 = vadd.f32 %v2729_v25, %v2680_v20  ;;  %v2731_v11 = vpop.f32.mrf.mxu3  ;;  %3039 = vmatmul.bf16.gmra.mxu0 %v2911_v16  ;;  %v3455_v25 = vrot.slane %v3453_v6, 4 }
 0x395   : > { %5053 = vmatmul.msk.bf16.gmra.mxu2 %vm1257_vm2, %v2912_v31  ;;  %v2844_v22 = vsel %vm6207_vm14, %v4992_v56, %v2843_v13  ;;  %v5124_v31 = vor.u32 %v5422_v23, %v5123_v59  ;;  %v5423_v13 = vld [vmem:[#allocation2 + $0xdc] sm:$0xf]  ;;  %v3447_v2 = vrot.slane %v3446_v8, 4  ;;  %v5131_v59 = vld [vmem:[#allocation2 + $0xd8] sm:$0xf] }
 0x396   : > { %v6832_v61 = vadd.f32 %v2730_v52, %v2271_v19  ;;  %3334 = vmatmul.bf16.gmra.mxu1 %v5116_v45  ;;  %v2895_v30 = vunpack.c.l.b16 %v2844_v22  ;;  %v3451_v19 = vrot.slane %v3449_v15, 5  ;;  %v2896_v12 = vunpack.c.h.b16 %v2844_v22  ;;  %v5133_v52 = vld [vmem:[#allocation2 + $0xe0] sm:$0xf0]  ;;  %v5424_v23 = vld [vmem:[#allocation2 + $0xdc] sm:$0xf0] }
 0x397   : > { %v5136_v56 = vor.u32 %v5423_v13, %v5133_v52 }
 0x398   : > { %v2251_v5 = vpop.f32.mrf.mxu2  ;;  %v2913_v16 = vpack.c.b16 %v2897_v43, %v2895_v30  ;;  %v3456_v45 = vor.u32 %v3455_v25, %v3451_v19  ;;  %v2914_v21 = vpack.c.b16 %v2898_v24, %v2896_v12  ;;  %v3477_v30 = vshrl.u32 %v6859_v3, 16 }
 0x399   : > { %v2252_v58 = vadd.f32 %v2251_v5, %v2202_v17  ;;  %5179 = vmatmul.msk.bf16.gmra.mxu3 %vm1257_vm2, %v5128_v4  ;;  %v2204_v38 = vpop.f32.mrf.mxu0  ;;  %v3459_v17 = vshll.u32 %v3417_v40, 16  ;;  %v3418_v5 = vld [vmem:[#allocation2 + $0x48] sm:$0xff] }
 0x39a   : > { %v3457_v4 = vrot.slane %v3456_v45, 4  ;;  %v3467_v22 = vshll.u32 %v3418_v5, 16  ;;  %v3479_v45 = vrot.slane %v3477_v30, 4 }
 0x39b   : > { %v2682_v63 = vpop.f32.mrf.mxu1  ;;  %v2273_v34 = vadd.f32 %v2252_v58, %v6680_v47  ;;  %v3461_v36 = vrot.slane %v3459_v17, 5  ;;  %v3420_v17 = vld [vmem:[#allocation2 + $0x58] sm:$0x11] }
 0x39c   : > { %v2732_v49 = vadd.f32 %v2731_v11, %v2682_v63  ;;  %v2734_v41 = vpop.f32.mrf.mxu3  ;;  %v3464_v63 = vshrl.u32 %v3418_v5, 16 }
 0x39d   : > { %v3462_v15 = vsel %vm5997_vm11, %v3457_v4, %v3461_v36  ;;  %v3483_v4 = vshll.u32 %v3420_v17, 16 }
 0x39e   : > { %v6852_v10 = vadd.f32 %v2732_v49, %v2272_v33  ;;  %v3934_v49 = vrot.slane %v3932_v35, 4  ;;  %v3652_v12 = vunpack.c.l.b16 %v3462_v15 }
 0x3a0   : > { %v2253_v37 = vpop.f32.mrf.mxu2  ;;  %v6877_v8 = vsel %vm6207_vm14, %v3934_v49, %v3935_v18 }
 0x3a1   : > { %v2254_v47 = vadd.f32 %v2253_v37, %v2204_v38  ;;  %v2207_v20 = vpop.f32.mrf.mxu0  ;;  %v5243_v38 = vrot.slane %v3898_v57, 9  ;;  %v3466_v37 = vrot.slane %v3464_v63, 4  ;;  %v3899_v63 = vld [vmem:[#allocation2 + $0x48] sm:$0xee] }
 0x3a3   : > { %v2685_v14 = vpop.f32.mrf.mxu1  ;;  %v2274_v33 = vadd.f32 %v2254_v47, %v6702_v26  ;;  %v3452_v26 = vsel %vm5997_vm11, %v3447_v2, %v3451_v19  ;;  %v3653_v19 = vunpack.c.h.b16 %v3462_v15  ;;  %v6873_v40 = vsel %vm6207_vm14, %v5243_v38, %v3932_v35  ;;  %v6885_v15 = vld [vmem:[#allocation2 + $0x68] sm:$0xff] }
 0x3a4   : > { %v2735_v28 = vadd.f32 %v2734_v41, %v2685_v14  ;;  %v2736_v11 = vpop.f32.mrf.mxu3  ;;  %3044 = vmatmul.bf16.gmra.mxu0 %v2913_v16  ;;  %v3651_v44 = vunpack.c.h.b16 %v3452_v26  ;;  %v3650_v25 = vunpack.c.l.b16 %v3452_v26  ;;  %v3469_v16 = vrot.slane %v3467_v22, 5  ;;  %v3421_v26 = vld [vmem:[#allocation2 + $0x60] sm:$0xff] }
 0x3a5   : > { %5054 = vmatmul.msk.bf16.gmra.mxu2 %vm1257_vm2, %v2914_v21  ;;  %v4006_v52 = vunpack.c.h.b16 %v6873_v40  ;;  %v3939_v38 = vrot.slane %v6859_v3, 5  ;;  %v3497_v49 = vshll.u32 %v6885_v15, 16  ;;  %v3501_v18 = vshrl.u32 %v6885_v15, 16 }
 0x3a6   : > { %v6855_v53 = vadd.f32 %v2735_v28, %v2273_v34  ;;  %3339 = vmatmul.bf16.gmra.mxu1 %v5124_v31  ;;  %v3473_v34 = vshll.u32 %v6859_v3, 16  ;;  %v5132_v31 = vor.u32 %v5424_v23, %v5131_v59  ;;  %v3682_v21 = vpack.c.b16 %v3652_v12, %v3650_v25 }
 0x3a7   : > { %v4008_v28 = vunpack.c.h.b16 %v6877_v8  ;;  %v3941_v25 = vrot.slane %v3939_v38, 4  ;;  %v3942_v12 = vrot.slane %v3420_v17, 5 }
 0x3a8   : > { %v2256_v46 = vpop.f32.mrf.mxu2 }
 0x3a9   : > { %v2257_v6 = vadd.f32 %v2256_v46, %v2207_v20  ;;  %5180 = vmatmul.msk.bf16.gmra.mxu3 %vm1257_vm2, %v5136_v56  ;;  %v2209_v58 = vpop.f32.mrf.mxu0  ;;  %v3683_v20 = vpack.c.b16 %v3653_v19, %v3651_v44  ;;  %v4038_v5 = vpack.c.b16 %v4008_v28, %v4006_v52  ;;  %v5244_v19 = vrot.slane %v3899_v63, 9 }
 0x3aa   : > { %v3943_v17 = vsel %vm6207_vm14, %v3941_v25, %v3942_v12 }
 0x3ab   : > { %v2687_v51 = vpop.f32.mrf.mxu1  ;;  %v2275_v41 = vadd.f32 %v2257_v6, %v6710_v54  ;;  %v3475_v54 = vrot.slane %v3473_v34, 5 }
 0x3ac   : > { %v2737_v43 = vadd.f32 %v2736_v11, %v2687_v51  ;;  %v2739_v50 = vpop.f32.mrf.mxu3  ;;  %v3488_v51 = vshrl.u32 %v3421_v26, 16 }
 0x3ad   : > { %v3480_v2 = vor.u32 %v3479_v45, %v3475_v54 }
 0x3ae   : > { %v6869_v24 = vadd.f32 %v2737_v43, %v2274_v33  ;;  %v3470_v33 = vor.u32 %v3469_v16, %v3466_v37  ;;  %v4005_v43 = vunpack.c.l.b16 %v6873_v40 }
 0x3af   : > { %v3481_v6 = vrot.slane %v3480_v2, 4 }
 0x3b0   : > { %v2258_v47 = vpop.f32.mrf.mxu2  ;;  %v3471_v46 = vrot.slane %v3470_v33, 4 }
 0x3b1   : > { %v2259_v14 = vadd.f32 %v2258_v47, %v2209_v58  ;;  %v3010_v13 = vpop.f32.mrf.mxu0  ;;  %v3485_v58 = vrot.slane %v3483_v4, 5  ;;  %v3490_v47 = vrot.slane %v3488_v51, 4 }
 0x3b3   : > { %v2690_v11 = vpop.f32.mrf.mxu1  ;;  %v2276_v56 = vadd.f32 %v2259_v14, %v6728_v7  ;;  %v3491_v7 = vshll.u32 %v3421_v26, 16  ;;  %v3486_v44 = vsel %vm5997_vm11, %v3481_v6, %v3485_v58  ;;  %v3423_v14 = vld [vmem:[#allocation2 + $0x70] sm:$0x11] }
 0x3b4   : > { %v2740_v36 = vadd.f32 %v2739_v50, %v2690_v11  ;;  %v2741_v57 = vpop.f32.mrf.mxu3  ;;  %3792 = vmatmul.bf16.vlgmr.msra.gmra.mxu0 %v3682_v21  ;;  %v3476_v50 = vsel %vm5997_vm11, %v3471_v46, %v3475_v54  ;;  %v3656_v16 = vunpack.c.l.b16 %v3486_v44  ;;  %v3657_v21 = vunpack.c.h.b16 %v3486_v44 }
 0x3b5   : > { %5235 = vmatmul.msk.bf16.vlgmr.msra.gmra.mxu2 %vm1257_vm2, %v3683_v20  ;;  %v3654_v37 = vunpack.c.l.b16 %v3476_v50  ;;  %v3493_v40 = vrot.slane %v3491_v7, 5  ;;  %v3655_v54 = vunpack.c.h.b16 %v3476_v50  ;;  %v3507_v2 = vshll.u32 %v3423_v14, 16 }
 0x3b6   : > { %v6882_v35 = vadd.f32 %v2740_v36, %v2275_v41  ;;  %3344 = vmatmul.bf16.gmra.mxu1 %v5132_v31  ;;  %v4007_v41 = vunpack.c.l.b16 %v6877_v8  ;;  %v3499_v31 = vrot.slane %v3497_v49, 5  ;;  %v3503_v8 = vrot.slane %v3501_v18, 4  ;;  %v3900_v49 = vld [vmem:[#allocation2 + $0x60] sm:$0xee] }
 0x3b7   : > { %v3684_v28 = vpack.c.b16 %v3656_v16, %v3654_v37  ;;  %v3494_v33 = vor.u32 %v3493_v40, %v3490_v47  ;;  %v3946_v18 = vrot.slane %v6885_v15, 5  ;;  %v5245_v44 = vrot.slane %v3900_v49, 9 }
 0x3b8   : > { %v3059_v22 = vpop.f32.mrf.mxu2  ;;  %v4037_v52 = vpack.c.b16 %v4007_v41, %v4005_v43  ;;  %v3504_v11 = vor.u32 %v3503_v8, %v3499_v31  ;;  %v3949_v15 = vrot.slane %v3423_v14, 5  ;;  %v4011_v40 = vunpack.c.l.b16 %v3943_v17 }
 0x3b9   : > { %v3060_v34 = vadd.f32 %v3059_v22, %v3010_v13  ;;  %5305 = vmatmul.msk.bf16.vlgmr.msra.gmra.mxu3 %vm1257_vm2, %v4038_v5  ;;  %v3012_v30 = vpop.f32.mrf.mxu0  ;;  %v3940_v13 = vsel %vm6207_vm14, %v5244_v19, %v3939_v38  ;;  %v4012_v5 = vunpack.c.h.b16 %v3943_v17  ;;  %v3495_v38 = vrot.slane %v3494_v33, 4  ;;  %v3426_v17 = vld [vmem:[#allocation2 + $0x88] sm:$0x11] }
 0x3ba   : > { %v3505_v63 = vrot.slane %v3504_v11, 4  ;;  %v3509_v22 = vrot.slane %v3507_v2, 5  ;;  %v4009_v47 = vunpack.c.l.b16 %v3940_v13  ;;  %v6923_v14 = vsel %vm6207_vm14, %v5245_v44, %v3946_v18 }
 0x3bb   : > { %v2692_v3 = vpop.f32.mrf.mxu1  ;;  %v3099_v23 = vadd.f32 %v3060_v34, %v6732_v48  ;;  %v3424_v34 = vld [vmem:[#allocation2 + $0x78] sm:$0xff] }
 0x3bc   : > { %v2742_v59 = vadd.f32 %v2741_v57, %v2692_v3  ;;  %v3359_v45 = vpop.f32.mrf.mxu3  ;;  %v3685_v57 = vpack.c.b16 %v3657_v21, %v3655_v54  ;;  %v3510_v41 = vsel %vm5997_vm11, %v3505_v63, %v3509_v22  ;;  %v3512_v19 = vshrl.u32 %v3424_v34, 16 }
 0x3bd   : > { %v3515_v25 = vshll.u32 %v3424_v34, 16  ;;  %v3661_v54 = vunpack.c.h.b16 %v3510_v41  ;;  %v3531_v63 = vshll.u32 %v3426_v17, 16 }
 0x3be   : > { %v6898_v20 = vadd.f32 %v2742_v59, %v2276_v56  ;;  %v4010_v56 = vunpack.c.h.b16 %v3940_v13  ;;  %v3948_v59 = vrot.slane %v3946_v18, 4 }
 0x3bf   : > { %v3517_v33 = vrot.slane %v3515_v25, 5 }
 0x3c0   : > { %v3061_v48 = vpop.f32.mrf.mxu2  ;;  %v4040_v7 = vpack.c.b16 %v4012_v5, %v4010_v56  ;;  %v6927_v11 = vsel %vm6207_vm14, %v3948_v59, %v3949_v15 }
 0x3c1   : > { %v3062_v4 = vadd.f32 %v3061_v48, %v3012_v30  ;;  %v3015_v36 = vpop.f32.mrf.mxu0  ;;  %v6909_v30 = vld [vmem:[#allocation2 + $0x80] sm:$0xff] }
 0x3c2   : > { %v3525_v37 = vshrl.u32 %v6909_v30, 16  ;;  %v3953_v44 = vrot.slane %v6909_v30, 5 }
 0x3c3   : > { %v3310_v46 = vpop.f32.mrf.mxu1  ;;  %v3100_v6 = vadd.f32 %v3062_v4, %v6748_v29  ;;  %v3500_v29 = vsel %vm5997_vm11, %v3495_v38, %v3499_v31  ;;  %v4039_v4 = vpack.c.b16 %v4011_v40, %v4009_v47 }
 0x3c4   : > { %v3360_v26 = vadd.f32 %v3359_v45, %v3310_v46  ;;  %v3361_v58 = vpop.f32.mrf.mxu3  ;;  %3797 = vmatmul.bf16.gmra.mxu0 %v3684_v28  ;;  %v3659_v8 = vunpack.c.h.b16 %v3500_v29  ;;  %v3658_v21 = vunpack.c.l.b16 %v3500_v29  ;;  %v3514_v28 = vrot.slane %v3512_v19, 4  ;;  %v3427_v29 = vld [vmem:[#allocation2 + $0x90] sm:$0xff]  ;;  %v3901_v19 = vld [vmem:[#allocation2 + $0x78] sm:$0xee] }
 0x3c5   : > { %5236 = vmatmul.msk.bf16.gmra.mxu2 %vm1257_vm2, %v3685_v57  ;;  %v3527_v13 = vrot.slane %v3525_v37, 4  ;;  %v4014_v46 = vunpack.c.h.b16 %v6923_v14 }
 0x3c6   : > { %v6905_v51 = vadd.f32 %v3360_v26, %v3099_v23  ;;  %4147 = vmatmul.bf16.vlgmr.msra.gmra.mxu1 %v4037_v52  ;;  %v3521_v23 = vshll.u32 %v6909_v30, 16  ;;  %v3660_v52 = vunpack.c.l.b16 %v3510_v41  ;;  %v4016_v26 = vunpack.c.h.b16 %v6927_v11  ;;  %v6935_v41 = vld [vmem:[#allocation2 + $0x98] sm:$0xff] }
 0x3c7   : > { %v3545_v59 = vshll.u32 %v6935_v41, 16  ;;  %v3549_v15 = vshrl.u32 %v6935_v41, 16 }
 0x3c8   : > { %v3064_v43 = vpop.f32.mrf.mxu2  ;;  %v3686_v57 = vpack.c.b16 %v3660_v52, %v3658_v21  ;;  %v4042_v34 = vpack.c.b16 %v4016_v26, %v4014_v46 }
 0x3c9   : > { %v3065_v50 = vadd.f32 %v3064_v43, %v3015_v36  ;;  %5306 = vmatmul.msk.bf16.gmra.mxu3 %vm1257_vm2, %v4040_v7  ;;  %v3017_v3 = vpop.f32.mrf.mxu0  ;;  %v3687_v36 = vpack.c.b16 %v3661_v54, %v3659_v8  ;;  %v3955_v8 = vrot.slane %v3953_v44, 4  ;;  %v3956_v54 = vrot.slane %v3426_v17, 5 }
 0x3cb   : > { %v3312_v12 = vpop.f32.mrf.mxu1  ;;  %v3101_v45 = vadd.f32 %v3065_v50, %v6752_v60  ;;  %v3523_v60 = vrot.slane %v3521_v23, 5  ;;  %v3957_v17 = vsel %vm6207_vm14, %v3955_v8, %v3956_v54 }
 0x3cc   : > { %v3362_v16 = vadd.f32 %v3361_v58, %v3312_v12  ;;  %v3364_v31 = vpop.f32.mrf.mxu3  ;;  %v3536_v12 = vshrl.u32 %v3427_v29, 16 }
 0x3cd   : > { %v3528_v38 = vor.u32 %v3527_v13, %v3523_v60 }
 0x3ce   : > { %v6919_v48 = vadd.f32 %v3362_v16, %v3100_v6  ;;  %v3518_v6 = vor.u32 %v3517_v33, %v3514_v28  ;;  %v4013_v16 = vunpack.c.l.b16 %v6923_v14 }
 0x3cf   : > { %v3529_v50 = vrot.slane %v3528_v38, 4 }
 0x3d0   : > { %v3066_v2 = vpop.f32.mrf.mxu2  ;;  %v3519_v43 = vrot.slane %v3518_v6, 4 }
 0x3d1   : > { %v3067_v56 = vadd.f32 %v3066_v2, %v3017_v3  ;;  %v3020_v5 = vpop.f32.mrf.mxu0  ;;  %v3533_v3 = vrot.slane %v3531_v63, 5  ;;  %v3538_v2 = vrot.slane %v3536_v12, 4 }
 0x3d2   : > { %v3524_v47 = vsel %vm5997_vm11, %v3519_v43, %v3523_v60 }
 0x3d3   : > { %v3315_v58 = vpop.f32.mrf.mxu1  ;;  %v3102_v7 = vadd.f32 %v3067_v56, %v6768_v27  ;;  %v3539_v27 = vshll.u32 %v3427_v29, 16  ;;  %v3534_v40 = vsel %vm5997_vm11, %v3529_v50, %v3533_v3  ;;  %v3662_v28 = vunpack.c.l.b16 %v3524_v47  ;;  %v3429_v56 = vld [vmem:[#allocation2 + $0xa0] sm:$0x11] }
 0x3d4   : > { %v3365_v22 = vadd.f32 %v3364_v31, %v3315_v58  ;;  %v3366_v49 = vpop.f32.mrf.mxu3  ;;  %3802 = vmatmul.bf16.gmra.mxu0 %v3686_v57  ;;  %v5246_v31 = vrot.slane %v3901_v19, 9  ;;  %v3664_v33 = vunpack.c.l.b16 %v3534_v40  ;;  %v3663_v60 = vunpack.c.h.b16 %v3524_v47 }
 0x3d5   : > { %5237 = vmatmul.msk.bf16.gmra.mxu2 %vm1257_vm2, %v3687_v36  ;;  %v3541_v14 = vrot.slane %v3539_v27, 5  ;;  %v3665_v57 = vunpack.c.h.b16 %v3534_v40  ;;  %v3555_v38 = vshll.u32 %v3429_v56, 16 }
 0x3d6   : > { %v6932_v18 = vadd.f32 %v3365_v22, %v3101_v45  ;;  %4152 = vmatmul.bf16.gmra.mxu1 %v4039_v4  ;;  %v4015_v45 = vunpack.c.l.b16 %v6927_v11  ;;  %v3547_v4 = vrot.slane %v3545_v59, 5  ;;  %v3551_v11 = vrot.slane %v3549_v15, 4  ;;  %v3902_v59 = vld [vmem:[#allocation2 + $0x90] sm:$0xee] }
 0x3d7   : > { %v3688_v26 = vpack.c.b16 %v3664_v33, %v3662_v28  ;;  %v3542_v6 = vor.u32 %v3541_v14, %v3538_v2  ;;  %v3960_v15 = vrot.slane %v6935_v41, 5  ;;  %v5247_v40 = vrot.slane %v3902_v59, 9 }
 0x3d8   : > { %v3069_v25 = vpop.f32.mrf.mxu2  ;;  %v4041_v46 = vpack.c.b16 %v4015_v45, %v4013_v16  ;;  %v3552_v58 = vor.u32 %v3551_v11, %v3547_v4  ;;  %v3963_v41 = vrot.slane %v3429_v56, 5  ;;  %v4019_v14 = vunpack.c.l.b16 %v3957_v17 }
 0x3d9   : > { %v3070_v23 = vadd.f32 %v3069_v25, %v3020_v5  ;;  %5307 = vmatmul.msk.bf16.gmra.mxu3 %vm1257_vm2, %v4042_v34  ;;  %v3022_v37 = vpop.f32.mrf.mxu0  ;;  %v3954_v5 = vsel %vm6207_vm14, %v5246_v31, %v3953_v44  ;;  %v4020_v34 = vunpack.c.h.b16 %v3957_v17  ;;  %v3543_v44 = vrot.slane %v3542_v6, 4  ;;  %v3432_v17 = vld [vmem:[#allocation2 + $0xb8] sm:$0x11] }
 0x3da   : > { %v3553_v19 = vrot.slane %v3552_v58, 4  ;;  %v3557_v25 = vrot.slane %v3555_v38, 5  ;;  %v4017_v2 = vunpack.c.l.b16 %v3954_v5  ;;  %v6973_v56 = vsel %vm6207_vm14, %v5247_v40, %v3960_v15 }
 0x3db   : > { %v3317_v30 = vpop.f32.mrf.mxu1  ;;  %v3103_v52 = vadd.f32 %v3070_v23, %v6772_v32  ;;  %v3430_v23 = vld [vmem:[#allocation2 + $0xa8] sm:$0xff] }
 0x3dc   : > { %v3367_v21 = vadd.f32 %v3366_v49, %v3317_v30  ;;  %v3369_v13 = vpop.f32.mrf.mxu3  ;;  %v3689_v49 = vpack.c.b16 %v3665_v57, %v3663_v60  ;;  %v3558_v45 = vsel %vm5997_vm11, %v3553_v19, %v3557_v25  ;;  %v3560_v31 = vshrl.u32 %v3430_v23, 16 }
 0x3dd   : > { %v3563_v8 = vshll.u32 %v3430_v23, 16  ;;  %v3669_v60 = vunpack.c.h.b16 %v3558_v45  ;;  %v3579_v19 = vshll.u32 %v3432_v17, 16 }
 0x3de   : > { %v6948_v36 = vadd.f32 %v3367_v21, %v3102_v7  ;;  %v4018_v7 = vunpack.c.h.b16 %v3954_v5  ;;  %v3962_v21 = vrot.slane %v3960_v15, 4 }
 0x3df   : > { %v3565_v6 = vrot.slane %v3563_v8, 5 }
 0x3e0   : > { %v3071_v32 = vpop.f32.mrf.mxu2  ;;  %v4044_v27 = vpack.c.b16 %v4020_v34, %v4018_v7  ;;  %v6977_v58 = vsel %vm6207_vm14, %v3962_v21, %v3963_v41 }
 0x3e1   : > { %v3072_v63 = vadd.f32 %v3071_v32, %v3022_v37  ;;  %v3025_v22 = vpop.f32.mrf.mxu0  ;;  %v6959_v37 = vld [vmem:[#allocation2 + $0xb0] sm:$0xff] }
 0x3e2   : > { %v3573_v28 = vshrl.u32 %v6959_v37, 16  ;;  %v3967_v40 = vrot.slane %v6959_v37, 5 }
 0x3e3   : > { %v3320_v43 = vpop.f32.mrf.mxu1  ;;  %v3104_v50 = vadd.f32 %v3072_v63, %v6788_v55  ;;  %v3548_v55 = vsel %vm5997_vm11, %v3543_v44, %v3547_v4  ;;  %v4043_v63 = vpack.c.b16 %v4019_v14, %v4017_v2 }
 0x3e4   : > { %v3370_v29 = vadd.f32 %v3369_v13, %v3320_v43  ;;  %v3371_v3 = vpop.f32.mrf.mxu3  ;;  %3807 = vmatmul.bf16.gmra.mxu0 %v3688_v26  ;;  %v3667_v11 = vunpack.c.h.b16 %v3548_v55  ;;  %v3666_v57 = vunpack.c.l.b16 %v3548_v55  ;;  %v3562_v26 = vrot.slane %v3560_v31, 4  ;;  %v3433_v55 = vld [vmem:[#allocation2 + $0xc0] sm:$0xff]  ;;  %v3903_v31 = vld [vmem:[#allocation2 + $0xa8] sm:$0xee] }
 0x3e5   : > { %5238 = vmatmul.msk.bf16.gmra.mxu2 %vm1257_vm2, %v3689_v49  ;;  %v3575_v5 = vrot.slane %v3573_v28, 4  ;;  %v4022_v43 = vunpack.c.h.b16 %v6973_v56 }
 0x3e6   : > { %v6955_v12 = vadd.f32 %v3370_v29, %v3103_v52  ;;  %4157 = vmatmul.bf16.gmra.mxu1 %v4041_v46  ;;  %v3569_v52 = vshll.u32 %v6959_v37, 16  ;;  %v3668_v46 = vunpack.c.l.b16 %v3558_v45  ;;  %v4024_v29 = vunpack.c.h.b16 %v6977_v58  ;;  %v6985_v45 = vld [vmem:[#allocation2 + $0xc8] sm:$0xff] }
 0x3e7   : > { %v3593_v21 = vshll.u32 %v6985_v45, 16  ;;  %v3597_v41 = vshrl.u32 %v6985_v45, 16 }
 0x3e8   : > { %v3074_v16 = vpop.f32.mrf.mxu2  ;;  %v3690_v49 = vpack.c.b16 %v3668_v46, %v3666_v57  ;;  %v4046_v23 = vpack.c.b16 %v4024_v29, %v4022_v43 }
 0x3e9   : > { %v3075_v47 = vadd.f32 %v3074_v16, %v3025_v22  ;;  %5308 = vmatmul.msk.bf16.gmra.mxu3 %vm1257_vm2, %v4044_v27  ;;  %v3027_v30 = vpop.f32.mrf.mxu0  ;;  %v3691_v22 = vpack.c.b16 %v3669_v60, %v3667_v11  ;;  %v3969_v11 = vrot.slane %v3967_v40, 4  ;;  %v3970_v60 = vrot.slane %v3432_v17, 5 }
 0x3eb   : > { %v3322_v54 = vpop.f32.mrf.mxu1  ;;  %v3105_v13 = vadd.f32 %v3075_v47, %v6792_v62  ;;  %v3571_v62 = vrot.slane %v3569_v52, 5  ;;  %v3971_v17 = vsel %vm6207_vm14, %v3969_v11, %v3970_v60 }
 0x3ec   : > { %v3372_v33 = vadd.f32 %v3371_v3, %v3322_v54  ;;  %v3374_v4 = vpop.f32.mrf.mxu3  ;;  %v3584_v54 = vshrl.u32 %v3433_v55, 16 }
 0x3ed   : > { %v3576_v44 = vor.u32 %v3575_v5, %v3571_v62 }
 0x3ee   : > { %v6969_v32 = vadd.f32 %v3372_v33, %v3104_v50  ;;  %v3566_v50 = vor.u32 %v3565_v6, %v3562_v26  ;;  %v4021_v33 = vunpack.c.l.b16 %v6973_v56 }
 0x3ef   : > { %v3577_v47 = vrot.slane %v3576_v44, 4 }
 0x3f0   : > { %v3076_v38 = vpop.f32.mrf.mxu2  ;;  %v3567_v16 = vrot.slane %v3566_v50, 4 }
 0x3f1   : > { %v3077_v7 = vadd.f32 %v3076_v38, %v3027_v30  ;;  %v3030_v34 = vpop.f32.mrf.mxu0  ;;  %v3581_v30 = vrot.slane %v3579_v19, 5  ;;  %v3586_v38 = vrot.slane %v3584_v54, 4 }
 0x3f2   : > { %v3572_v2 = vsel %vm5997_vm11, %v3567_v16, %v3571_v62 }
 0x3f3   : > { %v3325_v3 = vpop.f32.mrf.mxu1  ;;  %v3106_v27 = vadd.f32 %v3077_v7, %v6808_v0  ;;  %v3587_v0 = vshll.u32 %v3433_v55, 16  ;;  %v3582_v14 = vsel %vm5997_vm11, %v3577_v47, %v3581_v30  ;;  %v3670_v26 = vunpack.c.l.b16 %v3572_v2  ;;  %v3435_v7 = vld [vmem:[#allocation2 + $0xd0] sm:$0x11] }
 0x3f4   : > { %v3375_v25 = vadd.f32 %v3374_v4, %v3325_v3  ;;  %v3376_v59 = vpop.f32.mrf.mxu3  ;;  %3812 = vmatmul.bf16.gmra.mxu0 %v3690_v49  ;;  %v5248_v4 = vrot.slane %v3903_v31, 9  ;;  %v3672_v6 = vunpack.c.l.b16 %v3582_v14  ;;  %v3671_v62 = vunpack.c.h.b16 %v3572_v2 }
 0x3f5   : > { %5239 = vmatmul.msk.bf16.gmra.mxu2 %vm1257_vm2, %v3691_v22  ;;  %v3589_v56 = vrot.slane %v3587_v0, 5  ;;  %v3673_v49 = vunpack.c.h.b16 %v3582_v14  ;;  %v3603_v44 = vshll.u32 %v3435_v7, 16 }
 0x3f6   : > { %v6982_v15 = vadd.f32 %v3375_v25, %v3105_v13  ;;  %4162 = vmatmul.bf16.gmra.mxu1 %v4043_v63  ;;  %v4023_v13 = vunpack.c.l.b16 %v6977_v58  ;;  %v3595_v63 = vrot.slane %v3593_v21, 5  ;;  %v3599_v58 = vrot.slane %v3597_v41, 4  ;;  %v3904_v21 = vld [vmem:[#allocation2 + $0xc0] sm:$0xee] }
 0x3f7   : > { %v3692_v29 = vpack.c.b16 %v3672_v6, %v3670_v26  ;;  %v3590_v50 = vor.u32 %v3589_v56, %v3586_v38  ;;  %v3974_v41 = vrot.slane %v6985_v45, 5  ;;  %v5249_v14 = vrot.slane %v3904_v21, 9 }
 0x3f8   : > { %v3079_v8 = vpop.f32.mrf.mxu2  ;;  %v4045_v43 = vpack.c.b16 %v4023_v13, %v4021_v33  ;;  %v3600_v3 = vor.u32 %v3599_v58, %v3595_v63  ;;  %v3977_v45 = vrot.slane %v3435_v7, 5  ;;  %v4027_v56 = vunpack.c.l.b16 %v3971_v17 }
 0x3f9   : > { %v3080_v52 = vadd.f32 %v3079_v8, %v3030_v34  ;;  %5309 = vmatmul.msk.bf16.gmra.mxu3 %vm1257_vm2, %v4046_v23  ;;  %v3032_v28 = vpop.f32.mrf.mxu0  ;;  %v3968_v34 = vsel %vm6207_vm14, %v5248_v4, %v3967_v40  ;;  %v4028_v23 = vunpack.c.h.b16 %v3971_v17  ;;  %v3591_v40 = vrot.slane %v3590_v50, 4 }
 0x3fa   : > { %v3601_v31 = vrot.slane %v3600_v3, 4  ;;  %v3605_v8 = vrot.slane %v3603_v44, 5  ;;  %v4025_v38 = vunpack.c.l.b16 %v3968_v34  ;;  %v3975_v7 = vsel %vm6207_vm14, %v5249_v14, %v3974_v41 }
 0x3fb   : > { %v3327_v37 = vpop.f32.mrf.mxu1  ;;  %v3107_v46 = vadd.f32 %v3080_v52, %v6812_v1  ;;  %v3436_v52 = vld [vmem:[#allocation2 + $0xd8] sm:$0xff] }
 0x3fc   : > { %v3377_v57 = vadd.f32 %v3376_v59, %v3327_v37  ;;  %v3379_v5 = vpop.f32.mrf.mxu3  ;;  %v3693_v59 = vpack.c.b16 %v3673_v49, %v3671_v62  ;;  %v3606_v13 = vsel %vm5997_vm11, %v3601_v31, %v3605_v8  ;;  %v3608_v4 = vshrl.u32 %v3436_v52, 16 }
 0x3fd   : > { %v3611_v11 = vshll.u32 %v3436_v52, 16  ;;  %v3677_v62 = vunpack.c.h.b16 %v3606_v13  ;;  %v4047_v17 = vpack.c.b16 %v4027_v56, %v4025_v38  ;;  %v4029_v38 = vunpack.c.l.b16 %v3975_v7 }
 0x3fe   : > { %v6998_v22 = vadd.f32 %v3377_v57, %v3106_v27  ;;  %v4026_v27 = vunpack.c.h.b16 %v3968_v34  ;;  %v3976_v57 = vrot.slane %v3974_v41, 4 }
 0x3ff   : > { %v3613_v50 = vrot.slane %v3611_v11, 5 }
 0x400   : > { %v3081_v1 = vpop.f32.mrf.mxu2  ;;  %v4048_v0 = vpack.c.b16 %v4028_v23, %v4026_v27  ;;  %v3978_v3 = vsel %vm6207_vm14, %v3976_v57, %v3977_v45 }
 0x401   : > { %v3082_v19 = vadd.f32 %v3081_v1, %v3032_v28  ;;  %v3035_v25 = vpop.f32.mrf.mxu0  ;;  %v7009_v28 = vld [vmem:[#allocation2 + $0xe0] sm:$0xff]  ;;  %v4031_v56 = vunpack.c.l.b16 %v3978_v3 }
 0x402   : > { %v3621_v26 = vshrl.u32 %v7009_v28, 16 }
 0x403   : > { %v3330_v16 = vpop.f32.mrf.mxu1  ;;  %v3108_v47 = vadd.f32 %v3082_v19, %v6828_v39  ;;  %v3596_v39 = vsel %vm5997_vm11, %v3591_v40, %v3595_v63 }
 0x404   : > { %v3380_v55 = vadd.f32 %v3379_v5, %v3330_v16  ;;  %v3381_v30 = vpop.f32.mrf.mxu3  ;;  %3817 = vmatmul.bf16.gmra.mxu0 %v3692_v29  ;;  %v3675_v58 = vunpack.c.h.b16 %v3596_v39  ;;  %v3674_v49 = vunpack.c.l.b16 %v3596_v39  ;;  %v3610_v29 = vrot.slane %v3608_v4, 4 }
 0x405   : > { %5240 = vmatmul.msk.bf16.gmra.mxu2 %vm1257_vm2, %v3693_v59  ;;  %v3623_v19 = vrot.slane %v3621_v26, 4  ;;  %v4030_v16 = vunpack.c.h.b16 %v3975_v7 }
 0x406   : > { %v7005_v54 = vadd.f32 %v3380_v55, %v3107_v46  ;;  %4167 = vmatmul.bf16.gmra.mxu1 %v4045_v43  ;;  %v3617_v46 = vshll.u32 %v7009_v28, 16  ;;  %v3676_v43 = vunpack.c.l.b16 %v3606_v13  ;;  %v4032_v55 = vunpack.c.h.b16 %v3978_v3 }
 0x408   : > { %v3084_v33 = vpop.f32.mrf.mxu2  ;;  %v3619_v44 = vrot.slane %v3617_v46, 5  ;;  %v3694_v59 = vpack.c.b16 %v3676_v43, %v3674_v49  ;;  %v4050_v52 = vpack.c.b16 %v4032_v55, %v4030_v16 }
 0x409   : > { %v3085_v2 = vadd.f32 %v3084_v33, %v3035_v25  ;;  %5310 = vmatmul.msk.bf16.gmra.mxu3 %vm1257_vm2, %v4048_v0  ;;  %v3037_v37 = vpop.f32.mrf.mxu0  ;;  %v3695_v25 = vpack.c.b16 %v3677_v62, %v3675_v58 }
 0x40a   : > { %v3624_v40 = vor.u32 %v3623_v19, %v3619_v44 }
 0x40b   : > { %v3332_v60 = vpop.f32.mrf.mxu1  ;;  %v3109_v5 = vadd.f32 %v3085_v2, %v6832_v61  ;;  %v3438_v61 = vld [vmem:[#allocation2 + $0xe8] sm:$0x11]  ;;  %v3981_v2 = vrot.slane %v7009_v28, 5 }
 0x40c   : > { %v3382_v6 = vadd.f32 %v3381_v30, %v3332_v60  ;;  %v3384_v63 = vpop.f32.mrf.mxu3  ;;  %v3627_v31 = vshll.u32 %v3438_v61, 16  ;;  %v3625_v39 = vrot.slane %v3624_v40, 4  ;;  %v3984_v26 = vrot.slane %v3438_v61, 5 }
 0x40d   : > { %v3983_v46 = vrot.slane %v3981_v2, 4 }
 0x40e   : > { %v7019_v1 = vadd.f32 %v3382_v6, %v3108_v47  ;;  %v3614_v47 = vor.u32 %v3613_v50, %v3610_v29  ;;  %v3629_v13 = vrot.slane %v3627_v31, 5 }
 0x40f   : > { %v3985_v42 = vsel %vm6207_vm14, %v3983_v46, %v3984_v26 }
 0x410   : > { %v3086_v34 = vpop.f32.mrf.mxu2  ;;  %v3615_v33 = vrot.slane %v3614_v47, 4  ;;  %v3630_v57 = vsel %vm5997_vm11, %v3625_v39, %v3629_v13  ;;  %v4036_v3 = vunpack.c.h.b16 %v3985_v42 }
 0x411   : > { %v3087_v27 = vadd.f32 %v3086_v34, %v3037_v37  ;;  %v3040_v23 = vpop.f32.mrf.mxu0  ;;  %v3905_v37 = vld [vmem:[#allocation2 + $0xd8] sm:$0xee]  ;;  %v3680_v58 = vunpack.c.l.b16 %v3630_v57  ;;  %v3681_v43 = vunpack.c.h.b16 %v3630_v57 }
 0x412   : > { %v5250_v45 = vrot.slane %v3905_v37, 9 }
 0x413   : > { %v3335_v30 = vpop.f32.mrf.mxu1  ;;  %v3110_v0 = vadd.f32 %v3087_v27, %v6852_v10  ;;  %v3620_v10 = vsel %vm5997_vm11, %v3615_v33, %v3619_v44  ;;  %v4049_v44 = vpack.c.b16 %v4031_v56, %v4029_v38 }
 0x414   : > { %v3385_v8 = vadd.f32 %v3384_v63, %v3335_v30  ;;  %v3386_v21 = vpop.f32.mrf.mxu3  ;;  %3822 = vmatmul.bf16.gmra.mxu0 %v3694_v59  ;;  %v3678_v63 = vunpack.c.l.b16 %v3620_v10  ;;  %v3679_v49 = vunpack.c.h.b16 %v3620_v10  ;;  %v3982_v29 = vsel %vm6207_vm14, %v5250_v45, %v3981_v2 }
 0x415   : > { %5241 = vmatmul.msk.bf16.gmra.mxu2 %vm1257_vm2, %v3695_v25  ;;  %v4034_v7 = vunpack.c.h.b16 %v3982_v29 }
 0x416   : > { %v7026_v41 = vadd.f32 %v3385_v8, %v3109_v5  ;;  %4172 = vmatmul.bf16.gmra.mxu1 %v4047_v17  ;;  %v3696_v19 = vpack.c.b16 %v3680_v58, %v3678_v63  ;;  %v3697_v34 = vpack.c.b16 %v3681_v43, %v3679_v49 }
 0x417   : > { %v4052_v9 = vpack.c.b16 %v4036_v3, %v4034_v7 }
 0x418   : > { %v3089_v14 = vpop.f32.mrf.mxu2 }
 0x419   : > { %v3090_v4 = vadd.f32 %v3089_v14, %v3040_v23  ;;  %5311 = vmatmul.msk.bf16.gmra.mxu3 %vm1257_vm2, %v4050_v52  ;;  %v3042_v11 = vpop.f32.mrf.mxu0 }
 0x41b   : > { %v3337_v60 = vpop.f32.mrf.mxu1  ;;  %v3111_v5 = vadd.f32 %v3090_v4, %v6855_v53 }
 0x41c   : > { %v3387_v6 = vadd.f32 %v3386_v21, %v3337_v60  ;;  %v3389_v28 = vpop.f32.mrf.mxu3  ;;  %v4035_v21 = vunpack.c.l.b16 %v3985_v42 }
 0x41e   : > { %v7036_v62 = vadd.f32 %v3387_v6, %v3110_v0 }
 0x420   : > { %v3091_v50 = vpop.f32.mrf.mxu2 }
 0x421   : > { %v3092_v61 = vadd.f32 %v3091_v50, %v3042_v11  ;;  %v3045_v53 = vpop.f32.mrf.mxu0 }
 0x423   : > { %v3340_v17 = vpop.f32.mrf.mxu1  ;;  %v3112_v59 = vadd.f32 %v3092_v61, %v6869_v24  ;;  %v4033_v24 = vunpack.c.l.b16 %v3982_v29 }
 0x424   : > { %v3390_v25 = vadd.f32 %v3389_v28, %v3340_v17  ;;  %v3391_v27 = vpop.f32.mrf.mxu3  ;;  %3827 = vmatmul.bf16.gmra.mxu0 %v3696_v19 }
 0x425   : > { %5242 = vmatmul.msk.bf16.gmra.mxu2 %vm1257_vm2, %v3697_v34  ;;  %v4051_v39 = vpack.c.b16 %v4035_v21, %v4033_v24 }
 0x426   : > { %v7043_v23 = vadd.f32 %v3390_v25, %v3111_v5  ;;  %4177 = vmatmul.bf16.gmra.mxu1 %v4049_v44 }
 0x428   : > { %v3094_v16 = vpop.f32.mrf.mxu2 }
 0x429   : > { %v3095_v55 = vadd.f32 %v3094_v16, %v3045_v53  ;;  %5312 = vmatmul.msk.bf16.gmra.mxu3 %vm1257_vm2, %v4052_v9  ;;  %v3047_v47 = vpop.f32.mrf.mxu0 }
 0x42b   : > { %v3342_v30 = vpop.f32.mrf.mxu1  ;;  %v3113_v31 = vadd.f32 %v3095_v55, %v6882_v35 }
 0x42c   : > { %v3392_v40 = vadd.f32 %v3391_v27, %v3342_v30  ;;  %v3394_v8 = vpop.f32.mrf.mxu3 }
 0x42e   : > { %v7048_v0 = vadd.f32 %v3392_v40, %v3112_v59 }
 0x430   : > { %v3096_v52 = vpop.f32.mrf.mxu2 }
 0x431   : > { %v3097_v33 = vadd.f32 %v3096_v52, %v3047_v47  ;;  %v3793_v13 = vpop.f32.mrf.mxu0 }
 0x433   : > { %v3345_v2 = vpop.f32.mrf.mxu1  ;;  %v3114_v14 = vadd.f32 %v3097_v33, %v6898_v20 }
 0x434   : > { %v3395_v37 = vadd.f32 %v3394_v8, %v3345_v2  ;;  %v3396_v4 = vpop.f32.mrf.mxu3 }
 0x436   : > { %v7051_v11 = vadd.f32 %v3395_v37, %v3113_v31  ;;  %4182 = vmatmul.bf16.gmra.mxu1 %v4051_v39 }
 0x438   : > { %v3842_v10 = vpop.f32.mrf.mxu2 }
 0x439   : > { %v3795_v35 = vpop.f32.mrf.mxu0  ;;  %v3843_v26 = vadd.f32 %v3842_v10, %v3793_v13 }
 0x43b   : > { %v3347_v60 = vpop.f32.mrf.mxu1  ;;  %v3882_v38 = vadd.f32 %v3843_v26, %v6905_v51 }
 0x43c   : > { %v3397_v57 = vadd.f32 %v3396_v4, %v3347_v60  ;;  %v4197_v45 = vpop.f32.mrf.mxu3 }
 0x43e   : > { %v7053_v46 = vadd.f32 %v3397_v57, %v3114_v14 }
 0x440   : > { %v3844_v6 = vpop.f32.mrf.mxu2 }
 0x441   : > { %v3798_v5 = vpop.f32.mrf.mxu0  ;;  %v3845_v58 = vadd.f32 %v3844_v6, %v3795_v35 }
 0x443   : > { %v4148_v28 = vpop.f32.mrf.mxu1  ;;  %v3883_v42 = vadd.f32 %v3845_v58, %v6919_v48 }
 0x444   : > { %v4198_v20 = vadd.f32 %v4197_v45, %v4148_v28  ;;  %v4199_v56 = vpop.f32.mrf.mxu3 }
 0x446   : > { %v4237_v63 = vadd.f32 %v4198_v20, %v3882_v38 }
 0x448   : > { %4253 = vst [vmem:[%s5633_s16] sm:$0xff] %v4237_v63  ;;  %v3847_v49 = vpop.f32.mrf.mxu2  ;;  %v4291_v61 = vmul.f32 %v4237_v63, %v4237_v63 }
 0x449   : > { %v3800_v43 = vpop.f32.mrf.mxu0  ;;  %v3848_v7 = vadd.f32 %v3847_v49, %v3798_v5 }
 0x44b   : > { %v4150_v29 = vpop.f32.mrf.mxu1  ;;  %v3884_v59 = vadd.f32 %v3848_v7, %v6932_v18 }
 0x44c   : > { %v4200_v50 = vadd.f32 %v4199_v56, %v4150_v29  ;;  %v4202_v44 = vpop.f32.mrf.mxu3 }
 0x44e   : > { %v4238_v19 = vadd.f32 %v4200_v50, %v3883_v42 }
 0x450   : > { %4254 = vst [vmem:[%s5633_s16 + $0x8] sm:$0xff] %v4238_v19  ;;  %v4269_v53 = vadd.f32 %v4238_v19, %v4237_v63  ;;  %v4292_v34 = vmul.f32 %v4238_v19, %v4238_v19  ;;  %v3849_v51 = vpop.f32.mrf.mxu2 }
 0x451   : > { %v3803_v17 = vpop.f32.mrf.mxu0  ;;  %v3850_v47 = vadd.f32 %v3849_v51, %v3800_v43 }
 0x452   : > { %v4307_v3 = vadd.f32 %v4292_v34, %v4291_v61 }
 0x453   : > { %v4153_v25 = vpop.f32.mrf.mxu1  ;;  %v3885_v24 = vadd.f32 %v3850_v47, %v6948_v36 }
 0x454   : > { %v4203_v27 = vadd.f32 %v4202_v44, %v4153_v25  ;;  %v4204_v9 = vpop.f32.mrf.mxu3 }
 0x456   : > { %v4239_v16 = vadd.f32 %v4203_v27, %v3884_v59 }
 0x458   : > { %4255 = vst [vmem:[%s5633_s16 + $0x10] sm:$0xff] %v4239_v16  ;;  %v4270_v48 = vadd.f32 %v4269_v53, %v4239_v16  ;;  %v4293_v55 = vmul.f32 %v4239_v16, %v4239_v16  ;;  %v3852_v30 = vpop.f32.mrf.mxu2 }
 0x459   : > { %v3805_v31 = vpop.f32.mrf.mxu0  ;;  %v3853_v13 = vadd.f32 %v3852_v30, %v3803_v17 }
 0x45a   : > { %v4308_v40 = vadd.f32 %v4307_v3, %v4293_v55 }
 0x45b   : > { %v4155_v8 = vpop.f32.mrf.mxu1  ;;  %v3886_v10 = vadd.f32 %v3853_v13, %v6955_v12 }
 0x45c   : > { %v4205_v21 = vadd.f32 %v4204_v9, %v4155_v8  ;;  %v4207_v52 = vpop.f32.mrf.mxu3 }
 0x45e   : > { %v4240_v33 = vadd.f32 %v4205_v21, %v3885_v24 }
 0x460   : > { %4256 = vst [vmem:[%s5633_s16 + $0x18] sm:$0xff] %v4240_v33  ;;  %v4271_v18 = vadd.f32 %v4270_v48, %v4240_v33  ;;  %v4294_v39 = vmul.f32 %v4240_v33, %v4240_v33  ;;  %v3854_v2 = vpop.f32.mrf.mxu2 }
 0x461   : > { %v3808_v14 = vpop.f32.mrf.mxu0  ;;  %v3855_v26 = vadd.f32 %v3854_v2, %v3805_v31 }
 0x462   : > { %v4309_v37 = vadd.f32 %v4308_v40, %v4294_v39 }
 0x463   : > { %v4158_v4 = vpop.f32.mrf.mxu1  ;;  %v3887_v20 = vadd.f32 %v3855_v26, %v6969_v32 }
 0x464   : > { %v4208_v35 = vadd.f32 %v4207_v52, %v4158_v4  ;;  %v4209_v60 = vpop.f32.mrf.mxu3 }
 0x466   : > { %v4241_v57 = vadd.f32 %v4208_v35, %v3886_v10 }
 0x468   : > { %4257 = vst [vmem:[%s5633_s16 + $0x20] sm:$0xff] %v4241_v57  ;;  %v4272_v36 = vadd.f32 %v4271_v18, %v4241_v57  ;;  %v4295_v45 = vmul.f32 %v4241_v57, %v4241_v57  ;;  %v3857_v6 = vpop.f32.mrf.mxu2 }
 0x469   : > { %v3810_v28 = vpop.f32.mrf.mxu0  ;;  %v3858_v43 = vadd.f32 %v3857_v6, %v3808_v14 }
 0x46a   : > { %v4310_v5 = vadd.f32 %v4309_v37, %v4295_v45 }
 0x46b   : > { %v4160_v38 = vpop.f32.mrf.mxu1  ;;  %v3888_v19 = vadd.f32 %v3858_v43, %v6982_v15 }
 0x46c   : > { %v4210_v56 = vadd.f32 %v4209_v60, %v4160_v38  ;;  %v4212_v63 = vpop.f32.mrf.mxu3 }
 0x46e   : > { %v4242_v58 = vadd.f32 %v4210_v56, %v3887_v20 }
 0x470   : > { %4258 = vst [vmem:[%s5633_s16 + $0x28] sm:$0xff] %v4242_v58  ;;  %v4273_v12 = vadd.f32 %v4272_v36, %v4242_v58  ;;  %v4296_v49 = vmul.f32 %v4242_v58, %v4242_v58  ;;  %v3859_v29 = vpop.f32.mrf.mxu2 }
 0x471   : > { %v3813_v50 = vpop.f32.mrf.mxu0  ;;  %v3860_v51 = vadd.f32 %v3859_v29, %v3810_v28 }
 0x472   : > { %v4311_v42 = vadd.f32 %v4310_v5, %v4296_v49 }
 0x473   : > { %v4163_v44 = vpop.f32.mrf.mxu1  ;;  %v3889_v27 = vadd.f32 %v3860_v51, %v6998_v22 }
 0x474   : > { %v4213_v61 = vadd.f32 %v4212_v63, %v4163_v44  ;;  %v4214_v53 = vpop.f32.mrf.mxu3 }
 0x476   : > { %v4243_v34 = vadd.f32 %v4213_v61, %v3888_v19 }
 0x478   : > { %4259 = vst [vmem:[%s5633_s16 + $0x30] sm:$0xff] %v4243_v34  ;;  %v4274_v32 = vadd.f32 %v4273_v12, %v4243_v34  ;;  %v4297_v7 = vmul.f32 %v4243_v34, %v4243_v34  ;;  %v3862_v3 = vpop.f32.mrf.mxu2 }
 0x479   : > { %v3815_v59 = vpop.f32.mrf.mxu0  ;;  %v3863_v47 = vadd.f32 %v3862_v3, %v3813_v50 }
 0x47a   : > { %v4312_v17 = vadd.f32 %v4311_v42, %v4297_v7 }
 0x47b   : > { %v4165_v25 = vpop.f32.mrf.mxu1  ;;  %v3890_v8 = vadd.f32 %v3863_v47, %v7005_v54 }
 0x47c   : > { %v4215_v9 = vadd.f32 %v4214_v53, %v4165_v25  ;;  %v4217_v16 = vpop.f32.mrf.mxu3 }
 0x47e   : > { %v4244_v48 = vadd.f32 %v4215_v9, %v3889_v27 }
 0x480   : > { %4260 = vst [vmem:[%s5633_s16 + $0x38] sm:$0xff] %v4244_v48  ;;  %v4275_v15 = vadd.f32 %v4274_v32, %v4244_v48  ;;  %v4298_v55 = vmul.f32 %v4244_v48, %v4244_v48  ;;  %v3864_v30 = vpop.f32.mrf.mxu2 }
 0x481   : > { %v3818_v21 = vpop.f32.mrf.mxu0  ;;  %v3865_v39 = vadd.f32 %v3864_v30, %v3815_v59 }
 0x482   : > { %v4313_v40 = vadd.f32 %v4312_v17, %v4298_v55 }
 0x483   : > { %v4168_v31 = vpop.f32.mrf.mxu1  ;;  %v3891_v14 = vadd.f32 %v3865_v39, %v7019_v1 }
 0x484   : > { %v4218_v24 = vadd.f32 %v4217_v16, %v4168_v31  ;;  %v4219_v52 = vpop.f32.mrf.mxu3 }
 0x486   : > { %v4245_v33 = vadd.f32 %v4218_v24, %v3890_v8 }
 0x488   : > { %4261 = vst [vmem:[%s5633_s16 + $0x40] sm:$0xff] %v4245_v33  ;;  %v4276_v22 = vadd.f32 %v4275_v15, %v4245_v33  ;;  %v4299_v18 = vmul.f32 %v4245_v33, %v4245_v33  ;;  %v3867_v13 = vpop.f32.mrf.mxu2 }
 0x489   : > { %v3820_v60 = vpop.f32.mrf.mxu0  ;;  %v3868_v36 = vadd.f32 %v3867_v13, %v3818_v21 }
 0x48a   : > { %v4314_v2 = vadd.f32 %v4313_v40, %v4299_v18 }
 0x48b   : > { %v4170_v37 = vpop.f32.mrf.mxu1  ;;  %v3892_v5 = vadd.f32 %v3868_v36, %v7026_v41 }
 0x48c   : > { %v4220_v4 = vadd.f32 %v4219_v52, %v4170_v37  ;;  %v4222_v10 = vpop.f32.mrf.mxu3 }
 0x48e   : > { %v4246_v35 = vadd.f32 %v4220_v4, %v3891_v14 }
 0x490   : > { %4262 = vst [vmem:[%s5633_s16 + $0x48] sm:$0xff] %v4246_v35  ;;  %v4277_v54 = vadd.f32 %v4276_v22, %v4246_v35  ;;  %v4300_v57 = vmul.f32 %v4246_v35, %v4246_v35  ;;  %v3869_v45 = vpop.f32.mrf.mxu2 }
 0x491   : > { %v3870_v63 = vadd.f32 %v3869_v45, %v3820_v60  ;;  %v3823_v58 = vpop.f32.mrf.mxu0 }
 0x492   : > { %v4315_v26 = vadd.f32 %v4314_v2, %v4300_v57 }
 0x493   : > { %v4173_v6 = vpop.f32.mrf.mxu1  ;;  %v3893_v29 = vadd.f32 %v3870_v63, %v7036_v62 }
 0x494   : > { %v4223_v28 = vadd.f32 %v4222_v10, %v4173_v6  ;;  %v4224_v38 = vpop.f32.mrf.mxu3 }
 0x496   : > { %v4247_v20 = vadd.f32 %v4223_v28, %v3892_v5 }
 0x498   : > { %4263 = vst [vmem:[%s5633_s16 + $0x50] sm:$0xff] %v4247_v20  ;;  %v4278_v1 = vadd.f32 %v4277_v54, %v4247_v20  ;;  %v4301_v56 = vmul.f32 %v4247_v20, %v4247_v20  ;;  %v3872_v12 = vpop.f32.mrf.mxu2 }
 0x499   : > { %v3873_v61 = vadd.f32 %v3872_v12, %v3823_v58  ;;  %v3825_v32 = vpop.f32.mrf.mxu0 }
 0x49a   : > { %v4316_v49 = vadd.f32 %v4315_v26, %v4301_v56 }
 0x49b   : > { %v4175_v43 = vpop.f32.mrf.mxu1  ;;  %v3894_v51 = vadd.f32 %v3873_v61, %v7043_v23 }
 0x49c   : > { %v4225_v42 = vadd.f32 %v4224_v38, %v4175_v43  ;;  %v4227_v50 = vpop.f32.mrf.mxu3 }
 0x49e   : > { %v4248_v44 = vadd.f32 %v4225_v42, %v3893_v29 }
 0x4a0   : > { %4264 = vst [vmem:[%s5633_s16 + $0x58] sm:$0xff] %v4248_v44  ;;  %v4279_v41 = vadd.f32 %v4278_v1, %v4248_v44  ;;  %v4302_v19 = vmul.f32 %v4248_v44, %v4248_v44  ;;  %v3874_v53 = vpop.f32.mrf.mxu2 }
 0x4a1   : > { %v3875_v27 = vadd.f32 %v3874_v53, %v3825_v32  ;;  %v3828_v47 = vpop.f32.mrf.mxu0 }
 0x4a2   : > { %v4317_v34 = vadd.f32 %v4316_v49, %v4302_v19 }
 0x4a3   : > { %v4178_v7 = vpop.f32.mrf.mxu1  ;;  %v3895_v15 = vadd.f32 %v3875_v27, %v7048_v0 }
 0x4a4   : > { %v4228_v3 = vadd.f32 %v4227_v50, %v4178_v7  ;;  %v4229_v25 = vpop.f32.mrf.mxu3 }
 0x4a6   : > { %v4249_v17 = vadd.f32 %v4228_v3, %v3894_v51 }
 0x4a8   : > { %4265 = vst [vmem:[%s5633_s16 + $0x60] sm:$0xff] %v4249_v17  ;;  %v4280_v62 = vadd.f32 %v4279_v41, %v4249_v17  ;;  %v4303_v59 = vmul.f32 %v4249_v17, %v4249_v17  ;;  %v3877_v48 = vpop.f32.mrf.mxu2 }
 0x4a9   : > { %v3878_v23 = vadd.f32 %v3877_v48, %v3828_v47  ;;  %v3830_v39 = vpop.f32.mrf.mxu0 }
 0x4aa   : > { %v4318_v9 = vadd.f32 %v4317_v34, %v4303_v59 }
 0x4ab   : > { %v4180_v16 = vpop.f32.mrf.mxu1  ;;  %v3896_v52 = vadd.f32 %v3878_v23, %v7051_v11 }
 0x4ac   : > { %v4230_v55 = vadd.f32 %v4229_v25, %v4180_v16  ;;  %v4232_v8 = vpop.f32.mrf.mxu3 }
 0x4ae   : > { %v4250_v30 = vadd.f32 %v4230_v55, %v3895_v15 }
 0x4b0   : > { %4266 = vst [vmem:[%s5633_s16 + $0x68] sm:$0xff] %v4250_v30  ;;  %v4281_v40 = vadd.f32 %v4280_v62, %v4250_v30  ;;  %v4304_v31 = vmul.f32 %v4250_v30, %v4250_v30  ;;  %v3879_v22 = vpop.f32.mrf.mxu2 }
 0x4b1   : > { %v3880_v2 = vadd.f32 %v3879_v22, %v3830_v39 }
 0x4b2   : > { %v4319_v24 = vadd.f32 %v4318_v9, %v4304_v31 }
 0x4b3   : > { %v4183_v21 = vpop.f32.mrf.mxu1  ;;  %v3897_v10 = vadd.f32 %v3880_v2, %v7053_v46 }
 0x4b4   : > { %v4233_v33 = vadd.f32 %v4232_v8, %v4183_v21  ;;  %v4234_v14 = vpop.f32.mrf.mxu3 }
 0x4b6   : > { %v4251_v18 = vadd.f32 %v4233_v33, %v3896_v52 }
 0x4b8   : > { %4267 = vst [vmem:[%s5633_s16 + $0x70] sm:$0xff] %v4251_v18  ;;  %v4282_v0 = vadd.f32 %v4281_v40, %v4251_v18  ;;  %v4305_v13 = vmul.f32 %v4251_v18, %v4251_v18 }
 0x4ba   : > { %v4320_v37 = vadd.f32 %v4319_v24, %v4305_v13 }
 0x4bb   : > { %v4185_v4 = vpop.f32.mrf.mxu1 }
 0x4bc   : > { %v4235_v35 = vadd.f32 %v4234_v14, %v4185_v4 }
 0x4be   : > { %v4252_v60 = vadd.f32 %v4235_v35, %v3897_v10 }
 0x4c0   : > { %4268 = vst [vmem:[%s5633_s16 + $0x78] sm:$0xff] %v4252_v60  ;;  %v4283_v54 = vadd.f32 %v4282_v0, %v4252_v60  ;;  %v4306_v11 = vmul.f32 %v4252_v60, %v4252_v60 }
 0x4c2   : > { %v4284_v57 = vrot.slane %v4283_v54, 4  ;;  %v4321_v36 = vadd.f32 %v4320_v37, %v4306_v11 }
 0x4c4   : > { %v4285_v45 = vadd.f32 %v4284_v57, %v4283_v54  ;;  %v4322_v26 = vrot.slane %v4321_v36, 4 }
 0x4c6   : > { %v4286_v6 = vrot.slane %v4285_v45, 2  ;;  %v4323_v5 = vadd.f32 %v4322_v26, %v4321_v36 }
 0x4c8   : > { %v4287_v28 = vadd.f32 %v4286_v6, %v4285_v45  ;;  %v4324_v38 = vrot.slane %v4323_v5, 2 }
 0x4ca   : > { %v4288_v20 = vrot.slane %v4287_v28, 1  ;;  %v4325_v1 = vadd.f32 %v4324_v38, %v4323_v5 }
 0x4cc   : > { %v4289_v56 = vadd.f32 %v4288_v20, %v4287_v28  ;;  %v4326_v63 = vrot.slane %v4325_v1, 1 }
 0x4ce   : > { %4290 = vst [vmem:[%s5658_s19] sm:$0x1] %v4289_v56  ;;  %v4327_v46 = vadd.f32 %v4326_v63, %v4325_v1 }
 0x4d0   : > { %4328 = vst [vmem:[%s5658_s19 + $0x1] sm:$0x1] %v4327_v46 }
 0x4d1 PF: > { %s16_s22 = sadd.s32 1, %s5538_s22   ;;  %s7173_s18 = smov %s5530_s20 }
 0x4d2   : > { %p13_p13 = scmp.ge.s32.totalorder %s16_s22, 6   ;;  %s7174_s19 = smov %s5534_s21 }
 0x4d3   : > { %s7175_s20 = smov %s7178_s23  ;;  %s7176_s21 = smov %s7182_s24 }
 0x4d4   :  { %15 = sbr.rel (!%p13_p13) target bundleno = 3 (0x3), region = 103 }

</bundles_post_ra>
